<compile_context>
chip_gen: v7x
topology: tpu7x:2x2x1
jax: 0.10.0
libtpu: 0.0.40
codegen_flags: <defaults>
</compile_context>

<pallas_src>
import functools
import warnings

import jax
import jax.numpy as jnp
from jax.experimental import pallas as pl
from jax.experimental.pallas import tpu as pltpu

_TAPS = tuple((dy, dx) for dy in range(3) for dx in range(3))


# --------------------------------------------------------------------------- #
# Fused kernel: channel-major, lane-dense, per-tap shifted matmuls.
# --------------------------------------------------------------------------- #
def _fused_extractor_kernel(x_ref, w1_ref, b1_ref, w2_ref, b2_ref, m_ref, o_ref,
                            *, W, use_roll):
    # x_ref : (1, C_in_p, HW)   one image, channel-major, spatially flattened
    # w1_ref: (9, C_mid, C_in_p)  conv1 weights (BN1 scale folded in), per tap
    # b1_ref: (C_mid, 1)          folded conv1 bias + BN1 shift
    # w2_ref: (9, C_out, C_mid)   conv2 weights (BN2 scale folded in), per tap
    # b2_ref: (C_out, 1)
    # m_ref : (9, 1, HW)          0/1 zero-padding validity mask per tap
    # o_ref : (1, C_out, HW)      NCHW output, lane-dense store (HW lanes)

    def shift(v, off):
        # s[:, p] = v[:, p + off]; values at out-of-range p+off are irrelevant
        # (they are masked to zero afterwards).
        if off == 0:
            return v
        L = v.shape[1]
        if use_roll:
            return pltpu.roll(v, (-off) % L, axis=1)          # single XLU rotate
        # conservative variant: static slice + concat (zero fill)
        fill = jnp.zeros((v.shape[0], abs(off)), v.dtype)
        if off > 0:
            return jnp.concatenate([v[:, off:], fill], axis=1)
        return jnp.concatenate([fill, v[:, :L + off]], axis=1)

    def conv3x3(v, w_ref):
        acc = None
        for t, (dy, dx) in enumerate(_TAPS):
            off = (dy - 1) * W + (dx - 1)
            tap = shift(v, off)
            if off != 0:                       # centre tap mask is all ones
                tap = tap * m_ref[t]           # zero-padding of the 3x3 conv
            c = jnp.dot(w_ref[t], tap, preferred_element_type=jnp.float32)
            acc = c if acc is None else acc + c
        return acc

    x = x_ref[0]                                        # (C_in_p, HW)
    y1 = conv3x3(x, w1_ref) + b1_ref[...]               # conv1 + folded BN1
    y2 = conv3x3(y1, w2_ref) + b2_ref[...]              # conv2 + folded BN2
    o_ref[0] = jnp.maximum(y2, 0.0)                     # ReLU, already NCHW


def _forward(x_nchw, params, use_roll):
    w1, s1, b1, w2, s2, b2 = params
    N, C_IN, H, W = x_nchw.shape
    C_MID, C_OUT = w1.shape[-1], w2.shape[-1]
    HW = H * W
    C_IN_P = -(-C_IN // 8) * 8                 # pad conv1 K dim to sublane multiple

    # ---- input / parameter prep (all inside jit; a few KiB of work) ---------
    x = x_nchw.astype(jnp.float32).reshape(N, C_IN, HW)       # metadata reshape
    if C_IN_P != C_IN:
        x = jnp.pad(x, ((0, 0), (0, C_IN_P - C_IN), (0, 0)))

    # fold BN scale into the conv weights: (3,3,Cin,Cout) -> (9, Cout, Cin)
    w1e = (w1.astype(jnp.float32) * s1).reshape(9, C_IN, C_MID).transpose(0, 2, 1)
    if C_IN_P != C_IN:
        w1e = jnp.pad(w1e, ((0, 0), (0, 0), (0, C_IN_P - C_IN)))
    w2e = (w2.astype(jnp.float32) * s2).reshape(9, C_MID, C_OUT).transpose(0, 2, 1)
    b1c = b1.astype(jnp.float32).reshape(C_MID, 1)
    b2c = b2.astype(jnp.float32).reshape(C_OUT, 1)

    # per-tap zero-padding validity masks, shared by both convs
    p = jnp.arange(HW)
    yy, xx = p // W, p % W
    masks = jnp.stack([
        ((yy + dy - 1 >= 0) & (yy + dy - 1 < H) &
         (xx + dx - 1 >= 0) & (xx + dx - 1 < W)).astype(jnp.float32)
        for dy, dx in _TAPS]).reshape(9, 1, HW)

    kernel = functools.partial(_fused_extractor_kernel, W=W, use_roll=use_roll)

    out = pl.pallas_call(
        kernel,
        out_shape=jax.ShapeDtypeStruct((N, C_OUT, HW), jnp.float32),
        grid_spec=pltpu.PrefetchScalarGridSpec(
            num_scalar_prefetch=0,
            grid=(N,),
            in_specs=[
                pl.BlockSpec((1, C_IN_P, HW), lambda b: (b, 0, 0)),
                pl.BlockSpec((9, C_MID, C_IN_P), lambda b: (0, 0, 0)),
                pl.BlockSpec((C_MID, 1), lambda b: (0, 0)),
                pl.BlockSpec((9, C_OUT, C_MID), lambda b: (0, 0, 0)),
                pl.BlockSpec((C_OUT, 1), lambda b: (0, 0)),
                pl.BlockSpec((9, 1, HW), lambda b: (0, 0, 0)),
            ],
            out_specs=pl.BlockSpec((1, C_OUT, HW), lambda b: (b, 0, 0)),
        ),
        compiler_params=pltpu.CompilerParams(
            dimension_semantics=("parallel",)),      # one image per TC on v7x
    )(x, w1e, b1c, w2e, b2c, masks)

    return out.reshape(N, C_OUT, H, W)               # metadata-only, already NCHW


_forward_fast = jax.jit(functools.partial(_forward, use_roll=True))
_forward_safe = jax.jit(functools.partial(_forward, use_roll=False))

# Path selection cache: per input shape, chosen once (compile + run + self-check),
# then reused without any host sync or retracing.
_impl_cache = {}


def reconstructed_forward(x_nchw, params):
    key = (tuple(x_nchw.shape), str(x_nchw.dtype))
    impl = _impl_cache.get(key)
    if impl is not None:
        return impl(x_nchw, params)                  # async, no per-call sync

    # One-time (per shape) selection: validate the roll-based kernel against the
    # pure-JAX reference; fall back to the conservative shift variant otherwise.
    ref = reference_forward(x_nchw, params)
    out = None
    try:
        out = jax.block_until_ready(_forward_fast(x_nchw, params))
        ok = bool(jnp.allclose(out, ref, atol=1e-4, rtol=1e-4))
    except Exception as e:                           # lowering / runtime failure
        warnings.warn(
            f"fast Pallas path failed ({type(e).__name__}: {e}); using safe path")
        ok = False
    if ok:
        _impl_cache[key] = _forward_fast
        return out
    if out is not None:
        warnings.warn("fast Pallas path numeric mismatch; using safe path")
    _impl_cache[key] = _forward_safe
    return _forward_safe(x_nchw, params)


# --------------------------------------------------------------------------- #
# Parameters / pure-JAX reference
# --------------------------------------------------------------------------- #
def _fold_bn(bias, gamma, beta, mean, var, eps=1e-5):
    scale = gamma / jnp.sqrt(var + eps)
    shift = scale * bias + beta - scale * mean
    return scale, shift


def init_params(key, c_in, c_mid=32, c_out=3):
    ks = jax.random.split(key, 12)
    # conv weights stored as (kh, kw, C_in, C_out)
    w1 = 0.1 * jax.random.normal(ks[0], (3, 3, c_in, c_mid), jnp.float32)
    bias1 = 0.1 * jax.random.normal(ks[1], (c_mid,), jnp.float32)
    gamma1 = 1.0 + 0.1 * jax.random.normal(ks[2], (c_mid,), jnp.float32)
    beta1 = 0.1 * jax.random.normal(ks[3], (c_mid,), jnp.float32)
    mean1 = 0.1 * jax.random.normal(ks[4], (c_mid,), jnp.float32)
    var1 = 1.0 + 0.1 * jnp.abs(jax.random.normal(ks[5], (c_mid,), jnp.float32))

    w2 = 0.1 * jax.random.normal(ks[6], (3, 3, c_mid, c_out), jnp.float32)
    bias2 = 0.1 * jax.random.normal(ks[7], (c_out,), jnp.float32)
    gamma2 = 1.0 + 0.1 * jax.random.normal(ks[8], (c_out,), jnp.float32)
    beta2 = 0.1 * jax.random.normal(ks[9], (c_out,), jnp.float32)
    mean2 = 0.1 * jax.random.normal(ks[10], (c_out,), jnp.float32)
    var2 = 1.0 + 0.1 * jnp.abs(jax.random.normal(ks[11], (c_out,), jnp.float32))

    s1, b1 = _fold_bn(bias1, gamma1, beta1, mean1, var1)
    s2, b2 = _fold_bn(bias2, gamma2, beta2, mean2, var2)
    return (w1, s1, b1, w2, s2, b2)


def reference_forward(x_nchw, params):
    """Pure-JAX reference (same math, plain jnp), NCHW in -> NCHW out."""
    w1, s1, b1, w2, s2, b2 = params
    x = jnp.transpose(x_nchw, (0, 2, 3, 1)).astype(jnp.float32)

    def conv3x3(x, w):
        N, H, W, _ = x.shape
        xp = jnp.pad(x, ((0, 0), (1, 1), (1, 1), (0, 0)))
        out = 0.0
        for dy in range(3):
            for dx in range(3):
                out = out + jnp.einsum('nhwc,co->nhwo',
                                       xp[:, dy:dy + H, dx:dx + W, :], w[dy, dx])
        return out

    y1 = conv3x3(x, w1) * s1 + b1
    y2 = jnp.maximum(conv3x3(y1, w2) * s2 + b2, 0.0)
    return jnp.transpose(y2, (0, 3, 1, 2))


if __name__ == "__main__":
    key = jax.random.PRNGKey(0)
    k_x, k_p = jax.random.split(key)

    N, C_IN, H, W = 2, 4, 16, 16
    x = jax.random.normal(k_x, (N, C_IN, H, W), jnp.float32)
    params = init_params(k_p, C_IN)

    out = reconstructed_forward(x, params)
    out = jax.block_until_ready(out)

    ref = reference_forward(x, params)
    assert out.shape == (N, 3, H, W), out.shape
    assert jnp.allclose(out, ref, atol=1e-4, rtol=1e-4), \
        float(jnp.max(jnp.abs(out - ref)))

    # second call exercises the cached, sync-free fast path
    out2 = jax.block_until_ready(reconstructed_forward(x, params))
    assert jnp.allclose(out2, ref, atol=1e-4, rtol=1e-4)

    print("KERNEL_OK")
</pallas_src>

<mosaic_0001>
module attributes {stable_mosaic.version = 11 : i64} {
  func.func @_fused_extractor_kernel(%arg0: i32, %arg1: memref<1x8x256xf32, #tpu.memory_space<vmem>>, %arg2: memref<9x32x8xf32, #tpu.memory_space<vmem>>, %arg3: memref<32x1xf32, #tpu.memory_space<vmem>>, %arg4: memref<9x3x32xf32, #tpu.memory_space<vmem>>, %arg5: memref<3x1xf32, #tpu.memory_space<vmem>>, %arg6: memref<9x1x256xf32, #tpu.memory_space<vmem>>, %arg7: memref<1x3x256xf32, #tpu.memory_space<vmem>>) attributes {dimension_semantics = [#tpu.dimension_semantics<parallel>], iteration_bounds = array<i64: 2>, scalar_prefetch = 0 : i64, scratch_operands = 0 : i64, tpu.core_type = #tpu.core_type<tc>, window_params = [{transform_indices = @transform_0, window_bounds = array<i64: 1, 8, 256>}, {pipeline_mode = #tpu.pipeline_mode<synchronous>, transform_indices = @transform_1, window_bounds = array<i64: 9, 32, 8>}, {pipeline_mode = #tpu.pipeline_mode<synchronous>, transform_indices = @transform_2, window_bounds = array<i64: 32, 1>}, {pipeline_mode = #tpu.pipeline_mode<synchronous>, transform_indices = @transform_3, window_bounds = array<i64: 9, 3, 32>}, {pipeline_mode = #tpu.pipeline_mode<synchronous>, transform_indices = @transform_4, window_bounds = array<i64: 3, 1>}, {pipeline_mode = #tpu.pipeline_mode<synchronous>, transform_indices = @transform_5, window_bounds = array<i64: 9, 1, 256>}, {transform_indices = @transform_6, window_bounds = array<i64: 1, 3, 256>}]} {
    %c0 = arith.constant 0 : index
    %c0_0 = arith.constant 0 : index
    %c0_1 = arith.constant 0 : index
    %0 = vector.load %arg1[%c0, %c0_0, %c0_1] : memref<1x8x256xf32, #tpu.memory_space<vmem>>, vector<1x8x256xf32>
    %1 = vector.shape_cast %0 : vector<1x8x256xf32> to vector<8x256xf32>
    %c17_i32 = arith.constant 17 : i32
    %2 = tpu.dynamic_rotate %1 by %c17_i32 dim 1 : vector<8x256xf32>, i32 -> vector<8x256xf32>
    %c0_2 = arith.constant 0 : index
    %c0_3 = arith.constant 0 : index
    %c0_4 = arith.constant 0 : index
    %3 = vector.load %arg6[%c0_2, %c0_3, %c0_4] : memref<9x1x256xf32, #tpu.memory_space<vmem>>, vector<1x1x256xf32>
    %4 = vector.shape_cast %3 : vector<1x1x256xf32> to vector<1x256xf32>
    %5 = vector.broadcast %4 : vector<1x256xf32> to vector<8x256xf32>
    %6 = arith.mulf %2, %5 : vector<8x256xf32>
    %c0_5 = arith.constant 0 : index
    %c0_6 = arith.constant 0 : index
    %c0_7 = arith.constant 0 : index
    %7 = vector.load %arg2[%c0_5, %c0_6, %c0_7] : memref<9x32x8xf32, #tpu.memory_space<vmem>>, vector<1x32x8xf32>
    %8 = vector.shape_cast %7 : vector<1x32x8xf32> to vector<32x8xf32>
    %cst = arith.constant dense<0.000000e+00> : vector<32x256xf32>
    %9 = tpu.matmul %8, %6, %cst {dimension_numbers = #tpu.dot_dimension_numbers<[1], [0], [0], [1], [0, 0, 1, 1], [], []>} : vector<32x8xf32>, vector<8x256xf32>, vector<32x256xf32> -> vector<32x256xf32>
    %c16_i32 = arith.constant 16 : i32
    %10 = tpu.dynamic_rotate %1 by %c16_i32 dim 1 : vector<8x256xf32>, i32 -> vector<8x256xf32>
    %c1 = arith.constant 1 : index
    %c0_8 = arith.constant 0 : index
    %c0_9 = arith.constant 0 : index
    %11 = vector.load %arg6[%c1, %c0_8, %c0_9] : memref<9x1x256xf32, #tpu.memory_space<vmem>>, vector<1x1x256xf32>
    %12 = vector.shape_cast %11 : vector<1x1x256xf32> to vector<1x256xf32>
    %13 = vector.broadcast %12 : vector<1x256xf32> to vector<8x256xf32>
    %14 = arith.mulf %10, %13 : vector<8x256xf32>
    %c1_10 = arith.constant 1 : index
    %c0_11 = arith.constant 0 : index
    %c0_12 = arith.constant 0 : index
    %15 = vector.load %arg2[%c1_10, %c0_11, %c0_12] : memref<9x32x8xf32, #tpu.memory_space<vmem>>, vector<1x32x8xf32>
    %16 = vector.shape_cast %15 : vector<1x32x8xf32> to vector<32x8xf32>
    %cst_13 = arith.constant dense<0.000000e+00> : vector<32x256xf32>
    %17 = tpu.matmul %16, %14, %cst_13 {dimension_numbers = #tpu.dot_dimension_numbers<[1], [0], [0], [1], [0, 0, 1, 1], [], []>} : vector<32x8xf32>, vector<8x256xf32>, vector<32x256xf32> -> vector<32x256xf32>
    %18 = arith.addf %9, %17 : vector<32x256xf32>
    %c15_i32 = arith.constant 15 : i32
    %19 = tpu.dynamic_rotate %1 by %c15_i32 dim 1 : vector<8x256xf32>, i32 -> vector<8x256xf32>
    %c2 = arith.constant 2 : index
    %c0_14 = arith.constant 0 : index
    %c0_15 = arith.constant 0 : index
    %20 = vector.load %arg6[%c2, %c0_14, %c0_15] : memref<9x1x256xf32, #tpu.memory_space<vmem>>, vector<1x1x256xf32>
    %21 = vector.shape_cast %20 : vector<1x1x256xf32> to vector<1x256xf32>
    %22 = vector.broadcast %21 : vector<1x256xf32> to vector<8x256xf32>
    %23 = arith.mulf %19, %22 : vector<8x256xf32>
    %c2_16 = arith.constant 2 : index
    %c0_17 = arith.constant 0 : index
    %c0_18 = arith.constant 0 : index
    %24 = vector.load %arg2[%c2_16, %c0_17, %c0_18] : memref<9x32x8xf32, #tpu.memory_space<vmem>>, vector<1x32x8xf32>
    %25 = vector.shape_cast %24 : vector<1x32x8xf32> to vector<32x8xf32>
    %cst_19 = arith.constant dense<0.000000e+00> : vector<32x256xf32>
    %26 = tpu.matmul %25, %23, %cst_19 {dimension_numbers = #tpu.dot_dimension_numbers<[1], [0], [0], [1], [0, 0, 1, 1], [], []>} : vector<32x8xf32>, vector<8x256xf32>, vector<32x256xf32> -> vector<32x256xf32>
    %27 = arith.addf %18, %26 : vector<32x256xf32>
    %c1_i32 = arith.constant 1 : i32
    %28 = tpu.dynamic_rotate %1 by %c1_i32 dim 1 : vector<8x256xf32>, i32 -> vector<8x256xf32>
    %c3 = arith.constant 3 : index
    %c0_20 = arith.constant 0 : index
    %c0_21 = arith.constant 0 : index
    %29 = vector.load %arg6[%c3, %c0_20, %c0_21] : memref<9x1x256xf32, #tpu.memory_space<vmem>>, vector<1x1x256xf32>
    %30 = vector.shape_cast %29 : vector<1x1x256xf32> to vector<1x256xf32>
    %31 = vector.broadcast %30 : vector<1x256xf32> to vector<8x256xf32>
    %32 = arith.mulf %28, %31 : vector<8x256xf32>
    %c3_22 = arith.constant 3 : index
    %c0_23 = arith.constant 0 : index
    %c0_24 = arith.constant 0 : index
    %33 = vector.load %arg2[%c3_22, %c0_23, %c0_24] : memref<9x32x8xf32, #tpu.memory_space<vmem>>, vector<1x32x8xf32>
    %34 = vector.shape_cast %33 : vector<1x32x8xf32> to vector<32x8xf32>
    %cst_25 = arith.constant dense<0.000000e+00> : vector<32x256xf32>
    %35 = tpu.matmul %34, %32, %cst_25 {dimension_numbers = #tpu.dot_dimension_numbers<[1], [0], [0], [1], [0, 0, 1, 1], [], []>} : vector<32x8xf32>, vector<8x256xf32>, vector<32x256xf32> -> vector<32x256xf32>
    %36 = arith.addf %27, %35 : vector<32x256xf32>
    %c4 = arith.constant 4 : index
    %c0_26 = arith.constant 0 : index
    %c0_27 = arith.constant 0 : index
    %37 = vector.load %arg2[%c4, %c0_26, %c0_27] : memref<9x32x8xf32, #tpu.memory_space<vmem>>, vector<1x32x8xf32>
    %38 = vector.shape_cast %37 : vector<1x32x8xf32> to vector<32x8xf32>
    %cst_28 = arith.constant dense<0.000000e+00> : vector<32x256xf32>
    %39 = tpu.matmul %38, %1, %cst_28 {dimension_numbers = #tpu.dot_dimension_numbers<[1], [0], [0], [1], [0, 0, 1, 1], [], []>} : vector<32x8xf32>, vector<8x256xf32>, vector<32x256xf32> -> vector<32x256xf32>
    %40 = arith.addf %36, %39 : vector<32x256xf32>
    %c255_i32 = arith.constant 255 : i32
    %41 = tpu.dynamic_rotate %1 by %c255_i32 dim 1 : vector<8x256xf32>, i32 -> vector<8x256xf32>
    %c5 = arith.constant 5 : index
    %c0_29 = arith.constant 0 : index
    %c0_30 = arith.constant 0 : index
    %42 = vector.load %arg6[%c5, %c0_29, %c0_30] : memref<9x1x256xf32, #tpu.memory_space<vmem>>, vector<1x1x256xf32>
    %43 = vector.shape_cast %42 : vector<1x1x256xf32> to vector<1x256xf32>
    %44 = vector.broadcast %43 : vector<1x256xf32> to vector<8x256xf32>
    %45 = arith.mulf %41, %44 : vector<8x256xf32>
    %c5_31 = arith.constant 5 : index
    %c0_32 = arith.constant 0 : index
    %c0_33 = arith.constant 0 : index
    %46 = vector.load %arg2[%c5_31, %c0_32, %c0_33] : memref<9x32x8xf32, #tpu.memory_space<vmem>>, vector<1x32x8xf32>
    %47 = vector.shape_cast %46 : vector<1x32x8xf32> to vector<32x8xf32>
    %cst_34 = arith.constant dense<0.000000e+00> : vector<32x256xf32>
    %48 = tpu.matmul %47, %45, %cst_34 {dimension_numbers = #tpu.dot_dimension_numbers<[1], [0], [0], [1], [0, 0, 1, 1], [], []>} : vector<32x8xf32>, vector<8x256xf32>, vector<32x256xf32> -> vector<32x256xf32>
    %49 = arith.addf %40, %48 : vector<32x256xf32>
    %c241_i32 = arith.constant 241 : i32
    %50 = tpu.dynamic_rotate %1 by %c241_i32 dim 1 : vector<8x256xf32>, i32 -> vector<8x256xf32>
    %c6 = arith.constant 6 : index
    %c0_35 = arith.constant 0 : index
    %c0_36 = arith.constant 0 : index
    %51 = vector.load %arg6[%c6, %c0_35, %c0_36] : memref<9x1x256xf32, #tpu.memory_space<vmem>>, vector<1x1x256xf32>
    %52 = vector.shape_cast %51 : vector<1x1x256xf32> to vector<1x256xf32>
    %53 = vector.broadcast %52 : vector<1x256xf32> to vector<8x256xf32>
    %54 = arith.mulf %50, %53 : vector<8x256xf32>
    %c6_37 = arith.constant 6 : index
    %c0_38 = arith.constant 0 : index
    %c0_39 = arith.constant 0 : index
    %55 = vector.load %arg2[%c6_37, %c0_38, %c0_39] : memref<9x32x8xf32, #tpu.memory_space<vmem>>, vector<1x32x8xf32>
    %56 = vector.shape_cast %55 : vector<1x32x8xf32> to vector<32x8xf32>
    %cst_40 = arith.constant dense<0.000000e+00> : vector<32x256xf32>
    %57 = tpu.matmul %56, %54, %cst_40 {dimension_numbers = #tpu.dot_dimension_numbers<[1], [0], [0], [1], [0, 0, 1, 1], [], []>} : vector<32x8xf32>, vector<8x256xf32>, vector<32x256xf32> -> vector<32x256xf32>
    %58 = arith.addf %49, %57 : vector<32x256xf32>
    %c240_i32 = arith.constant 240 : i32
    %59 = tpu.dynamic_rotate %1 by %c240_i32 dim 1 : vector<8x256xf32>, i32 -> vector<8x256xf32>
    %c7 = arith.constant 7 : index
    %c0_41 = arith.constant 0 : index
    %c0_42 = arith.constant 0 : index
    %60 = vector.load %arg6[%c7, %c0_41, %c0_42] : memref<9x1x256xf32, #tpu.memory_space<vmem>>, vector<1x1x256xf32>
    %61 = vector.shape_cast %60 : vector<1x1x256xf32> to vector<1x256xf32>
    %62 = vector.broadcast %61 : vector<1x256xf32> to vector<8x256xf32>
    %63 = arith.mulf %59, %62 : vector<8x256xf32>
    %c7_43 = arith.constant 7 : index
    %c0_44 = arith.constant 0 : index
    %c0_45 = arith.constant 0 : index
    %64 = vector.load %arg2[%c7_43, %c0_44, %c0_45] : memref<9x32x8xf32, #tpu.memory_space<vmem>>, vector<1x32x8xf32>
    %65 = vector.shape_cast %64 : vector<1x32x8xf32> to vector<32x8xf32>
    %cst_46 = arith.constant dense<0.000000e+00> : vector<32x256xf32>
    %66 = tpu.matmul %65, %63, %cst_46 {dimension_numbers = #tpu.dot_dimension_numbers<[1], [0], [0], [1], [0, 0, 1, 1], [], []>} : vector<32x8xf32>, vector<8x256xf32>, vector<32x256xf32> -> vector<32x256xf32>
    %67 = arith.addf %58, %66 : vector<32x256xf32>
    %c239_i32 = arith.constant 239 : i32
    %68 = tpu.dynamic_rotate %1 by %c239_i32 dim 1 : vector<8x256xf32>, i32 -> vector<8x256xf32>
    %c8 = arith.constant 8 : index
    %c0_47 = arith.constant 0 : index
    %c0_48 = arith.constant 0 : index
    %69 = vector.load %arg6[%c8, %c0_47, %c0_48] : memref<9x1x256xf32, #tpu.memory_space<vmem>>, vector<1x1x256xf32>
    %70 = vector.shape_cast %69 : vector<1x1x256xf32> to vector<1x256xf32>
    %71 = vector.broadcast %70 : vector<1x256xf32> to vector<8x256xf32>
    %72 = arith.mulf %68, %71 : vector<8x256xf32>
    %c8_49 = arith.constant 8 : index
    %c0_50 = arith.constant 0 : index
    %c0_51 = arith.constant 0 : index
    %73 = vector.load %arg2[%c8_49, %c0_50, %c0_51] : memref<9x32x8xf32, #tpu.memory_space<vmem>>, vector<1x32x8xf32>
    %74 = vector.shape_cast %73 : vector<1x32x8xf32> to vector<32x8xf32>
    %cst_52 = arith.constant dense<0.000000e+00> : vector<32x256xf32>
    %75 = tpu.matmul %74, %72, %cst_52 {dimension_numbers = #tpu.dot_dimension_numbers<[1], [0], [0], [1], [0, 0, 1, 1], [], []>} : vector<32x8xf32>, vector<8x256xf32>, vector<32x256xf32> -> vector<32x256xf32>
    %76 = arith.addf %67, %75 : vector<32x256xf32>
    %c0_53 = arith.constant 0 : index
    %c0_54 = arith.constant 0 : index
    %77 = vector.load %arg3[%c0_53, %c0_54] : memref<32x1xf32, #tpu.memory_space<vmem>>, vector<32x1xf32>
    %78 = vector.broadcast %77 : vector<32x1xf32> to vector<32x256xf32>
    %79 = arith.addf %76, %78 : vector<32x256xf32>
    %c17_i32_55 = arith.constant 17 : i32
    %80 = tpu.dynamic_rotate %79 by %c17_i32_55 dim 1 : vector<32x256xf32>, i32 -> vector<32x256xf32>
    %c0_56 = arith.constant 0 : index
    %c0_57 = arith.constant 0 : index
    %c0_58 = arith.constant 0 : index
    %81 = vector.load %arg6[%c0_56, %c0_57, %c0_58] : memref<9x1x256xf32, #tpu.memory_space<vmem>>, vector<1x1x256xf32>
    %82 = vector.shape_cast %81 : vector<1x1x256xf32> to vector<1x256xf32>
    %83 = vector.broadcast %82 : vector<1x256xf32> to vector<32x256xf32>
    %84 = arith.mulf %80, %83 : vector<32x256xf32>
    %c0_59 = arith.constant 0 : index
    %c0_60 = arith.constant 0 : index
    %c0_61 = arith.constant 0 : index
    %85 = vector.load %arg4[%c0_59, %c0_60, %c0_61] : memref<9x3x32xf32, #tpu.memory_space<vmem>>, vector<1x3x32xf32>
    %86 = vector.shape_cast %85 : vector<1x3x32xf32> to vector<3x32xf32>
    %cst_62 = arith.constant dense<0.000000e+00> : vector<3x256xf32>
    %87 = tpu.matmul %86, %84, %cst_62 {dimension_numbers = #tpu.dot_dimension_numbers<[1], [0], [0], [1], [0, 0, 1, 1], [], []>} : vector<3x32xf32>, vector<32x256xf32>, vector<3x256xf32> -> vector<3x256xf32>
    %c16_i32_63 = arith.constant 16 : i32
    %88 = tpu.dynamic_rotate %79 by %c16_i32_63 dim 1 : vector<32x256xf32>, i32 -> vector<32x256xf32>
    %c1_64 = arith.constant 1 : index
    %c0_65 = arith.constant 0 : index
    %c0_66 = arith.constant 0 : index
    %89 = vector.load %arg6[%c1_64, %c0_65, %c0_66] : memref<9x1x256xf32, #tpu.memory_space<vmem>>, vector<1x1x256xf32>
    %90 = vector.shape_cast %89 : vector<1x1x256xf32> to vector<1x256xf32>
    %91 = vector.broadcast %90 : vector<1x256xf32> to vector<32x256xf32>
    %92 = arith.mulf %88, %91 : vector<32x256xf32>
    %c1_67 = arith.constant 1 : index
    %c0_68 = arith.constant 0 : index
    %c0_69 = arith.constant 0 : index
    %93 = vector.load %arg4[%c1_67, %c0_68, %c0_69] : memref<9x3x32xf32, #tpu.memory_space<vmem>>, vector<1x3x32xf32>
    %94 = vector.shape_cast %93 : vector<1x3x32xf32> to vector<3x32xf32>
    %cst_70 = arith.constant dense<0.000000e+00> : vector<3x256xf32>
    %95 = tpu.matmul %94, %92, %cst_70 {dimension_numbers = #tpu.dot_dimension_numbers<[1], [0], [0], [1], [0, 0, 1, 1], [], []>} : vector<3x32xf32>, vector<32x256xf32>, vector<3x256xf32> -> vector<3x256xf32>
    %96 = arith.addf %87, %95 : vector<3x256xf32>
    %c15_i32_71 = arith.constant 15 : i32
    %97 = tpu.dynamic_rotate %79 by %c15_i32_71 dim 1 : vector<32x256xf32>, i32 -> vector<32x256xf32>
    %c2_72 = arith.constant 2 : index
    %c0_73 = arith.constant 0 : index
    %c0_74 = arith.constant 0 : index
    %98 = vector.load %arg6[%c2_72, %c0_73, %c0_74] : memref<9x1x256xf32, #tpu.memory_space<vmem>>, vector<1x1x256xf32>
    %99 = vector.shape_cast %98 : vector<1x1x256xf32> to vector<1x256xf32>
    %100 = vector.broadcast %99 : vector<1x256xf32> to vector<32x256xf32>
    %101 = arith.mulf %97, %100 : vector<32x256xf32>
    %c2_75 = arith.constant 2 : index
    %c0_76 = arith.constant 0 : index
    %c0_77 = arith.constant 0 : index
    %102 = vector.load %arg4[%c2_75, %c0_76, %c0_77] : memref<9x3x32xf32, #tpu.memory_space<vmem>>, vector<1x3x32xf32>
    %103 = vector.shape_cast %102 : vector<1x3x32xf32> to vector<3x32xf32>
    %cst_78 = arith.constant dense<0.000000e+00> : vector<3x256xf32>
    %104 = tpu.matmul %103, %101, %cst_78 {dimension_numbers = #tpu.dot_dimension_numbers<[1], [0], [0], [1], [0, 0, 1, 1], [], []>} : vector<3x32xf32>, vector<32x256xf32>, vector<3x256xf32> -> vector<3x256xf32>
    %105 = arith.addf %96, %104 : vector<3x256xf32>
    %c1_i32_79 = arith.constant 1 : i32
    %106 = tpu.dynamic_rotate %79 by %c1_i32_79 dim 1 : vector<32x256xf32>, i32 -> vector<32x256xf32>
    %c3_80 = arith.constant 3 : index
    %c0_81 = arith.constant 0 : index
    %c0_82 = arith.constant 0 : index
    %107 = vector.load %arg6[%c3_80, %c0_81, %c0_82] : memref<9x1x256xf32, #tpu.memory_space<vmem>>, vector<1x1x256xf32>
    %108 = vector.shape_cast %107 : vector<1x1x256xf32> to vector<1x256xf32>
    %109 = vector.broadcast %108 : vector<1x256xf32> to vector<32x256xf32>
    %110 = arith.mulf %106, %109 : vector<32x256xf32>
    %c3_83 = arith.constant 3 : index
    %c0_84 = arith.constant 0 : index
    %c0_85 = arith.constant 0 : index
    %111 = vector.load %arg4[%c3_83, %c0_84, %c0_85] : memref<9x3x32xf32, #tpu.memory_space<vmem>>, vector<1x3x32xf32>
    %112 = vector.shape_cast %111 : vector<1x3x32xf32> to vector<3x32xf32>
    %cst_86 = arith.constant dense<0.000000e+00> : vector<3x256xf32>
    %113 = tpu.matmul %112, %110, %cst_86 {dimension_numbers = #tpu.dot_dimension_numbers<[1], [0], [0], [1], [0, 0, 1, 1], [], []>} : vector<3x32xf32>, vector<32x256xf32>, vector<3x256xf32> -> vector<3x256xf32>
    %114 = arith.addf %105, %113 : vector<3x256xf32>
    %c4_87 = arith.constant 4 : index
    %c0_88 = arith.constant 0 : index
    %c0_89 = arith.constant 0 : index
    %115 = vector.load %arg4[%c4_87, %c0_88, %c0_89] : memref<9x3x32xf32, #tpu.memory_space<vmem>>, vector<1x3x32xf32>
    %116 = vector.shape_cast %115 : vector<1x3x32xf32> to vector<3x32xf32>
    %cst_90 = arith.constant dense<0.000000e+00> : vector<3x256xf32>
    %117 = tpu.matmul %116, %79, %cst_90 {dimension_numbers = #tpu.dot_dimension_numbers<[1], [0], [0], [1], [0, 0, 1, 1], [], []>} : vector<3x32xf32>, vector<32x256xf32>, vector<3x256xf32> -> vector<3x256xf32>
    %118 = arith.addf %114, %117 : vector<3x256xf32>
    %c255_i32_91 = arith.constant 255 : i32
    %119 = tpu.dynamic_rotate %79 by %c255_i32_91 dim 1 : vector<32x256xf32>, i32 -> vector<32x256xf32>
    %c5_92 = arith.constant 5 : index
    %c0_93 = arith.constant 0 : index
    %c0_94 = arith.constant 0 : index
    %120 = vector.load %arg6[%c5_92, %c0_93, %c0_94] : memref<9x1x256xf32, #tpu.memory_space<vmem>>, vector<1x1x256xf32>
    %121 = vector.shape_cast %120 : vector<1x1x256xf32> to vector<1x256xf32>
    %122 = vector.broadcast %121 : vector<1x256xf32> to vector<32x256xf32>
    %123 = arith.mulf %119, %122 : vector<32x256xf32>
    %c5_95 = arith.constant 5 : index
    %c0_96 = arith.constant 0 : index
    %c0_97 = arith.constant 0 : index
    %124 = vector.load %arg4[%c5_95, %c0_96, %c0_97] : memref<9x3x32xf32, #tpu.memory_space<vmem>>, vector<1x3x32xf32>
    %125 = vector.shape_cast %124 : vector<1x3x32xf32> to vector<3x32xf32>
    %cst_98 = arith.constant dense<0.000000e+00> : vector<3x256xf32>
    %126 = tpu.matmul %125, %123, %cst_98 {dimension_numbers = #tpu.dot_dimension_numbers<[1], [0], [0], [1], [0, 0, 1, 1], [], []>} : vector<3x32xf32>, vector<32x256xf32>, vector<3x256xf32> -> vector<3x256xf32>
    %127 = arith.addf %118, %126 : vector<3x256xf32>
    %c241_i32_99 = arith.constant 241 : i32
    %128 = tpu.dynamic_rotate %79 by %c241_i32_99 dim 1 : vector<32x256xf32>, i32 -> vector<32x256xf32>
    %c6_100 = arith.constant 6 : index
    %c0_101 = arith.constant 0 : index
    %c0_102 = arith.constant 0 : index
    %129 = vector.load %arg6[%c6_100, %c0_101, %c0_102] : memref<9x1x256xf32, #tpu.memory_space<vmem>>, vector<1x1x256xf32>
    %130 = vector.shape_cast %129 : vector<1x1x256xf32> to vector<1x256xf32>
    %131 = vector.broadcast %130 : vector<1x256xf32> to vector<32x256xf32>
    %132 = arith.mulf %128, %131 : vector<32x256xf32>
    %c6_103 = arith.constant 6 : index
    %c0_104 = arith.constant 0 : index
    %c0_105 = arith.constant 0 : index
    %133 = vector.load %arg4[%c6_103, %c0_104, %c0_105] : memref<9x3x32xf32, #tpu.memory_space<vmem>>, vector<1x3x32xf32>
    %134 = vector.shape_cast %133 : vector<1x3x32xf32> to vector<3x32xf32>
    %cst_106 = arith.constant dense<0.000000e+00> : vector<3x256xf32>
    %135 = tpu.matmul %134, %132, %cst_106 {dimension_numbers = #tpu.dot_dimension_numbers<[1], [0], [0], [1], [0, 0, 1, 1], [], []>} : vector<3x32xf32>, vector<32x256xf32>, vector<3x256xf32> -> vector<3x256xf32>
    %136 = arith.addf %127, %135 : vector<3x256xf32>
    %c240_i32_107 = arith.constant 240 : i32
    %137 = tpu.dynamic_rotate %79 by %c240_i32_107 dim 1 : vector<32x256xf32>, i32 -> vector<32x256xf32>
    %c7_108 = arith.constant 7 : index
    %c0_109 = arith.constant 0 : index
    %c0_110 = arith.constant 0 : index
    %138 = vector.load %arg6[%c7_108, %c0_109, %c0_110] : memref<9x1x256xf32, #tpu.memory_space<vmem>>, vector<1x1x256xf32>
    %139 = vector.shape_cast %138 : vector<1x1x256xf32> to vector<1x256xf32>
    %140 = vector.broadcast %139 : vector<1x256xf32> to vector<32x256xf32>
    %141 = arith.mulf %137, %140 : vector<32x256xf32>
    %c7_111 = arith.constant 7 : index
    %c0_112 = arith.constant 0 : index
    %c0_113 = arith.constant 0 : index
    %142 = vector.load %arg4[%c7_111, %c0_112, %c0_113] : memref<9x3x32xf32, #tpu.memory_space<vmem>>, vector<1x3x32xf32>
    %143 = vector.shape_cast %142 : vector<1x3x32xf32> to vector<3x32xf32>
    %cst_114 = arith.constant dense<0.000000e+00> : vector<3x256xf32>
    %144 = tpu.matmul %143, %141, %cst_114 {dimension_numbers = #tpu.dot_dimension_numbers<[1], [0], [0], [1], [0, 0, 1, 1], [], []>} : vector<3x32xf32>, vector<32x256xf32>, vector<3x256xf32> -> vector<3x256xf32>
    %145 = arith.addf %136, %144 : vector<3x256xf32>
    %c239_i32_115 = arith.constant 239 : i32
    %146 = tpu.dynamic_rotate %79 by %c239_i32_115 dim 1 : vector<32x256xf32>, i32 -> vector<32x256xf32>
    %c8_116 = arith.constant 8 : index
    %c0_117 = arith.constant 0 : index
    %c0_118 = arith.constant 0 : index
    %147 = vector.load %arg6[%c8_116, %c0_117, %c0_118] : memref<9x1x256xf32, #tpu.memory_space<vmem>>, vector<1x1x256xf32>
    %148 = vector.shape_cast %147 : vector<1x1x256xf32> to vector<1x256xf32>
    %149 = vector.broadcast %148 : vector<1x256xf32> to vector<32x256xf32>
    %150 = arith.mulf %146, %149 : vector<32x256xf32>
    %c8_119 = arith.constant 8 : index
    %c0_120 = arith.constant 0 : index
    %c0_121 = arith.constant 0 : index
    %151 = vector.load %arg4[%c8_119, %c0_120, %c0_121] : memref<9x3x32xf32, #tpu.memory_space<vmem>>, vector<1x3x32xf32>
    %152 = vector.shape_cast %151 : vector<1x3x32xf32> to vector<3x32xf32>
    %cst_122 = arith.constant dense<0.000000e+00> : vector<3x256xf32>
    %153 = tpu.matmul %152, %150, %cst_122 {dimension_numbers = #tpu.dot_dimension_numbers<[1], [0], [0], [1], [0, 0, 1, 1], [], []>} : vector<3x32xf32>, vector<32x256xf32>, vector<3x256xf32> -> vector<3x256xf32>
    %154 = arith.addf %145, %153 : vector<3x256xf32>
    %c0_123 = arith.constant 0 : index
    %c0_124 = arith.constant 0 : index
    %155 = vector.load %arg5[%c0_123, %c0_124] : memref<3x1xf32, #tpu.memory_space<vmem>>, vector<3x1xf32>
    %156 = vector.broadcast %155 : vector<3x1xf32> to vector<3x256xf32>
    %157 = arith.addf %154, %156 : vector<3x256xf32>
    %cst_125 = arith.constant 0.000000e+00 : f32
    %158 = vector.broadcast %cst_125 : f32 to vector<3x256xf32>
    %159 = arith.maximumf %157, %158 : vector<3x256xf32>
    %c0_126 = arith.constant 0 : index
    %c0_127 = arith.constant 0 : index
    %c0_128 = arith.constant 0 : index
    %160 = vector.load %arg7[%c0_126, %c0_127, %c0_128] : memref<1x3x256xf32, #tpu.memory_space<vmem>>, vector<1x3x256xf32>
    %161 = vector.shape_cast %160 : vector<1x3x256xf32> to vector<3x256xf32>
    %162 = vector.shape_cast %159 : vector<3x256xf32> to vector<1x3x256xf32>
    tpu.vector_store %arg7[%c0_126, %c0_127, %c0_128], %162 {strides = array<i32>} : memref<1x3x256xf32, #tpu.memory_space<vmem>>, vector<1x3x256xf32>,
    return
  }
  func.func @transform_0(%arg0: i32) -> (i32, i32, i32) {
    %c0_i32 = arith.constant 0 : i32
    %c0_i32_0 = arith.constant 0 : i32
    %c0_i32_1 = arith.constant 0 : i32
    return %arg0, %c0_i32, %c0_i32_0 : i32, i32, i32
  }
  func.func @transform_1(%arg0: i32) -> (i32, i32, i32) {
    %c0_i32 = arith.constant 0 : i32
    %c0_i32_0 = arith.constant 0 : i32
    %c0_i32_1 = arith.constant 0 : i32
    %c0_i32_2 = arith.constant 0 : i32
    return %c0_i32, %c0_i32_0, %c0_i32_1 : i32, i32, i32
  }
  func.func @transform_2(%arg0: i32) -> (i32, i32) {
    %c0_i32 = arith.constant 0 : i32
    %c0_i32_0 = arith.constant 0 : i32
    %c0_i32_1 = arith.constant 0 : i32
    return %c0_i32, %c0_i32_0 : i32, i32
  }
  func.func @transform_3(%arg0: i32) -> (i32, i32, i32) {
    %c0_i32 = arith.constant 0 : i32
    %c0_i32_0 = arith.constant 0 : i32
    %c0_i32_1 = arith.constant 0 : i32
    %c0_i32_2 = arith.constant 0 : i32
    return %c0_i32, %c0_i32_0, %c0_i32_1 : i32, i32, i32
  }
  func.func @transform_4(%arg0: i32) -> (i32, i32) {
    %c0_i32 = arith.constant 0 : i32
    %c0_i32_0 = arith.constant 0 : i32
    %c0_i32_1 = arith.constant 0 : i32
    return %c0_i32, %c0_i32_0 : i32, i32
  }
  func.func @transform_5(%arg0: i32) -> (i32, i32, i32) {
    %c0_i32 = arith.constant 0 : i32
    %c0_i32_0 = arith.constant 0 : i32
    %c0_i32_1 = arith.constant 0 : i32
    %c0_i32_2 = arith.constant 0 : i32
    return %c0_i32, %c0_i32_0, %c0_i32_1 : i32, i32, i32
  }
  func.func @transform_6(%arg0: i32) -> (i32, i32, i32) {
    %c0_i32 = arith.constant 0 : i32
    %c0_i32_0 = arith.constant 0 : i32
    %c0_i32_1 = arith.constant 0 : i32
    return %arg0, %c0_i32, %c0_i32_0 : i32, i32, i32
  }
}

module attributes {stable_mosaic.version = 11 : i64} {
  func.func @_fused_extractor_kernel(%arg0: i32, %arg1: memref<1x8x256xf32, #tpu.memory_space<vmem>>, %arg2: memref<9x32x8xf32, #tpu.memory_space<vmem>>, %arg3: memref<32x1xf32, #tpu.memory_space<vmem>>, %arg4: memref<9x3x32xf32, #tpu.memory_space<vmem>>, %arg5: memref<3x1xf32, #tpu.memory_space<vmem>>, %arg6: memref<9x1x256xf32, #tpu.memory_space<vmem>>, %arg7: memref<1x3x256xf32, #tpu.memory_space<vmem>>) attributes {dimension_semantics = [#tpu.dimension_semantics<parallel>], iteration_bounds = array<i64: 2>, scalar_prefetch = 0 : i64, scratch_operands = 0 : i64, tpu.core_type = #tpu.core_type<tc>, window_params = [{transform_indices = @transform_0, window_bounds = array<i64: 1, 8, 256>}, {pipeline_mode = #tpu.pipeline_mode<synchronous>, transform_indices = @transform_1, window_bounds = array<i64: 9, 32, 8>}, {pipeline_mode = #tpu.pipeline_mode<synchronous>, transform_indices = @transform_2, window_bounds = array<i64: 32, 1>}, {pipeline_mode = #tpu.pipeline_mode<synchronous>, transform_indices = @transform_3, window_bounds = array<i64: 9, 3, 32>}, {pipeline_mode = #tpu.pipeline_mode<synchronous>, transform_indices = @transform_4, window_bounds = array<i64: 3, 1>}, {pipeline_mode = #tpu.pipeline_mode<synchronous>, transform_indices = @transform_5, window_bounds = array<i64: 9, 1, 256>}, {transform_indices = @transform_6, window_bounds = array<i64: 1, 3, 256>}]} {
    %c0 = arith.constant 0 : index
    %c0_0 = arith.constant 0 : index
    %c0_1 = arith.constant 0 : index
    %0 = vector.load %arg1[%c0, %c0_0, %c0_1] : memref<1x8x256xf32, #tpu.memory_space<vmem>>, vector<1x8x256xf32>
    %1 = vector.shape_cast %0 : vector<1x8x256xf32> to vector<8x256xf32>
    %cst = arith.constant 0.000000e+00 : f32
    %2 = vector.broadcast %cst : f32 to vector<8x17xf32>
    %3 = vector.extract_strided_slice %1 {offsets = [0, 0], sizes = [8, 239], strides = [1, 1]} : vector<8x256xf32> to vector<8x239xf32>
    %4 = tpu.concatenate %2, %3 in 1 : vector<8x17xf32>, vector<8x239xf32> -> vector<8x256xf32>
    %c0_2 = arith.constant 0 : index
    %c0_3 = arith.constant 0 : index
    %c0_4 = arith.constant 0 : index
    %5 = vector.load %arg6[%c0_2, %c0_3, %c0_4] : memref<9x1x256xf32, #tpu.memory_space<vmem>>, vector<1x1x256xf32>
    %6 = vector.shape_cast %5 : vector<1x1x256xf32> to vector<1x256xf32>
    %7 = vector.broadcast %6 : vector<1x256xf32> to vector<8x256xf32>
    %8 = arith.mulf %4, %7 : vector<8x256xf32>
    %c0_5 = arith.constant 0 : index
    %c0_6 = arith.constant 0 : index
    %c0_7 = arith.constant 0 : index
    %9 = vector.load %arg2[%c0_5, %c0_6, %c0_7] : memref<9x32x8xf32, #tpu.memory_space<vmem>>, vector<1x32x8xf32>
    %10 = vector.shape_cast %9 : vector<1x32x8xf32> to vector<32x8xf32>
    %cst_8 = arith.constant dense<0.000000e+00> : vector<32x256xf32>
    %11 = tpu.matmul %10, %8, %cst_8 {dimension_numbers = #tpu.dot_dimension_numbers<[1], [0], [0], [1], [0, 0, 1, 1], [], []>} : vector<32x8xf32>, vector<8x256xf32>, vector<32x256xf32> -> vector<32x256xf32>
    %cst_9 = arith.constant 0.000000e+00 : f32
    %12 = vector.broadcast %cst_9 : f32 to vector<8x16xf32>
    %13 = vector.extract_strided_slice %1 {offsets = [0, 0], sizes = [8, 240], strides = [1, 1]} : vector<8x256xf32> to vector<8x240xf32>
    %14 = tpu.concatenate %12, %13 in 1 : vector<8x16xf32>, vector<8x240xf32> -> vector<8x256xf32>
    %c1 = arith.constant 1 : index
    %c0_10 = arith.constant 0 : index
    %c0_11 = arith.constant 0 : index
    %15 = vector.load %arg6[%c1, %c0_10, %c0_11] : memref<9x1x256xf32, #tpu.memory_space<vmem>>, vector<1x1x256xf32>
    %16 = vector.shape_cast %15 : vector<1x1x256xf32> to vector<1x256xf32>
    %17 = vector.broadcast %16 : vector<1x256xf32> to vector<8x256xf32>
    %18 = arith.mulf %14, %17 : vector<8x256xf32>
    %c1_12 = arith.constant 1 : index
    %c0_13 = arith.constant 0 : index
    %c0_14 = arith.constant 0 : index
    %19 = vector.load %arg2[%c1_12, %c0_13, %c0_14] : memref<9x32x8xf32, #tpu.memory_space<vmem>>, vector<1x32x8xf32>
    %20 = vector.shape_cast %19 : vector<1x32x8xf32> to vector<32x8xf32>
    %cst_15 = arith.constant dense<0.000000e+00> : vector<32x256xf32>
    %21 = tpu.matmul %20, %18, %cst_15 {dimension_numbers = #tpu.dot_dimension_numbers<[1], [0], [0], [1], [0, 0, 1, 1], [], []>} : vector<32x8xf32>, vector<8x256xf32>, vector<32x256xf32> -> vector<32x256xf32>
    %22 = arith.addf %11, %21 : vector<32x256xf32>
    %cst_16 = arith.constant 0.000000e+00 : f32
    %23 = vector.broadcast %cst_16 : f32 to vector<8x15xf32>
    %24 = vector.extract_strided_slice %1 {offsets = [0, 0], sizes = [8, 241], strides = [1, 1]} : vector<8x256xf32> to vector<8x241xf32>
    %25 = tpu.concatenate %23, %24 in 1 : vector<8x15xf32>, vector<8x241xf32> -> vector<8x256xf32>
    %c2 = arith.constant 2 : index
    %c0_17 = arith.constant 0 : index
    %c0_18 = arith.constant 0 : index
    %26 = vector.load %arg6[%c2, %c0_17, %c0_18] : memref<9x1x256xf32, #tpu.memory_space<vmem>>, vector<1x1x256xf32>
    %27 = vector.shape_cast %26 : vector<1x1x256xf32> to vector<1x256xf32>
    %28 = vector.broadcast %27 : vector<1x256xf32> to vector<8x256xf32>
    %29 = arith.mulf %25, %28 : vector<8x256xf32>
    %c2_19 = arith.constant 2 : index
    %c0_20 = arith.constant 0 : index
    %c0_21 = arith.constant 0 : index
    %30 = vector.load %arg2[%c2_19, %c0_20, %c0_21] : memref<9x32x8xf32, #tpu.memory_space<vmem>>, vector<1x32x8xf32>
    %31 = vector.shape_cast %30 : vector<1x32x8xf32> to vector<32x8xf32>
    %cst_22 = arith.constant dense<0.000000e+00> : vector<32x256xf32>
    %32 = tpu.matmul %31, %29, %cst_22 {dimension_numbers = #tpu.dot_dimension_numbers<[1], [0], [0], [1], [0, 0, 1, 1], [], []>} : vector<32x8xf32>, vector<8x256xf32>, vector<32x256xf32> -> vector<32x256xf32>
    %33 = arith.addf %22, %32 : vector<32x256xf32>
    %cst_23 = arith.constant 0.000000e+00 : f32
    %34 = vector.broadcast %cst_23 : f32 to vector<8x1xf32>
    %35 = vector.extract_strided_slice %1 {offsets = [0, 0], sizes = [8, 255], strides = [1, 1]} : vector<8x256xf32> to vector<8x255xf32>
    %36 = tpu.concatenate %34, %35 in 1 : vector<8x1xf32>, vector<8x255xf32> -> vector<8x256xf32>
    %c3 = arith.constant 3 : index
    %c0_24 = arith.constant 0 : index
    %c0_25 = arith.constant 0 : index
    %37 = vector.load %arg6[%c3, %c0_24, %c0_25] : memref<9x1x256xf32, #tpu.memory_space<vmem>>, vector<1x1x256xf32>
    %38 = vector.shape_cast %37 : vector<1x1x256xf32> to vector<1x256xf32>
    %39 = vector.broadcast %38 : vector<1x256xf32> to vector<8x256xf32>
    %40 = arith.mulf %36, %39 : vector<8x256xf32>
    %c3_26 = arith.constant 3 : index
    %c0_27 = arith.constant 0 : index
    %c0_28 = arith.constant 0 : index
    %41 = vector.load %arg2[%c3_26, %c0_27, %c0_28] : memref<9x32x8xf32, #tpu.memory_space<vmem>>, vector<1x32x8xf32>
    %42 = vector.shape_cast %41 : vector<1x32x8xf32> to vector<32x8xf32>
    %cst_29 = arith.constant dense<0.000000e+00> : vector<32x256xf32>
    %43 = tpu.matmul %42, %40, %cst_29 {dimension_numbers = #tpu.dot_dimension_numbers<[1], [0], [0], [1], [0, 0, 1, 1], [], []>} : vector<32x8xf32>, vector<8x256xf32>, vector<32x256xf32> -> vector<32x256xf32>
    %44 = arith.addf %33, %43 : vector<32x256xf32>
    %c4 = arith.constant 4 : index
    %c0_30 = arith.constant 0 : index
    %c0_31 = arith.constant 0 : index
    %45 = vector.load %arg2[%c4, %c0_30, %c0_31] : memref<9x32x8xf32, #tpu.memory_space<vmem>>, vector<1x32x8xf32>
    %46 = vector.shape_cast %45 : vector<1x32x8xf32> to vector<32x8xf32>
    %cst_32 = arith.constant dense<0.000000e+00> : vector<32x256xf32>
    %47 = tpu.matmul %46, %1, %cst_32 {dimension_numbers = #tpu.dot_dimension_numbers<[1], [0], [0], [1], [0, 0, 1, 1], [], []>} : vector<32x8xf32>, vector<8x256xf32>, vector<32x256xf32> -> vector<32x256xf32>
    %48 = arith.addf %44, %47 : vector<32x256xf32>
    %cst_33 = arith.constant 0.000000e+00 : f32
    %49 = vector.broadcast %cst_33 : f32 to vector<8x1xf32>
    %50 = vector.extract_strided_slice %1 {offsets = [0, 1], sizes = [8, 255], strides = [1, 1]} : vector<8x256xf32> to vector<8x255xf32>
    %51 = tpu.concatenate %50, %49 in 1 : vector<8x255xf32>, vector<8x1xf32> -> vector<8x256xf32>
    %c5 = arith.constant 5 : index
    %c0_34 = arith.constant 0 : index
    %c0_35 = arith.constant 0 : index
    %52 = vector.load %arg6[%c5, %c0_34, %c0_35] : memref<9x1x256xf32, #tpu.memory_space<vmem>>, vector<1x1x256xf32>
    %53 = vector.shape_cast %52 : vector<1x1x256xf32> to vector<1x256xf32>
    %54 = vector.broadcast %53 : vector<1x256xf32> to vector<8x256xf32>
    %55 = arith.mulf %51, %54 : vector<8x256xf32>
    %c5_36 = arith.constant 5 : index
    %c0_37 = arith.constant 0 : index
    %c0_38 = arith.constant 0 : index
    %56 = vector.load %arg2[%c5_36, %c0_37, %c0_38] : memref<9x32x8xf32, #tpu.memory_space<vmem>>, vector<1x32x8xf32>
    %57 = vector.shape_cast %56 : vector<1x32x8xf32> to vector<32x8xf32>
    %cst_39 = arith.constant dense<0.000000e+00> : vector<32x256xf32>
    %58 = tpu.matmul %57, %55, %cst_39 {dimension_numbers = #tpu.dot_dimension_numbers<[1], [0], [0], [1], [0, 0, 1, 1], [], []>} : vector<32x8xf32>, vector<8x256xf32>, vector<32x256xf32> -> vector<32x256xf32>
    %59 = arith.addf %48, %58 : vector<32x256xf32>
    %cst_40 = arith.constant 0.000000e+00 : f32
    %60 = vector.broadcast %cst_40 : f32 to vector<8x15xf32>
    %61 = vector.extract_strided_slice %1 {offsets = [0, 15], sizes = [8, 241], strides = [1, 1]} : vector<8x256xf32> to vector<8x241xf32>
    %62 = tpu.concatenate %61, %60 in 1 : vector<8x241xf32>, vector<8x15xf32> -> vector<8x256xf32>
    %c6 = arith.constant 6 : index
    %c0_41 = arith.constant 0 : index
    %c0_42 = arith.constant 0 : index
    %63 = vector.load %arg6[%c6, %c0_41, %c0_42] : memref<9x1x256xf32, #tpu.memory_space<vmem>>, vector<1x1x256xf32>
    %64 = vector.shape_cast %63 : vector<1x1x256xf32> to vector<1x256xf32>
    %65 = vector.broadcast %64 : vector<1x256xf32> to vector<8x256xf32>
    %66 = arith.mulf %62, %65 : vector<8x256xf32>
    %c6_43 = arith.constant 6 : index
    %c0_44 = arith.constant 0 : index
    %c0_45 = arith.constant 0 : index
    %67 = vector.load %arg2[%c6_43, %c0_44, %c0_45] : memref<9x32x8xf32, #tpu.memory_space<vmem>>, vector<1x32x8xf32>
    %68 = vector.shape_cast %67 : vector<1x32x8xf32> to vector<32x8xf32>
    %cst_46 = arith.constant dense<0.000000e+00> : vector<32x256xf32>
    %69 = tpu.matmul %68, %66, %cst_46 {dimension_numbers = #tpu.dot_dimension_numbers<[1], [0], [0], [1], [0, 0, 1, 1], [], []>} : vector<32x8xf32>, vector<8x256xf32>, vector<32x256xf32> -> vector<32x256xf32>
    %70 = arith.addf %59, %69 : vector<32x256xf32>
    %cst_47 = arith.constant 0.000000e+00 : f32
    %71 = vector.broadcast %cst_47 : f32 to vector<8x16xf32>
    %72 = vector.extract_strided_slice %1 {offsets = [0, 16], sizes = [8, 240], strides = [1, 1]} : vector<8x256xf32> to vector<8x240xf32>
    %73 = tpu.concatenate %72, %71 in 1 : vector<8x240xf32>, vector<8x16xf32> -> vector<8x256xf32>
    %c7 = arith.constant 7 : index
    %c0_48 = arith.constant 0 : index
    %c0_49 = arith.constant 0 : index
    %74 = vector.load %arg6[%c7, %c0_48, %c0_49] : memref<9x1x256xf32, #tpu.memory_space<vmem>>, vector<1x1x256xf32>
    %75 = vector.shape_cast %74 : vector<1x1x256xf32> to vector<1x256xf32>
    %76 = vector.broadcast %75 : vector<1x256xf32> to vector<8x256xf32>
    %77 = arith.mulf %73, %76 : vector<8x256xf32>
    %c7_50 = arith.constant 7 : index
    %c0_51 = arith.constant 0 : index
    %c0_52 = arith.constant 0 : index
    %78 = vector.load %arg2[%c7_50, %c0_51, %c0_52] : memref<9x32x8xf32, #tpu.memory_space<vmem>>, vector<1x32x8xf32>
    %79 = vector.shape_cast %78 : vector<1x32x8xf32> to vector<32x8xf32>
    %cst_53 = arith.constant dense<0.000000e+00> : vector<32x256xf32>
    %80 = tpu.matmul %79, %77, %cst_53 {dimension_numbers = #tpu.dot_dimension_numbers<[1], [0], [0], [1], [0, 0, 1, 1], [], []>} : vector<32x8xf32>, vector<8x256xf32>, vector<32x256xf32> -> vector<32x256xf32>
    %81 = arith.addf %70, %80 : vector<32x256xf32>
    %cst_54 = arith.constant 0.000000e+00 : f32
    %82 = vector.broadcast %cst_54 : f32 to vector<8x17xf32>
    %83 = vector.extract_strided_slice %1 {offsets = [0, 17], sizes = [8, 239], strides = [1, 1]} : vector<8x256xf32> to vector<8x239xf32>
    %84 = tpu.concatenate %83, %82 in 1 : vector<8x239xf32>, vector<8x17xf32> -> vector<8x256xf32>
    %c8 = arith.constant 8 : index
    %c0_55 = arith.constant 0 : index
    %c0_56 = arith.constant 0 : index
    %85 = vector.load %arg6[%c8, %c0_55, %c0_56] : memref<9x1x256xf32, #tpu.memory_space<vmem>>, vector<1x1x256xf32>
    %86 = vector.shape_cast %85 : vector<1x1x256xf32> to vector<1x256xf32>
    %87 = vector.broadcast %86 : vector<1x256xf32> to vector<8x256xf32>
    %88 = arith.mulf %84, %87 : vector<8x256xf32>
    %c8_57 = arith.constant 8 : index
    %c0_58 = arith.constant 0 : index
    %c0_59 = arith.constant 0 : index
    %89 = vector.load %arg2[%c8_57, %c0_58, %c0_59] : memref<9x32x8xf32, #tpu.memory_space<vmem>>, vector<1x32x8xf32>
    %90 = vector.shape_cast %89 : vector<1x32x8xf32> to vector<32x8xf32>
    %cst_60 = arith.constant dense<0.000000e+00> : vector<32x256xf32>
    %91 = tpu.matmul %90, %88, %cst_60 {dimension_numbers = #tpu.dot_dimension_numbers<[1], [0], [0], [1], [0, 0, 1, 1], [], []>} : vector<32x8xf32>, vector<8x256xf32>, vector<32x256xf32> -> vector<32x256xf32>
    %92 = arith.addf %81, %91 : vector<32x256xf32>
    %c0_61 = arith.constant 0 : index
    %c0_62 = arith.constant 0 : index
    %93 = vector.load %arg3[%c0_61, %c0_62] : memref<32x1xf32, #tpu.memory_space<vmem>>, vector<32x1xf32>
    %94 = vector.broadcast %93 : vector<32x1xf32> to vector<32x256xf32>
    %95 = arith.addf %92, %94 : vector<32x256xf32>
    %cst_63 = arith.constant 0.000000e+00 : f32
    %96 = vector.broadcast %cst_63 : f32 to vector<32x17xf32>
    %97 = vector.extract_strided_slice %95 {offsets = [0, 0], sizes = [32, 239], strides = [1, 1]} : vector<32x256xf32> to vector<32x239xf32>
    %98 = tpu.concatenate %96, %97 in 1 : vector<32x17xf32>, vector<32x239xf32> -> vector<32x256xf32>
    %c0_64 = arith.constant 0 : index
    %c0_65 = arith.constant 0 : index
    %c0_66 = arith.constant 0 : index
    %99 = vector.load %arg6[%c0_64, %c0_65, %c0_66] : memref<9x1x256xf32, #tpu.memory_space<vmem>>, vector<1x1x256xf32>
    %100 = vector.shape_cast %99 : vector<1x1x256xf32> to vector<1x256xf32>
    %101 = vector.broadcast %100 : vector<1x256xf32> to vector<32x256xf32>
    %102 = arith.mulf %98, %101 : vector<32x256xf32>
    %c0_67 = arith.constant 0 : index
    %c0_68 = arith.constant 0 : index
    %c0_69 = arith.constant 0 : index
    %103 = vector.load %arg4[%c0_67, %c0_68, %c0_69] : memref<9x3x32xf32, #tpu.memory_space<vmem>>, vector<1x3x32xf32>
    %104 = vector.shape_cast %103 : vector<1x3x32xf32> to vector<3x32xf32>
    %cst_70 = arith.constant dense<0.000000e+00> : vector<3x256xf32>
    %105 = tpu.matmul %104, %102, %cst_70 {dimension_numbers = #tpu.dot_dimension_numbers<[1], [0], [0], [1], [0, 0, 1, 1], [], []>} : vector<3x32xf32>, vector<32x256xf32>, vector<3x256xf32> -> vector<3x256xf32>
    %cst_71 = arith.constant 0.000000e+00 : f32
    %106 = vector.broadcast %cst_71 : f32 to vector<32x16xf32>
    %107 = vector.extract_strided_slice %95 {offsets = [0, 0], sizes = [32, 240], strides = [1, 1]} : vector<32x256xf32> to vector<32x240xf32>
    %108 = tpu.concatenate %106, %107 in 1 : vector<32x16xf32>, vector<32x240xf32> -> vector<32x256xf32>
    %c1_72 = arith.constant 1 : index
    %c0_73 = arith.constant 0 : index
    %c0_74 = arith.constant 0 : index
    %109 = vector.load %arg6[%c1_72, %c0_73, %c0_74] : memref<9x1x256xf32, #tpu.memory_space<vmem>>, vector<1x1x256xf32>
    %110 = vector.shape_cast %109 : vector<1x1x256xf32> to vector<1x256xf32>
    %111 = vector.broadcast %110 : vector<1x256xf32> to vector<32x256xf32>
    %112 = arith.mulf %108, %111 : vector<32x256xf32>
    %c1_75 = arith.constant 1 : index
    %c0_76 = arith.constant 0 : index
    %c0_77 = arith.constant 0 : index
    %113 = vector.load %arg4[%c1_75, %c0_76, %c0_77] : memref<9x3x32xf32, #tpu.memory_space<vmem>>, vector<1x3x32xf32>
    %114 = vector.shape_cast %113 : vector<1x3x32xf32> to vector<3x32xf32>
    %cst_78 = arith.constant dense<0.000000e+00> : vector<3x256xf32>
    %115 = tpu.matmul %114, %112, %cst_78 {dimension_numbers = #tpu.dot_dimension_numbers<[1], [0], [0], [1], [0, 0, 1, 1], [], []>} : vector<3x32xf32>, vector<32x256xf32>, vector<3x256xf32> -> vector<3x256xf32>
    %116 = arith.addf %105, %115 : vector<3x256xf32>
    %cst_79 = arith.constant 0.000000e+00 : f32
    %117 = vector.broadcast %cst_79 : f32 to vector<32x15xf32>
    %118 = vector.extract_strided_slice %95 {offsets = [0, 0], sizes = [32, 241], strides = [1, 1]} : vector<32x256xf32> to vector<32x241xf32>
    %119 = tpu.concatenate %117, %118 in 1 : vector<32x15xf32>, vector<32x241xf32> -> vector<32x256xf32>
    %c2_80 = arith.constant 2 : index
    %c0_81 = arith.constant 0 : index
    %c0_82 = arith.constant 0 : index
    %120 = vector.load %arg6[%c2_80, %c0_81, %c0_82] : memref<9x1x256xf32, #tpu.memory_space<vmem>>, vector<1x1x256xf32>
    %121 = vector.shape_cast %120 : vector<1x1x256xf32> to vector<1x256xf32>
    %122 = vector.broadcast %121 : vector<1x256xf32> to vector<32x256xf32>
    %123 = arith.mulf %119, %122 : vector<32x256xf32>
    %c2_83 = arith.constant 2 : index
    %c0_84 = arith.constant 0 : index
    %c0_85 = arith.constant 0 : index
    %124 = vector.load %arg4[%c2_83, %c0_84, %c0_85] : memref<9x3x32xf32, #tpu.memory_space<vmem>>, vector<1x3x32xf32>
    %125 = vector.shape_cast %124 : vector<1x3x32xf32> to vector<3x32xf32>
    %cst_86 = arith.constant dense<0.000000e+00> : vector<3x256xf32>
    %126 = tpu.matmul %125, %123, %cst_86 {dimension_numbers = #tpu.dot_dimension_numbers<[1], [0], [0], [1], [0, 0, 1, 1], [], []>} : vector<3x32xf32>, vector<32x256xf32>, vector<3x256xf32> -> vector<3x256xf32>
    %127 = arith.addf %116, %126 : vector<3x256xf32>
    %cst_87 = arith.constant 0.000000e+00 : f32
    %128 = vector.broadcast %cst_87 : f32 to vector<32x1xf32>
    %129 = vector.extract_strided_slice %95 {offsets = [0, 0], sizes = [32, 255], strides = [1, 1]} : vector<32x256xf32> to vector<32x255xf32>
    %130 = tpu.concatenate %128, %129 in 1 : vector<32x1xf32>, vector<32x255xf32> -> vector<32x256xf32>
    %c3_88 = arith.constant 3 : index
    %c0_89 = arith.constant 0 : index
    %c0_90 = arith.constant 0 : index
    %131 = vector.load %arg6[%c3_88, %c0_89, %c0_90] : memref<9x1x256xf32, #tpu.memory_space<vmem>>, vector<1x1x256xf32>
    %132 = vector.shape_cast %131 : vector<1x1x256xf32> to vector<1x256xf32>
    %133 = vector.broadcast %132 : vector<1x256xf32> to vector<32x256xf32>
    %134 = arith.mulf %130, %133 : vector<32x256xf32>
    %c3_91 = arith.constant 3 : index
    %c0_92 = arith.constant 0 : index
    %c0_93 = arith.constant 0 : index
    %135 = vector.load %arg4[%c3_91, %c0_92, %c0_93] : memref<9x3x32xf32, #tpu.memory_space<vmem>>, vector<1x3x32xf32>
    %136 = vector.shape_cast %135 : vector<1x3x32xf32> to vector<3x32xf32>
    %cst_94 = arith.constant dense<0.000000e+00> : vector<3x256xf32>
    %137 = tpu.matmul %136, %134, %cst_94 {dimension_numbers = #tpu.dot_dimension_numbers<[1], [0], [0], [1], [0, 0, 1, 1], [], []>} : vector<3x32xf32>, vector<32x256xf32>, vector<3x256xf32> -> vector<3x256xf32>
    %138 = arith.addf %127, %137 : vector<3x256xf32>
    %c4_95 = arith.constant 4 : index
    %c0_96 = arith.constant 0 : index
    %c0_97 = arith.constant 0 : index
    %139 = vector.load %arg4[%c4_95, %c0_96, %c0_97] : memref<9x3x32xf32, #tpu.memory_space<vmem>>, vector<1x3x32xf32>
    %140 = vector.shape_cast %139 : vector<1x3x32xf32> to vector<3x32xf32>
    %cst_98 = arith.constant dense<0.000000e+00> : vector<3x256xf32>
    %141 = tpu.matmul %140, %95, %cst_98 {dimension_numbers = #tpu.dot_dimension_numbers<[1], [0], [0], [1], [0, 0, 1, 1], [], []>} : vector<3x32xf32>, vector<32x256xf32>, vector<3x256xf32> -> vector<3x256xf32>
    %142 = arith.addf %138, %141 : vector<3x256xf32>
    %cst_99 = arith.constant 0.000000e+00 : f32
    %143 = vector.broadcast %cst_99 : f32 to vector<32x1xf32>
    %144 = vector.extract_strided_slice %95 {offsets = [0, 1], sizes = [32, 255], strides = [1, 1]} : vector<32x256xf32> to vector<32x255xf32>
    %145 = tpu.concatenate %144, %143 in 1 : vector<32x255xf32>, vector<32x1xf32> -> vector<32x256xf32>
    %c5_100 = arith.constant 5 : index
    %c0_101 = arith.constant 0 : index
    %c0_102 = arith.constant 0 : index
    %146 = vector.load %arg6[%c5_100, %c0_101, %c0_102] : memref<9x1x256xf32, #tpu.memory_space<vmem>>, vector<1x1x256xf32>
    %147 = vector.shape_cast %146 : vector<1x1x256xf32> to vector<1x256xf32>
    %148 = vector.broadcast %147 : vector<1x256xf32> to vector<32x256xf32>
    %149 = arith.mulf %145, %148 : vector<32x256xf32>
    %c5_103 = arith.constant 5 : index
    %c0_104 = arith.constant 0 : index
    %c0_105 = arith.constant 0 : index
    %150 = vector.load %arg4[%c5_103, %c0_104, %c0_105] : memref<9x3x32xf32, #tpu.memory_space<vmem>>, vector<1x3x32xf32>
    %151 = vector.shape_cast %150 : vector<1x3x32xf32> to vector<3x32xf32>
    %cst_106 = arith.constant dense<0.000000e+00> : vector<3x256xf32>
    %152 = tpu.matmul %151, %149, %cst_106 {dimension_numbers = #tpu.dot_dimension_numbers<[1], [0], [0], [1], [0, 0, 1, 1], [], []>} : vector<3x32xf32>, vector<32x256xf32>, vector<3x256xf32> -> vector<3x256xf32>
    %153 = arith.addf %142, %152 : vector<3x256xf32>
    %cst_107 = arith.constant 0.000000e+00 : f32
    %154 = vector.broadcast %cst_107 : f32 to vector<32x15xf32>
    %155 = vector.extract_strided_slice %95 {offsets = [0, 15], sizes = [32, 241], strides = [1, 1]} : vector<32x256xf32> to vector<32x241xf32>
    %156 = tpu.concatenate %155, %154 in 1 : vector<32x241xf32>, vector<32x15xf32> -> vector<32x256xf32>
    %c6_108 = arith.constant 6 : index
    %c0_109 = arith.constant 0 : index
    %c0_110 = arith.constant 0 : index
    %157 = vector.load %arg6[%c6_108, %c0_109, %c0_110] : memref<9x1x256xf32, #tpu.memory_space<vmem>>, vector<1x1x256xf32>
    %158 = vector.shape_cast %157 : vector<1x1x256xf32> to vector<1x256xf32>
    %159 = vector.broadcast %158 : vector<1x256xf32> to vector<32x256xf32>
    %160 = arith.mulf %156, %159 : vector<32x256xf32>
    %c6_111 = arith.constant 6 : index
    %c0_112 = arith.constant 0 : index
    %c0_113 = arith.constant 0 : index
    %161 = vector.load %arg4[%c6_111, %c0_112, %c0_113] : memref<9x3x32xf32, #tpu.memory_space<vmem>>, vector<1x3x32xf32>
    %162 = vector.shape_cast %161 : vector<1x3x32xf32> to vector<3x32xf32>
    %cst_114 = arith.constant dense<0.000000e+00> : vector<3x256xf32>
    %163 = tpu.matmul %162, %160, %cst_114 {dimension_numbers = #tpu.dot_dimension_numbers<[1], [0], [0], [1], [0, 0, 1, 1], [], []>} : vector<3x32xf32>, vector<32x256xf32>, vector<3x256xf32> -> vector<3x256xf32>
    %164 = arith.addf %153, %163 : vector<3x256xf32>
    %cst_115 = arith.constant 0.000000e+00 : f32
    %165 = vector.broadcast %cst_115 : f32 to vector<32x16xf32>
    %166 = vector.extract_strided_slice %95 {offsets = [0, 16], sizes = [32, 240], strides = [1, 1]} : vector<32x256xf32> to vector<32x240xf32>
    %167 = tpu.concatenate %166, %165 in 1 : vector<32x240xf32>, vector<32x16xf32> -> vector<32x256xf32>
    %c7_116 = arith.constant 7 : index
    %c0_117 = arith.constant 0 : index
    %c0_118 = arith.constant 0 : index
    %168 = vector.load %arg6[%c7_116, %c0_117, %c0_118] : memref<9x1x256xf32, #tpu.memory_space<vmem>>, vector<1x1x256xf32>
    %169 = vector.shape_cast %168 : vector<1x1x256xf32> to vector<1x256xf32>
    %170 = vector.broadcast %169 : vector<1x256xf32> to vector<32x256xf32>
    %171 = arith.mulf %167, %170 : vector<32x256xf32>
    %c7_119 = arith.constant 7 : index
    %c0_120 = arith.constant 0 : index
    %c0_121 = arith.constant 0 : index
    %172 = vector.load %arg4[%c7_119, %c0_120, %c0_121] : memref<9x3x32xf32, #tpu.memory_space<vmem>>, vector<1x3x32xf32>
    %173 = vector.shape_cast %172 : vector<1x3x32xf32> to vector<3x32xf32>
    %cst_122 = arith.constant dense<0.000000e+00> : vector<3x256xf32>
    %174 = tpu.matmul %173, %171, %cst_122 {dimension_numbers = #tpu.dot_dimension_numbers<[1], [0], [0], [1], [0, 0, 1, 1], [], []>} : vector<3x32xf32>, vector<32x256xf32>, vector<3x256xf32> -> vector<3x256xf32>
    %175 = arith.addf %164, %174 : vector<3x256xf32>
    %cst_123 = arith.constant 0.000000e+00 : f32
    %176 = vector.broadcast %cst_123 : f32 to vector<32x17xf32>
    %177 = vector.extract_strided_slice %95 {offsets = [0, 17], sizes = [32, 239], strides = [1, 1]} : vector<32x256xf32> to vector<32x239xf32>
    %178 = tpu.concatenate %177, %176 in 1 : vector<32x239xf32>, vector<32x17xf32> -> vector<32x256xf32>
    %c8_124 = arith.constant 8 : index
    %c0_125 = arith.constant 0 : index
    %c0_126 = arith.constant 0 : index
    %179 = vector.load %arg6[%c8_124, %c0_125, %c0_126] : memref<9x1x256xf32, #tpu.memory_space<vmem>>, vector<1x1x256xf32>
    %180 = vector.shape_cast %179 : vector<1x1x256xf32> to vector<1x256xf32>
    %181 = vector.broadcast %180 : vector<1x256xf32> to vector<32x256xf32>
    %182 = arith.mulf %178, %181 : vector<32x256xf32>
    %c8_127 = arith.constant 8 : index
    %c0_128 = arith.constant 0 : index
    %c0_129 = arith.constant 0 : index
    %183 = vector.load %arg4[%c8_127, %c0_128, %c0_129] : memref<9x3x32xf32, #tpu.memory_space<vmem>>, vector<1x3x32xf32>
    %184 = vector.shape_cast %183 : vector<1x3x32xf32> to vector<3x32xf32>
    %cst_130 = arith.constant dense<0.000000e+00> : vector<3x256xf32>
    %185 = tpu.matmul %184, %182, %cst_130 {dimension_numbers = #tpu.dot_dimension_numbers<[1], [0], [0], [1], [0, 0, 1, 1], [], []>} : vector<3x32xf32>, vector<32x256xf32>, vector<3x256xf32> -> vector<3x256xf32>
    %186 = arith.addf %175, %185 : vector<3x256xf32>
    %c0_131 = arith.constant 0 : index
    %c0_132 = arith.constant 0 : index
    %187 = vector.load %arg5[%c0_131, %c0_132] : memref<3x1xf32, #tpu.memory_space<vmem>>, vector<3x1xf32>
    %188 = vector.broadcast %187 : vector<3x1xf32> to vector<3x256xf32>
    %189 = arith.addf %186, %188 : vector<3x256xf32>
    %cst_133 = arith.constant 0.000000e+00 : f32
    %190 = vector.broadcast %cst_133 : f32 to vector<3x256xf32>
    %191 = arith.maximumf %189, %190 : vector<3x256xf32>
    %c0_134 = arith.constant 0 : index
    %c0_135 = arith.constant 0 : index
    %c0_136 = arith.constant 0 : index
    %192 = vector.load %arg7[%c0_134, %c0_135, %c0_136] : memref<1x3x256xf32, #tpu.memory_space<vmem>>, vector<1x3x256xf32>
    %193 = vector.shape_cast %192 : vector<1x3x256xf32> to vector<3x256xf32>
    %194 = vector.shape_cast %191 : vector<3x256xf32> to vector<1x3x256xf32>
    tpu.vector_store %arg7[%c0_134, %c0_135, %c0_136], %194 {strides = array<i32>} : memref<1x3x256xf32, #tpu.memory_space<vmem>>, vector<1x3x256xf32>,
    return
  }
  func.func @transform_0(%arg0: i32) -> (i32, i32, i32) {
    %c0_i32 = arith.constant 0 : i32
    %c0_i32_0 = arith.constant 0 : i32
    %c0_i32_1 = arith.constant 0 : i32
    return %arg0, %c0_i32, %c0_i32_0 : i32, i32, i32
  }
  func.func @transform_1(%arg0: i32) -> (i32, i32, i32) {
    %c0_i32 = arith.constant 0 : i32
    %c0_i32_0 = arith.constant 0 : i32
    %c0_i32_1 = arith.constant 0 : i32
    %c0_i32_2 = arith.constant 0 : i32
    return %c0_i32, %c0_i32_0, %c0_i32_1 : i32, i32, i32
  }
  func.func @transform_2(%arg0: i32) -> (i32, i32) {
    %c0_i32 = arith.constant 0 : i32
    %c0_i32_0 = arith.constant 0 : i32
    %c0_i32_1 = arith.constant 0 : i32
    return %c0_i32, %c0_i32_0 : i32, i32
  }
  func.func @transform_3(%arg0: i32) -> (i32, i32, i32) {
    %c0_i32 = arith.constant 0 : i32
    %c0_i32_0 = arith.constant 0 : i32
    %c0_i32_1 = arith.constant 0 : i32
    %c0_i32_2 = arith.constant 0 : i32
    return %c0_i32, %c0_i32_0, %c0_i32_1 : i32, i32, i32
  }
  func.func @transform_4(%arg0: i32) -> (i32, i32) {
    %c0_i32 = arith.constant 0 : i32
    %c0_i32_0 = arith.constant 0 : i32
    %c0_i32_1 = arith.constant 0 : i32
    return %c0_i32, %c0_i32_0 : i32, i32
  }
  func.func @transform_5(%arg0: i32) -> (i32, i32, i32) {
    %c0_i32 = arith.constant 0 : i32
    %c0_i32_0 = arith.constant 0 : i32
    %c0_i32_1 = arith.constant 0 : i32
    %c0_i32_2 = arith.constant 0 : i32
    return %c0_i32, %c0_i32_0, %c0_i32_1 : i32, i32, i32
  }
  func.func @transform_6(%arg0: i32) -> (i32, i32, i32) {
    %c0_i32 = arith.constant 0 : i32
    %c0_i32_0 = arith.constant 0 : i32
    %c0_i32_1 = arith.constant 0 : i32
    return %arg0, %c0_i32, %c0_i32_0 : i32, i32, i32
  }
}

</mosaic_0001>

<bundles_post_ra>
// kernel: _forward.1
= control target key start
LH: loop header
LB: loop body
LE: loop exit
PB: predicated region body
PF: predicated region fallthrough
CT: control target
= control target key end

     0   :  { %s2827_s21 = smov 0   ;;  %s3745_s0 = inlined_call_operand.vmem [shape: f32[2,8,256], index: 0, kind: input, shape index: {}]   ;;  %s3746_s1 = inlined_call_operand.vmem [shape: f32[9,32,8], index: 1, kind: input, shape index: {}]   ;;  %s3747_s2 = inlined_call_operand.vmem [shape: f32[32,1], index: 2, kind: input, shape index: {}]   ;;  %s3748_s3 = inlined_call_operand.vmem [shape: f32[9,3,32], index: 3, kind: input, shape index: {}]   ;;  %s3749_s4 = inlined_call_operand.vmem [shape: f32[3,1], index: 4, kind: input, shape index: {}]   ;;  %s3750_s5 = inlined_call_operand.vmem [shape: f32[9,1,256], index: 5, kind: input, shape index: {}]   ;;  %s3751_s6 = inlined_call_operand.vmem [shape: f32[2,3,256], index: 6, kind: output, shape index: {}]  }
   0x1 LB: > { %s2497_s22 = sadd.s32 4294967295, %s2780_s21   ;;  %p2501_p0 = scmp.ge.s32.totalorder %s2780_s21, 1  ;;  %s2780_s21 = sphi %s2827_s21, %s16_s21  }
   0x2   : > { %p212_p1 = scmp.lt.s32.totalorder %s2780_s21, 3 }
   0x4   : > { %p213_p2 = pnand %p2501_p0, %p212_p1 }
   0x6   : > { %216 = sbr.rel (%p213_p2) target bundleno = 927 (0x39f), region = 44 }
   0xd   : > { %p242_p3 = scmp.lt.s32.totalorder %s2497_s22, 1  ;;  %v3752_v0 = vmov 0.0   ;;  %s2783_s27 = smov 15   ;;  %v258_v3 = vlaneseq  ;;  %v1442_v4 = vld [vmem:[%s3747_s2 + $0x8] sm:$0xff]  ;;  %v1441_v5 = vld [vmem:[%s3747_s2] sm:$0xff]  ;;  %v2791_v6 = vmov 0  }
   0xe   : > { %614 = vmatprep.mubr.f32.mxu0 %v3752_v0  ;;  %385 = vmatprep.mubr.f32.mxu1 %v3752_v0  ;;  %s2784_s28 = smov 1   ;;  %s2785_s29 = smov 127   ;;  %v1443_v7 = vld [vmem:[%s3747_s2 + $0x10] sm:$0xff]  ;;  %v1444_v8 = vld [vmem:[%s3747_s2 + $0x18] sm:$0xff]  ;;  %v2528_v13 = vld [vmem:[%s3750_s5 + $0x6] sm:$0x3] }
   0xf   : > { %s3777_s22 = smov (!%p242_p3, %s2497_s22), 1  ;;  %s2786_s30 = smov 113   ;;  %2773 = vset.pattern.permute.xlu1 %v2791_v6  ;;  %2772 = vset.pattern.permute.xlu0 %v2791_v6  ;;  %v266_v9 = vshrl.u32 %v258_v3, 7  ;;  %v2891_v10 = vand.u32 127, %v258_v3  ;;  %v2519_v14 = vld [vmem:[%s3750_s5 + $0x4] sm:$0x3] }
  0x10   : > { %s2600_s23 = sshll.u32 %s3777_s22, 4  ;;  %s2787_s7 = smov 16   ;;  %vm308_vm2 = vcmask 64512   ;;  %v2520_v31 = vld [vmem:[%s3746_s1 + $0x40] sm:$0xff]  ;;  %v2521_v34 = vld [vmem:[%s3746_s1 + $0x48] sm:$0xff]  ;;  %v2522_v40 = vld [vmem:[%s3746_s1 + $0x50] sm:$0xff] }
  0x11   : > { %s246_s26 = scalar_lea.vmem %s3745_s0, %s2600_s23  ;;  %s2788_s8 = smov 112   ;;  %v2893_v11 = vsub.s32 0, %v266_v9  ;;  %v2895_v12 = vsub.s32 1, %v266_v9  ;;  %vm515_vm0 = vcmp.lt.s32.totalorder %v2891_v10, 15  ;;  %vm651_vm1 = vcmp.lt.s32.totalorder %v2891_v10, 1  ;;  %v2523_v48 = vld [vmem:[%s3746_s1 + $0x58] sm:$0xff] }
  0x12   : > { %v2843_v1 = vld [vmem:[%s246_s26] sm:$0xff]  ;;  %v2849_v2 = vld [vmem:[%s246_s26 + $0x8] sm:$0xff]  ;;  %s2789_s9 = smov 17   ;;  %s2790_s10 = smov 111   ;;  %vm285_vm3 = vcmp.lt.s32.totalorder %v2891_v10, 16  ;;  %vm901_vm4 = vcmp.lt.s32.totalorder %v2891_v10, 127 }
  0x13   : > { %511 = vrot.lane.b32.xlu0 %v2843_v1, %s2783_s27  ;;  %647 = vrot.lane.b32.xlu1 %v2843_v1, %s2784_s28  ;;  %v2906_v17 = vrot.slane %v2528_v13, %v2895_v12  ;;  %v2909_v18 = vrot.slane %v2519_v14, %v2895_v12  ;;  %v2912_v19 = vrot.slane %v2519_v14, %v2893_v11  ;;  %v2506_v35 = vld [vmem:[%s3750_s5 + $0x2] sm:$0x3]  ;;  %v2545_v43 = vld [vmem:[%s3750_s5 + $0xa] sm:$0x3]  ;;  %vm260_vm5 = vcmp.lt.s32.totalorder %v2891_v10, 17  ;;  %s2601_s23 = sshll.u32 %s3777_s22, 3 }
  0x14   : > { %v2915_v20 = vrot.slane %v2528_v13, %v2893_v11  ;;  %v2952_v38 = vrot.slane %v2506_v35, %v2895_v12  ;;  %v2955_v39 = vrot.slane %v2506_v35, %v2893_v11  ;;  %v2507_v49 = vld [vmem:[%s3746_s1 + $0x20] sm:$0xff]  ;;  %v2983_v51 = vrot.slane %v2545_v43, %v2895_v12  ;;  %v2508_v57 = vld [vmem:[%s3746_s1 + $0x28] sm:$0xff]  ;;  %v2510_v6 = vld [vmem:[%s3746_s1 + $0x38] sm:$0xff] }
  0x15   : > { %v263_v50 = vld [vmem:[%s3750_s5] sm:$0x3]  ;;  %v2530_v3 = vld [vmem:[%s3746_s1 + $0x68] sm:$0xff]  ;;  %vm1037_vm6 = vcmp.lt.s32.totalorder %v2891_v10, 113  ;;  %v3049_v9 = vrot.slane %v2545_v43, %v2893_v11  ;;  %vm1173_vm7 = vcmp.lt.s32.totalorder %v2891_v10, 112  ;;  %vm1309_vm8 = vcmp.lt.s32.totalorder %v2891_v10, 111 }
  0x16   : > { %v2997_v55 = vrot.slane %v263_v50, %v2895_v12  ;;  %v2529_v56 = vld [vmem:[%s3746_s1 + $0x60] sm:$0xff]  ;;  %v3009_v60 = vrot.slane %v263_v50, %v2893_v11  ;;  %vm1540_vm9 = vcmask 261120  }
  0x17   : > { %513 = vrot.lane.b32.xlu0 %v2849_v2, %s2783_s27  ;;  %649 = vrot.lane.b32.xlu1 %v2849_v2, %s2784_s28  ;;  %v277_v13 = vld [vmem:[%s3746_s1] sm:$0xff] }
  0x18   : > { %v2596_v10 = vld [vmem:[%s3748_s3 + $0x20] sm:$0x7] }
  0x1b   : > { %899 = vrot.lane.b32.xlu1 %v2849_v2, %s2785_s29  ;;  %897 = vrot.lane.b32.xlu0 %v2843_v1, %s2785_s29 }
  0x1f   : > { %1035 = vrot.lane.b32.xlu1 %v2849_v2, %s2786_s30  ;;  %1033 = vrot.lane.b32.xlu0 %v2843_v1, %s2786_s30 }
  0x23   : > { %283 = vrot.lane.b32.xlu1 %v2849_v2, %s2787_s7  ;;  %281 = vrot.lane.b32.xlu0 %v2843_v1, %s2787_s7 }
  0x27   : > { %1171 = vrot.lane.b32.xlu1 %v2849_v2, %s2788_s8  ;;  %1169 = vrot.lane.b32.xlu0 %v2843_v1, %s2788_s8 }
  0x2b   : > { %256 = vrot.lane.b32.xlu1 %v2849_v2, %s2789_s9  ;;  %254 = vrot.lane.b32.xlu0 %v2843_v1, %s2789_s9 }
  0x2f   : > { %1307 = vrot.lane.b32.xlu1 %v2849_v2, %s2790_s10  ;;  %1305 = vrot.lane.b32.xlu0 %v2843_v1, %s2790_s10 }
  0x33   : > { %1452 = vperm.xlu1 %2773, %v1442_v4   ;;  %1447 = vperm.xlu0 %2772, %v1441_v5   ;;  %v2509_v4 = vld [vmem:[%s3746_s1 + $0x30] sm:$0xff] }
  0x37   : > { %1457 = vperm.xlu1 %2773, %v1443_v7   ;;  %1462 = vperm.xlu0 %2772, %v1444_v8   ;;  %v2554_v7 = vld [vmem:[%s3750_s5 + $0xc] sm:$0x3]  ;;  %v2532_v8 = vld [vmem:[%s3746_s1 + $0x78] sm:$0xff] }
  0x85   : > { %v512_v15 = vpop.permute.xlu0 %511  ;;  %v648_v16 = vpop.permute.xlu1 %647 }
  0x89   : > { %v514_v21 = vpop.permute.xlu0 %513  ;;  %v650_v22 = vpop.permute.xlu1 %649 }
  0x8a   : > { %v517_v23 = vsel %vm515_vm0, %v514_v21, %v512_v15  ;;  %v652_v24 = vsel %vm651_vm1, %v648_v16, %v650_v22  ;;  %v653_v25 = vsel %vm651_vm1, %v650_v22, %v648_v16  ;;  %v516_v26 = vsel %vm515_vm0, %v512_v15, %v514_v21  ;;  %v2537_v22 = vld [vmem:[%s3746_s1 + $0x80] sm:$0xff] }
  0x8b   : > { %v668_v27 = vmul.f32 %v2906_v17, %v652_v24  ;;  %v532_v28 = vmul.f32 %v2909_v18, %v516_v26  ;;  %v531_v29 = vmul.f32 %v2912_v19, %v517_v23  ;;  %v667_v30 = vmul.f32 %v2915_v20, %v653_v25  ;;  %v278_v23 = vld [vmem:[%s3746_s1 + $0x8] sm:$0xff]  ;;  %v279_v26 = vld [vmem:[%s3746_s1 + $0x10] sm:$0xff] }
  0x8c   : > { %v3060_v15 = vrot.slane %v2554_v7, %v2895_v12  ;;  %v2538_v25 = vld [vmem:[%s3746_s1 + $0x88] sm:$0xff] }
  0x8d   : > { %550 = vmatprep.subr.mxu0 %v532_v28  ;;  %v2932_v32 = vpop.permute.xlu1 %899  ;;  %v2934_v33 = vpop.permute.xlu0 %897  ;;  %v280_v28 = vld [vmem:[%s3746_s1 + $0x18] sm:$0xff] }
  0x8e   : > { %551 = vmatpush1.msra.mxu0 %v531_v29  ;;  %v903_v54 = vsel %vm901_vm4, %v2932_v32, %v2934_v33  ;;  %v902_v14 = vsel %vm901_vm4, %v2934_v33, %v2932_v32  ;;  %v2563_v29 = vld [vmem:[%s3750_s5 + $0xe] sm:$0x3] }
  0x8f   : > { %2524 = vmatmul.mubr.msk.f32.vlgmr.msra.gmra.mrb[0].mxu0 %vm308_vm2, %v2520_v31  ;;  %686 = vmatprep.subr.mxu0 %v668_v27  ;;  %v918_v58 = vmul.f32 %v2983_v51, %v903_v54  ;;  %v917_v21 = vmul.f32 %v3049_v9, %v902_v14  ;;  %v2539_v27 = vld [vmem:[%s3746_s1 + $0x90] sm:$0xff]  ;;  %v3109_v31 = vrot.slane %v2554_v7, %v2893_v11  ;;  %v2555_v54 = vld [vmem:[%s3746_s1 + $0xc0] sm:$0xff] }
  0x90   : > { %687 = vmatpush1.msra.mxu0 %v667_v30  ;;  %620 = vmatprep.mubr.f32.mxu0 %v3752_v0  ;;  %v2540_v30 = vld [vmem:[%s3746_s1 + $0x98] sm:$0xff]  ;;  %v3117_v33 = vrot.slane %v2563_v29, %v2895_v12 }
  0x91   : > { %800 = vmatprep.subr.mxu0 %v2849_v2  ;;  %v2945_v36 = vpop.permute.xlu1 %1035  ;;  %v2947_v37 = vpop.permute.xlu0 %1033 }
  0x92   : > { %v1039_v16 = vsel %vm1037_vm6, %v2945_v36, %v2947_v37  ;;  %v1038_v32 = vsel %vm1037_vm6, %v2947_v37, %v2945_v36  ;;  %3762 = vst [vmem:[#allocation2_spill] sm:$0xff] %v3117_v33  ;;  %v2547_v37 = vld [vmem:[%s3746_s1 + $0xa8] sm:$0xff] }
  0x93   : > { %2525 = vmatmul.mubr.msk.f32.gmra.mrb[2].mxu0 %vm308_vm2, %v2521_v34  ;;  %v1054_v24 = vmul.f32 %v3060_v15, %v1039_v16  ;;  %v1053_v35 = vmul.f32 %v3109_v31, %v1038_v32 }
  0x94   : > { %626 = vmatprep.mubr.f32.mxu0 %v3752_v0 }
  0x95   : > { %v284_v41 = vpop.permute.xlu1 %283  ;;  %v282_v42 = vpop.permute.xlu0 %281 }
  0x96   : > { %v287_v44 = vsel %vm285_vm3, %v284_v41, %v282_v42  ;;  %v286_v45 = vsel %vm285_vm3, %v282_v42, %v284_v41  ;;  %v2548_v41 = vld [vmem:[%s3746_s1 + $0xb0] sm:$0xff] }
  0x97   : > { %2526 = vmatmul.mubr.msk.f32.gmra.mrb[4].mxu0 %vm308_vm2, %v2522_v40  ;;  %v302_v46 = vmul.f32 %v2952_v38, %v286_v45  ;;  %v301_v47 = vmul.f32 %v2955_v39, %v287_v44  ;;  %v2546_v40 = vld [vmem:[%s3746_s1 + $0xa0] sm:$0xff]  ;;  %v2572_v42 = vld [vmem:[%s3750_s5 + $0x10] sm:$0x3]  ;;  %v2549_v45 = vld [vmem:[%s3746_s1 + $0xb8] sm:$0xff] }
  0x98   : > { %632 = vmatprep.mubr.f32.mxu0 %v3752_v0 }
  0x99   : > { %321 = vmatprep.subr.mxu1 %v302_v46  ;;  %v2985_v52 = vpop.permute.xlu1 %1171  ;;  %v2987_v53 = vpop.permute.xlu0 %1169  ;;  %v3150_v46 = vrot.slane %v2563_v29, %v2893_v11 }
  0x9a   : > { %322 = vmatpush1.msra.mxu1 %v301_v47  ;;  %v1175_v34 = vsel %vm1173_vm7, %v2985_v52, %v2987_v53  ;;  %v1174_v47 = vsel %vm1173_vm7, %v2987_v53, %v2985_v52  ;;  %v2557_v52 = vld [vmem:[%s3746_s1 + $0xd0] sm:$0xff]  ;;  %v2558_v53 = vld [vmem:[%s3746_s1 + $0xd8] sm:$0xff] }
  0x9b   : > { %2527 = vmatmul.mubr.msk.f32.gmra.mrb[6].mxu0 %vm308_vm2, %v2523_v48  ;;  %2511 = vmatmul.mubr.msk.f32.vlgmr.msra.gmra.mrb[0].mxu1 %vm308_vm2, %v2507_v49  ;;  %v1190_v36 = vmul.f32 %v3117_v33, %v1175_v34  ;;  %3763 = vst [vmem:[#allocation3_spill] sm:$0xff] %v3150_v46  ;;  %v3157_v48 = vrot.slane %v2572_v42, %v2895_v12  ;;  %v2556_v12 = vld [vmem:[%s3746_s1 + $0xc8] sm:$0xff] }
  0x9c   : > { %750 = vmatprep.mubr.f32.mxu0 %v3752_v0  ;;  %391 = vmatprep.mubr.f32.mxu1 %v3752_v0  ;;  %v1189_v50 = vmul.f32 %v3150_v46, %v1174_v47 }
  0x9d   : > { %v257_v59 = vpop.permute.xlu1 %256  ;;  %v255_v61 = vpop.permute.xlu0 %254  ;;  %3764 = vst [vmem:[#allocation4_spill] sm:$0xff] %v3157_v48 }
  0x9e   : > { %v261_v62 = vsel %vm260_vm5, %v255_v61, %v257_v59  ;;  %v262_v63 = vsel %vm260_vm5, %v257_v59, %v255_v61  ;;  %v2564_v61 = vld [vmem:[%s3746_s1 + $0xe0] sm:$0xff] }
  0x9f   : > { %2533 = vmatmul.mubr.msk.f32.vlgmr.msra.gmra.mrb[0].mxu0 %vm308_vm2, %v2529_v56  ;;  %2512 = vmatmul.mubr.msk.f32.gmra.mrb[2].mxu1 %vm308_vm2, %v2508_v57  ;;  %v276_v2 = vmul.f32 %v2997_v55, %v261_v62  ;;  %v275_v5 = vmul.f32 %v3009_v60, %v262_v63  ;;  %v3184_v57 = vrot.slane %v2572_v42, %v2893_v11  ;;  %v2565_v11 = vld [vmem:[%s3746_s1 + $0xe8] sm:$0xff]  ;;  %v2566_v62 = vld [vmem:[%s3746_s1 + $0xf0] sm:$0xff]  ;;  %v2567_v63 = vld [vmem:[%s3746_s1 + $0xf8] sm:$0xff] }
  0xa0   : > { %756 = vmatprep.mubr.f32.mxu0 %v3752_v0  ;;  %801 = vmatpush1.msra.mxu0 %v2843_v1  ;;  %v2531_v1 = vld [vmem:[%s3746_s1 + $0x70] sm:$0xff] }
  0xa1   : > { %936 = vmatprep.subr.mxu0 %v918_v58  ;;  %397 = vmatprep.mubr.f32.mxu1 %v3752_v0  ;;  %v1308_v43 = vpop.permute.xlu1 %1307  ;;  %v1306_v44 = vpop.permute.xlu0 %1305  ;;  %3765 = vst [vmem:[#allocation5_spill] sm:$0xff] %v3184_v57 }
  0xa2   : > { %422 = vmatprep.subr.mxu1 %v276_v2  ;;  %v1311_v49 = vsel %vm1309_vm8, %v1308_v43, %v1306_v44  ;;  %v1310_v58 = vsel %vm1309_vm8, %v1306_v44, %v1308_v43  ;;  %v2573_v2 = vld [vmem:[%s3746_s1 + $0x100] sm:$0xff] }
  0xa3   : > { %2534 = vmatmul.mubr.msk.f32.gmra.mrb[2].mxu0 %vm308_vm2, %v2530_v3  ;;  %2513 = vmatmul.mubr.msk.f32.gmra.mrb[4].mxu1 %vm308_vm2, %v2509_v4  ;;  %v1326_v56 = vmul.f32 %v3157_v48, %v1311_v49  ;;  %v1325_v59 = vmul.f32 %v3184_v57, %v1310_v58  ;;  %v2574_v3 = vld [vmem:[%s3746_s1 + $0x108] sm:$0xff]  ;;  %v2575_v4 = vld [vmem:[%s3746_s1 + $0x110] sm:$0xff] }
  0xa4   : > { %762 = vmatprep.mubr.f32.mxu0 %v3752_v0  ;;  %403 = vmatprep.mubr.f32.mxu1 %v3752_v0 }
  0xa5   : > { %423 = vmatpush1.msra.mxu1 %v275_v5  ;;  %v2576_v5 = vld [vmem:[%s3746_s1 + $0x118] sm:$0xff] }
  0xa7   : > { %2535 = vmatmul.mubr.msk.f32.gmra.mrb[4].mxu0 %vm308_vm2, %v2531_v1  ;;  %2514 = vmatmul.mubr.msk.f32.gmra.mrb[6].mxu1 %vm308_vm2, %v2510_v6 }
  0xa8   : > { %768 = vmatprep.mubr.f32.mxu0 %v3752_v0  ;;  %486 = vmatprep.mubr.f32.mxu1 %v3752_v0 }
  0xab   : > { %2536 = vmatmul.mubr.msk.f32.gmra.mrb[6].mxu0 %vm308_vm2, %v2532_v8  ;;  %2515 = vmatmul.mubr.msk.f32.vlgmr.msra.gmra.mrb[0].mxu1 %vm308_vm2, %v277_v13 }
  0xac   : > { %864 = vmatprep.mubr.f32.mxu0 %v3752_v0  ;;  %492 = vmatprep.mubr.f32.mxu1 %v3752_v0 }
  0xaf   : > { %2541 = vmatmul.mubr.msk.f32.vlgmr.msra.gmra.mrb[0].mxu0 %vm308_vm2, %v2537_v22  ;;  %2516 = vmatmul.mubr.msk.f32.gmra.mrb[2].mxu1 %vm308_vm2, %v278_v23 }
  0xb0   : > { %870 = vmatprep.mubr.f32.mxu0 %v3752_v0  ;;  %937 = vmatpush1.msra.mxu0 %v917_v21 }
  0xb1   : > { %1072 = vmatprep.subr.mxu0 %v1054_v24  ;;  %498 = vmatprep.mubr.f32.mxu1 %v3752_v0 }
  0xb2   : > { %v1448_v23 = vpop.permute.xlu0 %1447  ;;  %v1453_v32 = vpop.permute.xlu1 %1452 }
  0xb3   : > { %2542 = vmatmul.mubr.msk.f32.gmra.mrb[2].mxu0 %vm308_vm2, %v2538_v25  ;;  %2517 = vmatmul.mubr.msk.f32.gmra.mrb[4].mxu1 %vm308_vm2, %v279_v26 }
  0xb4   : > { %876 = vmatprep.mubr.f32.mxu0 %v3752_v0  ;;  %504 = vmatprep.mubr.f32.mxu1 %v3752_v0 }
  0xb7   : > { %2543 = vmatmul.mubr.msk.f32.gmra.mrb[4].mxu0 %vm308_vm2, %v2539_v27  ;;  %2518 = vmatmul.mubr.msk.f32.gmra.mrb[6].mxu1 %vm308_vm2, %v280_v28 }
  0xb8   : > { %882 = vmatprep.mubr.f32.mxu0 %v3752_v0  ;;  %1608 = vmatprep.mubr.f32.mxu1 %v3752_v0 }
  0xbb   : > { %2544 = vmatmul.mubr.msk.f32.gmra.mrb[6].mxu0 %vm308_vm2, %v2540_v30 }
  0xbc   : > { %1000 = vmatprep.mubr.f32.mxu0 %v3752_v0 }
  0xbf   : > { %2550 = vmatmul.mubr.msk.f32.vlgmr.msra.gmra.mrb[0].mxu0 %vm308_vm2, %v2546_v40 }
  0xc0   : > { %1006 = vmatprep.mubr.f32.mxu0 %v3752_v0  ;;  %1073 = vmatpush1.msra.mxu0 %v1053_v35 }
  0xc1   : > { %1208 = vmatprep.subr.mxu0 %v1190_v36 }
  0xc3   : > { %2551 = vmatmul.mubr.msk.f32.gmra.mrb[2].mxu0 %vm308_vm2, %v2547_v37 }
  0xc4   : > { %1012 = vmatprep.mubr.f32.mxu0 %v3752_v0 }
  0xc7   : > { %2552 = vmatmul.mubr.msk.f32.gmra.mrb[4].mxu0 %vm308_vm2, %v2548_v41 }
  0xc8   : > { %1018 = vmatprep.mubr.f32.mxu0 %v3752_v0 }
  0xcb   : > { %2553 = vmatmul.mubr.msk.f32.gmra.mrb[6].mxu0 %vm308_vm2, %v2549_v45 }
  0xcc   : > { %1136 = vmatprep.mubr.f32.mxu0 %v3752_v0 }
  0xcf   : > { %2559 = vmatmul.mubr.msk.f32.vlgmr.msra.gmra.mrb[0].mxu0 %vm308_vm2, %v2555_v54 }
  0xd0   : > { %1142 = vmatprep.mubr.f32.mxu0 %v3752_v0  ;;  %1209 = vmatpush1.msra.mxu0 %v1189_v50  ;;  %v1458_v50 = vpop.permute.xlu1 %1457 }
  0xd1   : > { %1344 = vmatprep.subr.mxu0 %v1326_v56  ;;  %v1463_v56 = vpop.permute.xlu0 %1462 }
  0xd3   : > { %2560 = vmatmul.mubr.msk.f32.gmra.mrb[2].mxu0 %vm308_vm2, %v2556_v12 }
  0xd4   : > { %1148 = vmatprep.mubr.f32.mxu0 %v3752_v0 }
  0xd7   : > { %2561 = vmatmul.mubr.msk.f32.gmra.mrb[4].mxu0 %vm308_vm2, %v2557_v52 }
  0xd8   : > { %1154 = vmatprep.mubr.f32.mxu0 %v3752_v0 }
  0xdb   : > { %2562 = vmatmul.mubr.msk.f32.gmra.mrb[6].mxu0 %vm308_vm2, %v2558_v53 }
  0xdc   : > { %1272 = vmatprep.mubr.f32.mxu0 %v3752_v0 }
  0xdf   : > { %2568 = vmatmul.mubr.msk.f32.vlgmr.msra.gmra.mrb[0].mxu0 %vm308_vm2, %v2564_v61 }
  0xe0   : > { %1278 = vmatprep.mubr.f32.mxu0 %v3752_v0  ;;  %1345 = vmatpush1.msra.mxu0 %v1325_v59 }
  0xe3   : > { %2569 = vmatmul.mubr.msk.f32.gmra.mrb[2].mxu0 %vm308_vm2, %v2565_v11 }
  0xe4   : > { %1284 = vmatprep.mubr.f32.mxu0 %v3752_v0 }
  0xe7   : > { %2570 = vmatmul.mubr.msk.f32.gmra.mrb[4].mxu0 %vm308_vm2, %v2566_v62 }
  0xe8   : > { %1290 = vmatprep.mubr.f32.mxu0 %v3752_v0 }
  0xeb   : > { %2571 = vmatmul.mubr.msk.f32.gmra.mrb[6].mxu0 %vm308_vm2, %v2567_v63  ;;  %v2427_v63 = vld [vmem:[%s3749_s4] sm:$0x7] }
  0xec   : > { %1408 = vmatprep.mubr.f32.mxu0 %v3752_v0 }
  0xef   : > { %2577 = vmatmul.mubr.msk.f32.vlgmr.msra.gmra.mrb[0].mxu0 %vm308_vm2, %v2573_v2 }
  0xf0   : > { %1414 = vmatprep.mubr.f32.mxu0 %v3752_v0 }
  0xf3   : > { %2578 = vmatmul.mubr.msk.f32.gmra.mrb[2].mxu0 %vm308_vm2, %v2574_v3 }
  0xf4   : > { %1420 = vmatprep.mubr.f32.mxu0 %v3752_v0 }
  0xf7   : > { %2579 = vmatmul.mubr.msk.f32.gmra.mrb[4].mxu0 %vm308_vm2, %v2575_v4 }
  0xf8   : > { %1426 = vmatprep.mubr.f32.mxu0 %v3752_v0 }
  0xfb   : > { %2580 = vmatmul.mubr.msk.f32.gmra.mrb[6].mxu0 %vm308_vm2, %v2576_v5 }
 0x17e   : > { %v488_v1 = vpop.f32.mrb[0].mxu1 }
 0x17f   : > { %v490_v6 = vpop.f32.mrb[1].mxu1 }
 0x182   : > { %v494_v7 = vpop.f32.mrb[2].mxu1 }
 0x183   : > { %v496_v8 = vpop.f32.mrb[3].mxu1 }
 0x186   : > { %v500_v13 = vpop.f32.mrb[4].mxu1 }
 0x187   : > { %v502_v14 = vpop.f32.mrb[5].mxu1 }
 0x18a   : > { %v506_v16 = vpop.f32.mrb[6].mxu1 }
 0x18b   : > { %v508_v21 = vpop.f32.mrb[7].mxu1 }
 0x1c2   : > { %v1410_v22 = vpop.f32.mrb[0].mxu0 }
 0x1c3   : > { %v2674_v24 = vadd.f32 %v1410_v22, %v488_v1  ;;  %v1412_v25 = vpop.f32.mrb[1].mxu0 }
 0x1c4   : > { %v2675_v26 = vadd.f32 %v1412_v25, %v490_v6 }
 0x1c5   : > { %v3230_v27 = vadd.f32 %v2674_v24, %v1448_v23 }
 0x1c6   : > { %v1416_v28 = vpop.f32.mrb[2].mxu0  ;;  %v3252_v47 = vadd.f32 %v2675_v26, %v1448_v23 }
 0x1c7   : > { %v2676_v29 = vadd.f32 %v1416_v28, %v494_v7  ;;  %v1418_v30 = vpop.f32.mrb[3].mxu0  ;;  %1506 = vrot.lane.b32.xlu1 %v3230_v27, %s2787_s7 }
 0x1c8   : > { %v2677_v34 = vadd.f32 %v1418_v30, %v496_v8 }
 0x1c9   : > { %v3234_v35 = vadd.f32 %v2676_v29, %v1453_v32 }
 0x1ca   : > { %v1422_v40 = vpop.f32.mrb[4].mxu0  ;;  %v3258_v49 = vadd.f32 %v2677_v34, %v1453_v32 }
 0x1cb   : > { %v2678_v36 = vadd.f32 %v1422_v40, %v500_v13  ;;  %1508 = vrot.lane.b32.xlu0 %v3234_v35, %s2787_s7  ;;  %v1424_v37 = vpop.f32.mrb[5].mxu0  ;;  %1473 = vrot.lane.b32.xlu1 %v3230_v27, %s2789_s9 }
 0x1cc   : > { %v2679_v41 = vadd.f32 %v1424_v37, %v502_v14 }
 0x1cd   : > { %v3276_v54 = vadd.f32 %v2678_v36, %v1458_v50 }
 0x1ce   : > { %v1428_v42 = vpop.f32.mrb[6].mxu0  ;;  %v3300_v52 = vadd.f32 %v2679_v41, %v1458_v50 }
 0x1cf   : > { %v2680_v43 = vadd.f32 %v1428_v42, %v506_v16  ;;  %1475 = vrot.lane.b32.xlu0 %v3234_v35, %s2789_s9  ;;  %v1430_v44 = vpop.f32.mrb[7].mxu0  ;;  %1689 = vrot.lane.b32.xlu1 %v3230_v27, %s2783_s27 }
 0x1d0   : > { %v2681_v45 = vadd.f32 %v1430_v44, %v508_v21 }
 0x1d1   : > { %v3282_v12 = vadd.f32 %v2680_v43, %v1463_v56 }
 0x1d2   : > { %v3306_v53 = vadd.f32 %v2681_v45, %v1463_v56 }
 0x1d3   : > { %1691 = vrot.lane.b32.xlu0 %v3234_v35, %s2783_s27  ;;  %1799 = vrot.lane.b32.xlu1 %v3230_v27, %s2784_s28 }
 0x1d7   : > { %1801 = vrot.lane.b32.xlu0 %v3234_v35, %s2784_s28  ;;  %1987 = vrot.lane.b32.xlu1 %v3230_v27, %s2785_s29 }
 0x1db   : > { %1989 = vrot.lane.b32.xlu0 %v3234_v35, %s2785_s29  ;;  %1514 = vrot.lane.b32.xlu1 %v3252_v47, %s2787_s7 }
 0x1df   : > { %1516 = vrot.lane.b32.xlu0 %v3258_v49, %s2787_s7  ;;  %1481 = vrot.lane.b32.xlu1 %v3252_v47, %s2789_s9 }
 0x1e3   : > { %1483 = vrot.lane.b32.xlu0 %v3258_v49, %s2789_s9  ;;  %1697 = vrot.lane.b32.xlu1 %v3252_v47, %s2783_s27 }
 0x1e7   : > { %1699 = vrot.lane.b32.xlu0 %v3258_v49, %s2783_s27  ;;  %1807 = vrot.lane.b32.xlu1 %v3252_v47, %s2784_s28 }
 0x1eb   : > { %1809 = vrot.lane.b32.xlu0 %v3258_v49, %s2784_s28  ;;  %1995 = vrot.lane.b32.xlu1 %v3252_v47, %s2785_s29 }
 0x1ef   : > { %1997 = vrot.lane.b32.xlu0 %v3258_v49, %s2785_s29  ;;  %1510 = vrot.lane.b32.xlu1 %v3276_v54, %s2787_s7 }
 0x1f3   : > { %1477 = vrot.lane.b32.xlu1 %v3276_v54, %s2789_s9  ;;  %1512 = vrot.lane.b32.xlu0 %v3282_v12, %s2787_s7 }
 0x1f7   : > { %1693 = vrot.lane.b32.xlu1 %v3276_v54, %s2783_s27  ;;  %1479 = vrot.lane.b32.xlu0 %v3282_v12, %s2789_s9 }
 0x1fb   : > { %1803 = vrot.lane.b32.xlu1 %v3276_v54, %s2784_s28  ;;  %1695 = vrot.lane.b32.xlu0 %v3282_v12, %s2783_s27 }
 0x1ff   : > { %1991 = vrot.lane.b32.xlu1 %v3276_v54, %s2785_s29  ;;  %1805 = vrot.lane.b32.xlu0 %v3282_v12, %s2784_s28 }
 0x203   : > { %1518 = vrot.lane.b32.xlu1 %v3300_v52, %s2787_s7  ;;  %1993 = vrot.lane.b32.xlu0 %v3282_v12, %s2785_s29 }
 0x207   : > { %2097 = vrot.lane.b32.xlu1 %v3230_v27, %s2786_s30  ;;  %1520 = vrot.lane.b32.xlu0 %v3306_v53, %s2787_s7 }
 0x20b   : > { %1485 = vrot.lane.b32.xlu1 %v3300_v52, %s2789_s9  ;;  %2099 = vrot.lane.b32.xlu0 %v3234_v35, %s2786_s30 }
 0x20f   : > { %1701 = vrot.lane.b32.xlu1 %v3300_v52, %s2783_s27  ;;  %1487 = vrot.lane.b32.xlu0 %v3306_v53, %s2789_s9 }
 0x213   : > { %1811 = vrot.lane.b32.xlu1 %v3300_v52, %s2784_s28  ;;  %2107 = vrot.lane.b32.xlu0 %v3258_v49, %s2786_s30 }
 0x217   : > { %1999 = vrot.lane.b32.xlu1 %v3300_v52, %s2785_s29  ;;  %1703 = vrot.lane.b32.xlu0 %v3306_v53, %s2783_s27 }
 0x21b   : > { %2105 = vrot.lane.b32.xlu1 %v3252_v47, %s2786_s30  ;;  %2103 = vrot.lane.b32.xlu0 %v3282_v12, %s2786_s30 }
 0x21f   : > { %2101 = vrot.lane.b32.xlu1 %v3276_v54, %s2786_s30  ;;  %1813 = vrot.lane.b32.xlu0 %v3306_v53, %s2784_s28  ;;  %s251_s28 = scalar_lea.vmem %s3751_s6, %s2601_s23 }
 0x223   : > { %2109 = vrot.lane.b32.xlu1 %v3300_v52, %s2786_s30  ;;  %2209 = vrot.lane.b32.xlu0 %v3234_v35, %s2788_s8 }
 0x227   : > { %2207 = vrot.lane.b32.xlu1 %v3230_v27, %s2788_s8  ;;  %2217 = vrot.lane.b32.xlu0 %v3258_v49, %s2788_s8 }
 0x22b   : > { %2215 = vrot.lane.b32.xlu1 %v3252_v47, %s2788_s8  ;;  %2213 = vrot.lane.b32.xlu0 %v3282_v12, %s2788_s8 }
 0x22f   : > { %2211 = vrot.lane.b32.xlu1 %v3276_v54, %s2788_s8  ;;  %2001 = vrot.lane.b32.xlu0 %v3306_v53, %s2785_s29 }
 0x233   : > { %2219 = vrot.lane.b32.xlu1 %v3300_v52, %s2788_s8  ;;  %2319 = vrot.lane.b32.xlu0 %v3234_v35, %s2790_s10 }
 0x237   : > { %2317 = vrot.lane.b32.xlu1 %v3230_v27, %s2790_s10  ;;  %2111 = vrot.lane.b32.xlu0 %v3306_v53, %s2786_s30 }
 0x239   : > { %v1507_v58 = vpop.permute.xlu1 %1506 }
 0x23b   : > { %2325 = vrot.lane.b32.xlu1 %v3252_v47, %s2790_s10  ;;  %2327 = vrot.lane.b32.xlu0 %v3258_v49, %s2790_s10 }
 0x23d   : > { %v3364_v59 = vpop.permute.xlu1 %1473  ;;  %v1509_v61 = vpop.permute.xlu0 %1508 }
 0x23f   : > { %2321 = vrot.lane.b32.xlu1 %v3276_v54, %s2790_s10  ;;  %2221 = vrot.lane.b32.xlu0 %v3306_v53, %s2788_s8 }
 0x241   : > { %v3370_v11 = vpop.permute.xlu1 %1689  ;;  %v3372_v62 = vpop.permute.xlu0 %1475 }
 0x243   : > { %2329 = vrot.lane.b32.xlu1 %v3300_v52, %s2790_s10  ;;  %2323 = vrot.lane.b32.xlu0 %v3282_v12, %s2790_s10 }
 0x245   : > { %v1800_v2 = vpop.permute.xlu1 %1799  ;;  %v3381_v3 = vpop.permute.xlu0 %1691 }
 0x247   : > { %2430 = vperm.xlu1 %2773, %v2427_v63   ;;  %2331 = vrot.lane.b32.xlu0 %v3306_v53, %s2790_s10 }
 0x249   : > { %v1988_v4 = vpop.permute.xlu1 %1987  ;;  %v1802_v5 = vpop.permute.xlu0 %1801 }
 0x24d   : > { %v1515_v1 = vpop.permute.xlu1 %1514  ;;  %v1990_v6 = vpop.permute.xlu0 %1989 }
 0x24e   : > { %v1522_v7 = vsel %vm285_vm3, %v1507_v58, %v1515_v1  ;;  %v1526_v8 = vsel %vm285_vm3, %v1515_v1, %v1507_v58 }
 0x24f   : > { %v1530_v22 = vmul.f32 %v1526_v8, %v2955_v39  ;;  %v1531_v23 = vmul.f32 %v1522_v7, %v2952_v38 }
 0x251   : > { %v3389_v13 = vpop.permute.xlu1 %1481  ;;  %v1517_v14 = vpop.permute.xlu0 %1516 }
 0x252   : > { %v1523_v16 = vsel %vm285_vm3, %v1509_v61, %v1517_v14  ;;  %v1527_v21 = vsel %vm285_vm3, %v1517_v14, %v1509_v61 }
 0x253   : > { %v1532_v24 = vmul.f32 %v1527_v21, %v2955_v39  ;;  %v1533_v25 = vmul.f32 %v1523_v16, %v2952_v38 }
 0x255   : > { %v2604_v26 = vpack.c.bf16 %v1532_v24, %v1530_v22  ;;  %v3399_v28 = vpop.permute.xlu1 %1697  ;;  %v1484_v29 = vpop.permute.xlu0 %1483  ;;  %v2602_v30 = vpack.c.bf16 %v1533_v25, %v1531_v23 }
 0x256   : > { %v1709_v32 = vsel %vm515_vm0, %v3399_v28, %v3370_v11 }
 0x257   : > { %2603 = vmatprep.subr.bf16.mxu1 %v2602_v30  ;;  %v3409_v37 = vmul.f32 %v1709_v32, %v2912_v19 }
 0x258   : > { %2605 = vmatpush1.bf16.msra.mxu1 %v2604_v26 }
 0x259   : > { %v1808_v34 = vpop.permute.xlu1 %1807  ;;  %v1700_v40 = vpop.permute.xlu0 %1699 }
 0x25a   : > { %v1710_v36 = vsel %vm515_vm0, %v1700_v40, %v3381_v3  ;;  %v1815_v42 = vsel %vm651_vm1, %v1800_v2, %v1808_v34  ;;  %v1819_v43 = vsel %vm651_vm1, %v1808_v34, %v1800_v2 }
 0x25b   : > { %v3412_v41 = vmul.f32 %v1710_v36, %v2912_v19  ;;  %v3425_v61 = vmul.f32 %v1819_v43, %v2915_v20  ;;  %v3428_v63 = vmul.f32 %v1815_v42, %v2906_v17 }
 0x25d   : > { %v1996_v45 = vpop.permute.xlu1 %1995  ;;  %v1810_v50 = vpop.permute.xlu0 %1809 }
 0x25e   : > { %v1816_v56 = vsel %vm651_vm1, %v1802_v5, %v1810_v50  ;;  %v1820_v58 = vsel %vm651_vm1, %v1810_v50, %v1802_v5  ;;  %v2003_v7 = vsel %vm901_vm4, %v1988_v4, %v1996_v45  ;;  %v2007_v8 = vsel %vm901_vm4, %v1996_v45, %v1988_v4 }
 0x25f   : > { %v3431_v1 = vmul.f32 %v1820_v58, %v2915_v20  ;;  %v3434_v2 = vmul.f32 %v1816_v56, %v2906_v17  ;;  %v3449_v24 = vmul.f32 %v2003_v7, %v3049_v9  ;;  %v3452_v25 = vmul.f32 %v2007_v8, %v2983_v51 }
 0x260   : > { %v1490_v8 = vsel %vm260_vm5, %v3372_v62, %v1484_v29  ;;  %v1494_v5 = vsel %vm260_vm5, %v1484_v29, %v3372_v62  ;;  %v1493_v62 = vsel %vm260_vm5, %v3389_v13, %v3364_v59 }
 0x261   : > { %v1511_v14 = vpop.permute.xlu1 %1510  ;;  %v1998_v16 = vpop.permute.xlu0 %1997  ;;  %v1500_v21 = vmul.f32 %v1490_v8, %v2997_v55 }
 0x262   : > { %v2004_v22 = vsel %vm901_vm4, %v1990_v6, %v1998_v16  ;;  %v2008_v23 = vsel %vm901_vm4, %v1998_v16, %v1990_v6 }
 0x263   : > { %v3455_v4 = vmul.f32 %v2004_v22, %v3049_v9  ;;  %v3458_v26 = vmul.f32 %v2008_v23, %v2983_v51  ;;  %v1489_v23 = vsel %vm260_vm5, %v3364_v59, %v3389_v13 }
 0x264   : > { %v1498_v29 = vmul.f32 %v1489_v23, %v2997_v55 }
 0x265   : > { %v1478_v32 = vpop.permute.xlu1 %1477  ;;  %v1513_v34 = vpop.permute.xlu0 %1512 }
 0x269   : > { %v1694_v36 = vpop.permute.xlu1 %1693  ;;  %v1480_v42 = vpop.permute.xlu0 %1479 }
 0x26d   : > { %v3464_v43 = vpop.permute.xlu1 %1803  ;;  %v3466_v45 = vpop.permute.xlu0 %1695 }
 0x271   : > { %v3468_v50 = vpop.permute.xlu1 %1991  ;;  %v3470_v56 = vpop.permute.xlu0 %1805 }
 0x275   : > { %v1519_v58 = vpop.permute.xlu1 %1518  ;;  %v3472_v7 = vpop.permute.xlu0 %1993 }
 0x276   : > { %v1524_v16 = vsel %vm285_vm3, %v1511_v14, %v1519_v58  ;;  %v1528_v22 = vsel %vm285_vm3, %v1519_v58, %v1511_v14 }
 0x277   : > { %v1534_v58 = vmul.f32 %v1528_v22, %v2955_v39  ;;  %v1535_v0 = vmul.f32 %v1524_v16, %v2952_v38 }
 0x279   : > { %v3485_v30 = vpop.permute.xlu1 %2097  ;;  %v1521_v6 = vpop.permute.xlu0 %1520 }
 0x27a   : > { %v1525_v44 = vsel %vm285_vm3, %v1513_v34, %v1521_v6  ;;  %v1529_v14 = vsel %vm285_vm3, %v1521_v6, %v1513_v34  ;;  %v1499_v6 = vmul.f32 %v1494_v5, %v3009_v60 }
 0x27b   : > { %v1536_v57 = vmul.f32 %v1529_v14, %v2955_v39  ;;  %v1537_v48 = vmul.f32 %v1525_v44, %v2952_v38  ;;  %v1706_v39 = vsel %vm515_vm0, %v3381_v3, %v1700_v40  ;;  %v2610_v38 = vpack.c.bf16 %v1500_v21, %v1498_v29 }
 0x27c   : > { %v1497_v44 = vmul.f32 %v1493_v62, %v3009_v60  ;;  %v1716_v5 = vmul.f32 %v1706_v39, %v2909_v18 }
 0x27d   : > { %v2608_v8 = vpack.c.bf16 %v1536_v57, %v1534_v58  ;;  %v1486_v46 = vpop.permute.xlu1 %1485  ;;  %v3504_v33 = vpop.permute.xlu0 %2099  ;;  %v2606_v34 = vpack.c.bf16 %v1537_v48, %v1535_v0  ;;  %v2581_v0 = vld [vmem:[%s3748_s3 + $0x4] sm:$0x7]  ;;  %v1705_v48 = vsel %vm515_vm0, %v3370_v11, %v3399_v28  ;;  %v3766_v28 = vmov 0.0  }
 0x27e   : > { %v1491_v59 = vsel %vm260_vm5, %v1478_v32, %v1486_v46  ;;  %v1495_v57 = vsel %vm260_vm5, %v1486_v46, %v1478_v32  ;;  %v2612_v40 = vpack.c.bf16 %v1499_v6, %v1497_v44  ;;  %v1714_v23 = vmul.f32 %v1705_v48, %v2909_v18 }
 0x27f   : > { %2607 = vmatprep.subr.bf16.mxu1 %v2606_v34  ;;  %v1501_v32 = vmul.f32 %v1495_v57, %v3009_v60  ;;  %v1502_v16 = vmul.f32 %v1491_v59, %v2997_v55 }
 0x280   : > { %2609 = vmatpush1.bf16.msra.mxu1 %v2608_v8  ;;  %v2618_v29 = vpack.c.bf16 %v1716_v5, %v1714_v23 }
 0x281   : > { %v1702_v3 = vpop.permute.xlu1 %1701  ;;  %2611 = vmatprep.subr.bf16.mxu1 %v2610_v38  ;;  %v1488_v13 = vpop.permute.xlu0 %1487 }
 0x282   : > { %v1492_v46 = vsel %vm260_vm5, %v1480_v42, %v1488_v13  ;;  %v1496_v21 = vsel %vm260_vm5, %v1488_v13, %v1480_v42  ;;  %v1707_v8 = vsel %vm515_vm0, %v1694_v36, %v1702_v3 }
 0x283   : > { %v1503_v22 = vmul.f32 %v1496_v21, %v3009_v60  ;;  %v1504_v11 = vmul.f32 %v1492_v46, %v2997_v55  ;;  %2582 = vmatmul.mubr.msk.f32.vlgmr.msra.gmra.mrb[8].mxu1 %vm1540_vm9, %v2581_v0  ;;  %v1711_v55 = vsel %vm515_vm0, %v1702_v3, %v1694_v36  ;;  %v1505_v60 = vld [vmem:[%s3748_s3] sm:$0x7]  ;;  %v1718_v36 = vmul.f32 %v1707_v8, %v2909_v18 }
 0x284   : > { %2613 = vmatpush1.bf16.msra.mxu1 %v2612_v40  ;;  %1682 = vmatprep.mubr.f32.mxu1 %v3766_v28  ;;  %v1717_v44 = vmul.f32 %v1711_v55, %v2912_v19  ;;  %v3767_v0 = vpack.c.bf16 %v3412_v41, %v3409_v37  ;;  %v2584_v37 = vld [vmem:[%s3748_s3 + $0x8] sm:$0x7]  ;;  %v3768_v40 = vpack.c.bf16 %v3434_v2, %v3428_v63 }
 0x285   : > { %v2616_v14 = vpack.c.bf16 %v1503_v22, %v1501_v32  ;;  %v1812_v58 = vpop.permute.xlu1 %1811  ;;  %v3534_v62 = vpop.permute.xlu0 %2107  ;;  %v2614_v42 = vpack.c.bf16 %v1504_v11, %v1502_v16  ;;  %v3769_v63 = vpack.c.bf16 %v3431_v1, %v3425_v61  ;;  %v2636_v1 = vpack.c.bf16 %v3234_v35, %v3230_v27 }
 0x287   : > { %2615 = vmatprep.subr.bf16.mxu1 %v2614_v42  ;;  %v2640_v42 = vpack.c.bf16 %v3282_v12, %v3276_v54  ;;  %v2118_v54 = vsel %vm1037_vm6, %v3534_v62, %v3504_v33 }
 0x288   : > { %2617 = vmatpush1.bf16.msra.mxu1 %v2616_v14  ;;  %v2634_v14 = vpack.c.bf16 %v3258_v49, %v3252_v47 }
 0x289   : > { %v2000_v34 = vpop.permute.xlu1 %1999  ;;  %2619 = vmatprep.subr.bf16.mxu1 %v2618_v29  ;;  %v1704_v6 = vpop.permute.xlu0 %1703 }
 0x28a   : > { %v1708_v39 = vsel %vm515_vm0, %v3466_v45, %v1704_v6  ;;  %v1712_v38 = vsel %vm515_vm0, %v1704_v6, %v3466_v45  ;;  %v2005_v29 = vsel %vm901_vm4, %v3468_v50, %v2000_v34  ;;  %v2009_v27 = vsel %vm901_vm4, %v2000_v34, %v3468_v50 }
 0x28b   : > { %v1719_v59 = vmul.f32 %v1712_v38, %v2912_v19  ;;  %v1720_v57 = vmul.f32 %v1708_v39, %v2909_v18  ;;  %2583 = vmatmul.mubr.msk.f32.vlgmr.msra.gmra.mrb[8].mxu1 %vm1540_vm9, %v1505_v60  ;;  %v1817_v19 = vsel %vm651_vm1, %v3464_v43, %v1812_v58  ;;  %v1821_v18 = vsel %vm651_vm1, %v1812_v58, %v3464_v43 }
 0x28c   : > { %2621 = vmatpush1.bf16.msra.mxu1 %v3767_v0  ;;  %1790 = vmatprep.mubr.f32.mxu1 %v3766_v28  ;;  %v1827_v21 = vmul.f32 %v1821_v18, %v2915_v20  ;;  %v1828_v32 = vmul.f32 %v1817_v19, %v2906_v17  ;;  %v2638_v58 = vpack.c.bf16 %v3306_v53, %v3300_v52  ;;  %v2588_v52 = vld [vmem:[%s3748_s3 + $0x10] sm:$0x7]  ;;  %v2590_v0 = vld [vmem:[%s3748_s3 + $0x14] sm:$0x7] }
 0x28d   : > { %v2624_v48 = vpack.c.bf16 %v1719_v59, %v1717_v44  ;;  %v2106_v3 = vpop.permute.xlu1 %2105  ;;  %v3558_v13 = vpop.permute.xlu0 %2103  ;;  %v2622_v45 = vpack.c.bf16 %v1720_v57, %v1718_v36  ;;  %v3770_v53 = vpack.c.bf16 %v3458_v26, %v3452_v25  ;;  %v2015_v8 = vmul.f32 %v2005_v29, %v3049_v9 }
 0x28e   : > { %v2117_v35 = vsel %vm1037_vm6, %v2106_v3, %v3485_v30  ;;  %v2113_v55 = vsel %vm1037_vm6, %v3485_v30, %v2106_v3  ;;  %v2016_v6 = vmul.f32 %v2009_v27, %v2983_v51  ;;  %v2114_v30 = vsel %vm1037_vm6, %v3504_v33, %v3534_v62 }
 0x28f   : > { %2623 = vmatprep.subr.bf16.mxu1 %v2622_v45  ;;  %v2122_v25 = vmul.f32 %v2117_v35, %v3060_v15  ;;  %v3771_v38 = vpack.c.bf16 %v3455_v4, %v3449_v24  ;;  %v2121_v44 = vmul.f32 %v2113_v55, %v3109_v31  ;;  %v2123_v33 = vmul.f32 %v2114_v30, %v3109_v31 }
 0x290   : > { %2625 = vmatpush1.bf16.msra.mxu1 %v2624_v48 }
 0x291   : > { %v3569_v41 = vpop.permute.xlu1 %2101  ;;  %2627 = vmatprep.subr.bf16.mxu1 %v3768_v40  ;;  %v1814_v5 = vpop.permute.xlu0 %1813  ;;  %v2652_v48 = vpack.c.bf16 %v2123_v33, %v2121_v44 }
 0x292   : > { %v1818_v46 = vsel %vm651_vm1, %v3470_v56, %v1814_v5  ;;  %v1822_v43 = vsel %vm651_vm1, %v1814_v5, %v3470_v56 }
 0x293   : > { %v1829_v16 = vmul.f32 %v1822_v43, %v2915_v20  ;;  %v1830_v22 = vmul.f32 %v1818_v46, %v2906_v17  ;;  %2585 = vmatmul.mubr.msk.f32.vlgmr.msra.gmra.mrb[8].mxu1 %vm1540_vm9, %v2584_v37  ;;  %v2586_v17 = vld [vmem:[%s3748_s3 + $0xc] sm:$0x7]  ;;  %v3772_v46 = vld [vmem:[#allocation2_spill] sm:$0xff] }
 0x294   : > { %2629 = vmatpush1.bf16.msra.mxu1 %v3769_v63  ;;  %1900 = vmatprep.mubr.f32.mxu1 %v3766_v28 }
 0x295   : > { %v2632_v2 = vpack.c.bf16 %v1829_v16, %v1827_v21  ;;  %v2110_v11 = vpop.permute.xlu1 %2109  ;;  %v3589_v23 = vpop.permute.xlu0 %2209  ;;  %v2630_v56 = vpack.c.bf16 %v1830_v22, %v1828_v32 }
 0x296   : > { %v2115_v57 = vsel %vm1037_vm6, %v3569_v41, %v2110_v11  ;;  %v2119_v24 = vsel %vm1037_vm6, %v2110_v11, %v3569_v41 }
 0x297   : > { %2631 = vmatprep.subr.bf16.mxu1 %v2630_v56  ;;  %v2125_v3 = vmul.f32 %v2115_v57, %v3109_v31  ;;  %v2126_v5 = vmul.f32 %v2119_v24, %v3060_v15 }
 0x298   : > { %2633 = vmatpush1.bf16.msra.mxu1 %v2632_v2 }
 0x299   : > { %v2208_v20 = vpop.permute.xlu1 %2207  ;;  %2635 = vmatprep.subr.bf16.mxu1 %v2634_v14  ;;  %v2218_v61 = vpop.permute.xlu0 %2217 }
 0x29a   : > { %v2228_v18 = vsel %vm1173_vm7, %v2218_v61, %v3589_v23  ;;  %v2224_v16 = vsel %vm1173_vm7, %v3589_v23, %v2218_v61 }
 0x29b   : > { %2587 = vmatmul.mubr.msk.f32.vlgmr.msra.gmra.mrb[8].mxu1 %vm1540_vm9, %v2586_v17  ;;  %v2234_v22 = vmul.f32 %v2228_v18, %v3772_v46 }
 0x29c   : > { %2637 = vmatpush1.bf16.msra.mxu1 %v2636_v1  ;;  %1978 = vmatprep.mubr.f32.mxu1 %v3766_v28  ;;  %v2592_v1 = vld [vmem:[%s3748_s3 + $0x18] sm:$0x7] }
 0x29d   : > { %v2216_v47 = vpop.permute.xlu1 %2215  ;;  %2639 = vmatprep.subr.bf16.mxu1 %v2638_v58  ;;  %v3602_v49 = vpop.permute.xlu0 %2213 }
 0x29e   : > { %v2227_v4 = vsel %vm1173_vm7, %v2216_v47, %v2208_v20  ;;  %v2223_v37 = vsel %vm1173_vm7, %v2208_v20, %v2216_v47 }
 0x29f   : > { %v2232_v43 = vmul.f32 %v2227_v4, %v3772_v46 }
 0x2a0   : > { %2641 = vmatpush1.bf16.msra.mxu1 %v2640_v42 }
 0x2a1   : > { %v2212_v12 = vpop.permute.xlu1 %2211  ;;  %2643 = vmatprep.subr.bf16.mxu1 %v3770_v53  ;;  %v2002_v50 = vpop.permute.xlu0 %2001  ;;  %v2658_v23 = vpack.c.bf16 %v2234_v22, %v2232_v43  ;;  %v3774_v53 = vld [vmem:[#allocation4_spill] sm:$0xff] }
 0x2a2   : > { %v2006_v60 = vsel %vm901_vm4, %v3472_v7, %v2002_v50  ;;  %v2010_v34 = vsel %vm901_vm4, %v2002_v50, %v3472_v7  ;;  %v2124_v7 = vmul.f32 %v2118_v54, %v3060_v15 }
 0x2a3   : > { %v2017_v26 = vmul.f32 %v2006_v60, %v3049_v9  ;;  %v2018_v39 = vmul.f32 %v2010_v34, %v2983_v51  ;;  %2589 = vmatmul.mubr.msk.f32.vlgmr.msra.gmra.mrb[8].mxu1 %vm1540_vm9, %v2588_v52 }
 0x2a4   : > { %2645 = vmatpush1.bf16.msra.mxu1 %v3771_v38  ;;  %2088 = vmatprep.mubr.f32.mxu1 %v3766_v28  ;;  %v2650_v62 = vpack.c.bf16 %v2124_v7, %v2122_v25 }
 0x2a5   : > { %v2648_v9 = vpack.c.bf16 %v2017_v26, %v2015_v8  ;;  %v2220_v36 = vpop.permute.xlu1 %2219  ;;  %v2320_v51 = vpop.permute.xlu0 %2319  ;;  %v2646_v59 = vpack.c.bf16 %v2018_v39, %v2016_v6  ;;  %v3775_v39 = vld [vmem:[#allocation5_spill] sm:$0xff] }
 0x2a7   : > { %2647 = vmatprep.subr.bf16.mxu1 %v2646_v59 }
 0x2a8   : > { %2649 = vmatpush1.bf16.msra.mxu1 %v2648_v9  ;;  %v2594_v9 = vld [vmem:[%s3748_s3 + $0x1c] sm:$0x7] }
 0x2a9   : > { %v2318_v45 = vpop.permute.xlu1 %2317  ;;  %2651 = vmatprep.subr.bf16.mxu1 %v2650_v62  ;;  %v2112_v19 = vpop.permute.xlu0 %2111 }
 0x2aa   : > { %v2116_v41 = vsel %vm1037_vm6, %v3558_v13, %v2112_v19  ;;  %v2120_v40 = vsel %vm1037_vm6, %v2112_v19, %v3558_v13  ;;  %v3773_v13 = vld [vmem:[#allocation3_spill] sm:$0xff] }
 0x2ab   : > { %v2127_v21 = vmul.f32 %v2116_v41, %v3109_v31  ;;  %v2128_v32 = vmul.f32 %v2120_v40, %v3060_v15  ;;  %2591 = vmatmul.mubr.msk.f32.vlgmr.msra.gmra.mrb[8].mxu1 %vm1540_vm9, %v2590_v0  ;;  %v2231_v63 = vmul.f32 %v2223_v37, %v3773_v13  ;;  %v2225_v15 = vsel %vm1173_vm7, %v2212_v12, %v2220_v36 }
 0x2ac   : > { %2653 = vmatpush1.bf16.msra.mxu1 %v2652_v48  ;;  %2198 = vmatprep.mubr.f32.mxu1 %v3766_v28  ;;  %v2229_v31 = vsel %vm1173_vm7, %v2220_v36, %v2212_v12  ;;  %v2233_v17 = vmul.f32 %v2224_v16, %v3773_v13  ;;  %v2235_v47 = vmul.f32 %v2225_v15, %v3773_v13 }
 0x2ad   : > { %v2656_v2 = vpack.c.bf16 %v2127_v21, %v2125_v3  ;;  %v2326_v11 = vpop.permute.xlu1 %2325  ;;  %v2328_v56 = vpop.permute.xlu0 %2327  ;;  %v2654_v14 = vpack.c.bf16 %v2128_v32, %v2126_v5  ;;  %v2236_v42 = vmul.f32 %v2229_v31, %v3772_v46 }
 0x2ae   : > { %v2337_v20 = vsel %vm1309_vm8, %v2326_v11, %v2318_v45  ;;  %v2338_v61 = vsel %vm1309_vm8, %v2328_v56, %v2320_v51  ;;  %v2660_v58 = vpack.c.bf16 %v2233_v17, %v2231_v63  ;;  %v2333_v35 = vsel %vm1309_vm8, %v2318_v45, %v2326_v11 }
 0x2af   : > { %2655 = vmatprep.subr.bf16.mxu1 %v2654_v14  ;;  %v2334_v52 = vsel %vm1309_vm8, %v2320_v51, %v2328_v56  ;;  %v2342_v50 = vmul.f32 %v2337_v20, %v3774_v53  ;;  %v2344_v8 = vmul.f32 %v2338_v61, %v3774_v53  ;;  %v2341_v30 = vmul.f32 %v2333_v35, %v3775_v39 }
 0x2b0   : > { %2657 = vmatpush1.bf16.msra.mxu1 %v2656_v2 }
 0x2b1   : > { %v2322_v29 = vpop.permute.xlu1 %2321  ;;  %2659 = vmatprep.subr.bf16.mxu1 %v2658_v23  ;;  %v2222_v27 = vpop.permute.xlu0 %2221  ;;  %v2666_v38 = vpack.c.bf16 %v2344_v8, %v2342_v50 }
 0x2b2   : > { %v2226_v54 = vsel %vm1173_vm7, %v3602_v49, %v2222_v27  ;;  %v2230_v12 = vsel %vm1173_vm7, %v2222_v27, %v3602_v49  ;;  %v2343_v49 = vmul.f32 %v2334_v52, %v3775_v39 }
 0x2b3   : > { %v2237_v55 = vmul.f32 %v2226_v54, %v3773_v13  ;;  %v2238_v60 = vmul.f32 %v2230_v12, %v3772_v46  ;;  %2593 = vmatmul.mubr.msk.f32.vlgmr.msra.gmra.mrb[8].mxu1 %vm1540_vm9, %v2592_v1 }
 0x2b4   : > { %2661 = vmatpush1.bf16.msra.mxu1 %v2660_v58  ;;  %2308 = vmatprep.mubr.f32.mxu1 %v3766_v28  ;;  %v2668_v51 = vpack.c.bf16 %v2343_v49, %v2341_v30 }
 0x2b5   : > { %v2664_v34 = vpack.c.bf16 %v2237_v55, %v2235_v47  ;;  %v2330_v6 = vpop.permute.xlu1 %2329  ;;  %v2324_v25 = vpop.permute.xlu0 %2323  ;;  %v2662_v26 = vpack.c.bf16 %v2238_v60, %v2236_v42 }
 0x2b6   : > { %v2335_v7 = vsel %vm1309_vm8, %v2322_v29, %v2330_v6  ;;  %v2339_v44 = vsel %vm1309_vm8, %v2330_v6, %v2322_v29 }
 0x2b7   : > { %2663 = vmatprep.subr.bf16.mxu1 %v2662_v26  ;;  %v2345_v33 = vmul.f32 %v2335_v7, %v3775_v39  ;;  %v2346_v62 = vmul.f32 %v2339_v44, %v3774_v53 }
 0x2b8   : > { %2665 = vmatpush1.bf16.msra.mxu1 %v2664_v34 }
 0x2b9   : > { %2667 = vmatprep.subr.bf16.mxu1 %v2666_v38  ;;  %v2332_v36 = vpop.permute.xlu0 %2331 }
 0x2ba   : > { %v2336_v59 = vsel %vm1309_vm8, %v2324_v25, %v2332_v36  ;;  %v2340_v57 = vsel %vm1309_vm8, %v2332_v36, %v2324_v25 }
 0x2bb   : > { %v2347_v24 = vmul.f32 %v2336_v59, %v3775_v39  ;;  %v2348_v4 = vmul.f32 %v2340_v57, %v3774_v53  ;;  %2595 = vmatmul.mubr.msk.f32.vlgmr.msra.gmra.mrb[8].mxu1 %vm1540_vm9, %v2594_v9 }
 0x2bc   : > { %2669 = vmatpush1.bf16.msra.mxu1 %v2668_v51  ;;  %2418 = vmatprep.mubr.f32.mxu1 %v3766_v28 }
 0x2bd   : > { %v2672_v0 = vpack.c.bf16 %v2347_v24, %v2345_v33  ;;  %v2670_v48 = vpack.c.bf16 %v2348_v4, %v2346_v62 }
 0x2bf   : > { %2671 = vmatprep.subr.bf16.mxu1 %v2670_v48 }
 0x2c0   : > { %2673 = vmatpush1.bf16.msra.mxu1 %v2672_v0 }
 0x2c3   : > { %2597 = vmatmul.mubr.msk.f32.vlgmr.msra.gmra.mrb[8].mxu1 %vm1540_vm9, %v2596_v10 }
 0x2c6   : > { %v2431_v3 = vpop.permute.xlu1 %2430 }
 0x396   : > { %v2420_v45 = vpop.f32.mrb[8].mxu1 }
 0x397   : > { %v2433_v19 = vadd.f32 %v2431_v3, %v2420_v45  ;;  %v2422_v18 = vpop.f32.mrb[9].mxu1 }
 0x398   : > { %v2434_v37 = vadd.f32 %v2431_v3, %v2422_v18 }
 0x399   : > { %v2435_v41 = vmax.f32 %v2433_v19, 0.0 }
 0x39a   : > { %v2436_v40 = vmax.f32 %v2434_v37, 0.0 }
 0x39c   : > { %v2439_v28 = vcombine.low %v2435_v41, %v2436_v40 }
 0x39e   : > { %2441 = vst [vmem:[%s251_s28] sm:$0x77] %v2439_v28 }
 0x39f PF: > { %s16_s21 = sadd.s32 1, %s2780_s21  }
 0x3a0   : > { %p13_p4 = scmp.ge.s32.totalorder %s16_s21, 4  }
 0x3a2   :  { %15 = sbr.rel (!%p13_p4) target bundleno = 1 (0x1), region = 97 }

// kernel: _forward.1
= control target key start
LH: loop header
LB: loop body
LE: loop exit
PB: predicated region body
PF: predicated region fallthrough
CT: control target
= control target key end

     0   :  { %s2915_s21 = smov 0   ;;  %s3700_s0 = inlined_call_operand.vmem [shape: f32[2,8,256], index: 0, kind: input, shape index: {}]   ;;  %s3701_s1 = inlined_call_operand.vmem [shape: f32[9,32,8], index: 1, kind: input, shape index: {}]   ;;  %s3702_s2 = inlined_call_operand.vmem [shape: f32[32,1], index: 2, kind: input, shape index: {}]   ;;  %s3703_s3 = inlined_call_operand.vmem [shape: f32[9,3,32], index: 3, kind: input, shape index: {}]   ;;  %s3704_s4 = inlined_call_operand.vmem [shape: f32[3,1], index: 4, kind: input, shape index: {}]   ;;  %s3705_s5 = inlined_call_operand.vmem [shape: f32[9,1,256], index: 5, kind: input, shape index: {}]   ;;  %s3706_s6 = inlined_call_operand.vmem [shape: f32[2,3,256], index: 6, kind: output, shape index: {}]  }
   0x1 LB: > { %s2585_s22 = sadd.s32 4294967295, %s2868_s21   ;;  %p2589_p0 = scmp.ge.s32.totalorder %s2868_s21, 1  ;;  %s2868_s21 = sphi %s2915_s21, %s16_s21  }
   0x2   : > { %p212_p1 = scmp.lt.s32.totalorder %s2868_s21, 3 }
   0x4   : > { %p213_p2 = pnand %p2589_p0, %p212_p1 }
   0x5   : > { %p242_p3 = scmp.lt.s32.totalorder (!%p213_p2), %s2585_s22, 1  ;;  %v2870_v0 = vmov (!%p213_p2), 0.0   ;;  %s2871_s27 = smov (!%p213_p2), 1   ;;  %v1457_v3 = vld [vmem:[%s3702_s2] sm:$0xff] (!%p213_p2)  ;;  %v1458_v4 = vld [vmem:[%s3702_s2 + $0x8] sm:$0xff] (!%p213_p2)  ;;  %v267_v5 = vlaneseq (!%p213_p2)  ;;  %v2879_v6 = vmov (!%p213_p2), 0  }
   0x6   : > { %216 = sbr.rel (%p213_p2) target bundleno = 921 (0x399), region = 44  ;;  %620 = vmatprep.mubr.f32.mxu0 (!%p213_p2), %v2870_v0  ;;  %389 = vmatprep.mubr.f32.mxu1 (!%p213_p2), %v2870_v0  ;;  %s2872_s28 = smov (!%p213_p2), 15   ;;  %v1460_v7 = vld [vmem:[%s3702_s2 + $0x18] sm:$0xff] (!%p213_p2)  ;;  %v1459_v8 = vld [vmem:[%s3702_s2 + $0x10] sm:$0xff] (!%p213_p2)  ;;  %v2616_v12 = vld [vmem:[%s3705_s5 + $0x6] sm:$0x3] (!%p213_p2) }
   0x7   : > { %s2873_s29 = smov (!%p213_p2), 127   ;;  %s2874_s30 = smov (!%p213_p2), 113   ;;  %2860 = vset.pattern.permute.xlu0 (!%p213_p2), %v2879_v6  ;;  %2861 = vset.pattern.permute.xlu1 (!%p213_p2), %v2879_v6  ;;  %v268_v9 = vshrl.u32 (!%p213_p2), %v267_v5, 7  ;;  %v2607_v15 = vld [vmem:[%s3705_s5 + $0x4] sm:$0x3] (!%p213_p2)  ;;  %vm657_vm0 = vcmask (!%p213_p2), 7168  }
   0x8   : > { %s2875_s7 = smov (!%p213_p2), 16   ;;  %s2876_s8 = smov (!%p213_p2), 112   ;;  %vm519_vm1 = vcmask (!%p213_p2), 121856   ;;  %vm312_vm2 = vcmask (!%p213_p2), 64512   ;;  %v2608_v30 = vld [vmem:[%s3701_s1 + $0x40] sm:$0xff] (!%p213_p2)  ;;  %v2609_v33 = vld [vmem:[%s3701_s1 + $0x48] sm:$0xff] (!%p213_p2) }
   0x9   : > { %s2877_s9 = smov (!%p213_p2), 17   ;;  %s2878_s10 = smov (!%p213_p2), 111   ;;  %v2979_v10 = vsub.s32 (!%p213_p2), 1, %v268_v9  ;;  %v2981_v11 = vsub.s32 (!%p213_p2), 0, %v268_v9  ;;  %v2594_v34 = vld [vmem:[%s3705_s5 + $0x2] sm:$0x3] (!%p213_p2) }
   0xa   : > { %vm287_vm3 = vcmask (!%p213_p2), 130048   ;;  %v2610_v39 = vld [vmem:[%s3701_s1 + $0x50] sm:$0xff] (!%p213_p2)  ;;  %v2633_v42 = vld [vmem:[%s3705_s5 + $0xa] sm:$0x3] (!%p213_p2)  ;;  %vm909_vm4 = vcmask (!%p213_p2), 1039360   ;;  %v2611_v47 = vld [vmem:[%s3701_s1 + $0x58] sm:$0xff] (!%p213_p2) }
   0xb   : > { %v2990_v16 = vrot.slane (!%p213_p2), %v2616_v12, %v2979_v10  ;;  %v2993_v17 = vrot.slane (!%p213_p2), %v2607_v15, %v2979_v10  ;;  %v2996_v18 = vrot.slane (!%p213_p2), %v2616_v12, %v2981_v11  ;;  %v2999_v19 = vrot.slane (!%p213_p2), %v2607_v15, %v2981_v11  ;;  %v2595_v48 = vld [vmem:[%s3701_s1 + $0x20] sm:$0xff] (!%p213_p2)  ;;  %v2596_v56 = vld [vmem:[%s3701_s1 + $0x28] sm:$0xff] (!%p213_p2)  ;;  %v2598_v5 = vld [vmem:[%s3701_s1 + $0x38] sm:$0xff] (!%p213_p2) }
   0xc   : > { %v3031_v37 = vrot.slane (!%p213_p2), %v2594_v34, %v2979_v10  ;;  %v3034_v38 = vrot.slane (!%p213_p2), %v2594_v34, %v2981_v11  ;;  %v265_v49 = vld [vmem:[%s3705_s5] sm:$0x3] (!%p213_p2)  ;;  %v3059_v50 = vrot.slane (!%p213_p2), %v2633_v42, %v2979_v10  ;;  %vm260_vm5 = vcmask (!%p213_p2), 138240   ;;  %v2642_v6 = vld [vmem:[%s3705_s5 + $0xc] sm:$0x3] (!%p213_p2) }
   0xd   : > { %s3708_s22 = smov (!%p242_p3, %s2585_s22), 1  ;;  %v3070_v54 = vrot.slane %v265_v49, %v2979_v10  ;;  %v2617_v55 = vld [vmem:[%s3701_s1 + $0x60] sm:$0xff]  ;;  %v3082_v59 = vrot.slane %v265_v49, %v2981_v11  ;;  %vm1047_vm6 = vcmask 924672   ;;  %vm1185_vm7 = vcmask 916480  }
   0xe   : > { %s2688_s23 = sshll.u32 %s3708_s22, 4  ;;  %v279_v9 = vld [vmem:[%s3701_s1] sm:$0xff]  ;;  %vm1323_vm8 = vcmask 908288   ;;  %vm1580_vm9 = vcmask 261120  }
   0xf   : > { %s246_s26 = scalar_lea.vmem %s3700_s0, %s2688_s23  ;;  %v2634_v34 = vld [vmem:[%s3701_s1 + $0xa0] sm:$0xff]  ;;  %s2689_s23 = sshll.u32 %s3708_s22, 3 }
  0x10   : > { %v2931_v1 = vld [vmem:[%s246_s26] sm:$0xff]  ;;  %v2937_v2 = vld [vmem:[%s246_s26 + $0x8] sm:$0xff] }
  0x11   : > { %653 = vrot.lane.b32.xlu1 %v2931_v1, %s2871_s27  ;;  %515 = vrot.lane.b32.xlu0 %v2931_v1, %s2872_s28 }
  0x15   : > { %655 = vrot.lane.b32.xlu1 %v2937_v2, %s2871_s27  ;;  %517 = vrot.lane.b32.xlu0 %v2937_v2, %s2872_s28 }
  0x19   : > { %907 = vrot.lane.b32.xlu0 %v2937_v2, %s2873_s29  ;;  %905 = vrot.lane.b32.xlu1 %v2931_v1, %s2873_s29 }
  0x1d   : > { %1045 = vrot.lane.b32.xlu0 %v2937_v2, %s2874_s30  ;;  %1043 = vrot.lane.b32.xlu1 %v2931_v1, %s2874_s30 }
  0x21   : > { %285 = vrot.lane.b32.xlu1 %v2937_v2, %s2875_s7  ;;  %283 = vrot.lane.b32.xlu0 %v2931_v1, %s2875_s7 }
  0x25   : > { %1183 = vrot.lane.b32.xlu0 %v2937_v2, %s2876_s8  ;;  %1181 = vrot.lane.b32.xlu1 %v2931_v1, %s2876_s8 }
  0x29   : > { %258 = vrot.lane.b32.xlu1 %v2937_v2, %s2877_s9  ;;  %256 = vrot.lane.b32.xlu0 %v2931_v1, %s2877_s9 }
  0x2d   : > { %1321 = vrot.lane.b32.xlu0 %v2937_v2, %s2878_s10  ;;  %1319 = vrot.lane.b32.xlu1 %v2931_v1, %s2878_s10 }
  0x31   : > { %1463 = vperm.xlu0 %2860, %v1457_v3   ;;  %1468 = vperm.xlu1 %2861, %v1458_v4   ;;  %v2597_v3 = vld [vmem:[%s3701_s1 + $0x30] sm:$0xff] }
  0x35   : > { %1478 = vperm.xlu0 %2860, %v1460_v7   ;;  %1473 = vperm.xlu1 %2861, %v1459_v8   ;;  %v2620_v7 = vld [vmem:[%s3701_s1 + $0x78] sm:$0xff]  ;;  %v3119_v8 = vrot.slane %v2633_v42, %v2981_v11 }
  0x36   : > { %v2637_v42 = vld [vmem:[%s3701_s1 + $0xb8] sm:$0xff] }
  0x83   : > { %v654_v13 = vpop.permute.xlu1 %653  ;;  %v516_v14 = vpop.permute.xlu0 %515 }
  0x84   : > { %v661_v20 = vsel %vm657_vm0, 0.0, %v654_v13  ;;  %v523_v21 = vsel %vm519_vm1, 0.0, %v516_v14 }
  0x85   : > { %v675_v28 = vmul.f32 %v2996_v18, %v661_v20  ;;  %v537_v29 = vmul.f32 %v2999_v19, %v523_v21  ;;  %v2625_v20 = vld [vmem:[%s3701_s1 + $0x80] sm:$0xff]  ;;  %v280_v21 = vld [vmem:[%s3701_s1 + $0x8] sm:$0xff] }
  0x87   : > { %v656_v22 = vpop.permute.xlu1 %655  ;;  %v518_v23 = vpop.permute.xlu0 %517 }
  0x88   : > { %v658_v24 = vsel %vm657_vm0, %v654_v13, %v656_v22  ;;  %v520_v25 = vsel %vm519_vm1, %v516_v14, %v518_v23  ;;  %v3129_v13 = vrot.slane %v2642_v6, %v2979_v10  ;;  %v2626_v23 = vld [vmem:[%s3701_s1 + $0x88] sm:$0xff] }
  0x89   : > { %v676_v26 = vmul.f32 %v2990_v16, %v658_v24  ;;  %v538_v27 = vmul.f32 %v2993_v17, %v520_v25  ;;  %v281_v24 = vld [vmem:[%s3701_s1 + $0x10] sm:$0xff] }
  0x8a   : > { %v2627_v25 = vld [vmem:[%s3701_s1 + $0x90] sm:$0xff] }
  0x8b   : > { %556 = vmatprep.subr.mxu0 %v538_v27  ;;  %v3012_v31 = vpop.permute.xlu0 %907  ;;  %v3014_v32 = vpop.permute.xlu1 %905  ;;  %v2651_v27 = vld [vmem:[%s3705_s5 + $0xe] sm:$0x3] }
  0x8c   : > { %557 = vmatpush1.msra.mxu0 %v537_v29  ;;  %v913_v53 = vsel %vm909_vm4, %v3012_v31, 0.0  ;;  %v910_v12 = vsel %vm909_vm4, %v3014_v32, %v3012_v31  ;;  %v3175_v29 = vrot.slane %v2642_v6, %v2981_v11  ;;  %v3182_v31 = vrot.slane %v2651_v27, %v2979_v10 }
  0x8d   : > { %2612 = vmatmul.mubr.msk.f32.vlgmr.msra.gmra.mrb[0].mxu0 %vm312_vm2, %v2608_v30  ;;  %694 = vmatprep.subr.mxu0 %v676_v26  ;;  %v928_v57 = vmul.f32 %v3059_v50, %v913_v53  ;;  %v927_v15 = vmul.f32 %v3119_v8, %v910_v12  ;;  %v282_v26 = vld [vmem:[%s3701_s1 + $0x18] sm:$0xff] }
  0x8e   : > { %695 = vmatpush1.msra.mxu0 %v675_v28  ;;  %626 = vmatprep.mubr.f32.mxu0 %v2870_v0  ;;  %v2628_v28 = vld [vmem:[%s3701_s1 + $0x98] sm:$0xff] }
  0x8f   : > { %808 = vmatprep.subr.mxu0 %v2937_v2  ;;  %v3025_v35 = vpop.permute.xlu0 %1045  ;;  %v3027_v36 = vpop.permute.xlu1 %1043  ;;  %v2618_v2 = vld [vmem:[%s3701_s1 + $0x68] sm:$0xff]  ;;  %v2646_v53 = vld [vmem:[%s3701_s1 + $0xd8] sm:$0xff] }
  0x90   : > { %v1051_v14 = vsel %vm1047_vm6, %v3025_v35, 0.0  ;;  %v1048_v30 = vsel %vm1047_vm6, %v3027_v36, %v3025_v35  ;;  %v2635_v35 = vld [vmem:[%s3701_s1 + $0xa8] sm:$0xff]  ;;  %v2636_v36 = vld [vmem:[%s3701_s1 + $0xb0] sm:$0xff] }
  0x91   : > { %2613 = vmatmul.mubr.msk.f32.gmra.mrb[2].mxu0 %vm312_vm2, %v2609_v33  ;;  %v1066_v22 = vmul.f32 %v3129_v13, %v1051_v14  ;;  %v1065_v33 = vmul.f32 %v3175_v29, %v1048_v30 }
  0x92   : > { %632 = vmatprep.mubr.f32.mxu0 %v2870_v0 }
  0x93   : > { %v286_v40 = vpop.permute.xlu1 %285  ;;  %v284_v41 = vpop.permute.xlu0 %283 }
  0x94   : > { %v291_v43 = vsel %vm287_vm3, 0.0, %v284_v41  ;;  %v288_v44 = vsel %vm287_vm3, %v284_v41, %v286_v40  ;;  %v2660_v40 = vld [vmem:[%s3705_s5 + $0x10] sm:$0x3] }
  0x95   : > { %2614 = vmatmul.mubr.msk.f32.gmra.mrb[4].mxu0 %vm312_vm2, %v2610_v39  ;;  %v306_v45 = vmul.f32 %v3031_v37, %v288_v44  ;;  %v305_v46 = vmul.f32 %v3034_v38, %v291_v43  ;;  %v3212_v43 = vrot.slane %v2651_v27, %v2981_v11 }
  0x96   : > { %638 = vmatprep.mubr.f32.mxu0 %v2870_v0 }
  0x97   : > { %325 = vmatprep.subr.mxu1 %v306_v45  ;;  %v3061_v51 = vpop.permute.xlu0 %1183  ;;  %v3063_v52 = vpop.permute.xlu1 %1181  ;;  %v3218_v45 = vrot.slane %v2660_v40, %v2979_v10  ;;  %v2644_v10 = vld [vmem:[%s3701_s1 + $0xc8] sm:$0xff] }
  0x98   : > { %326 = vmatpush1.msra.mxu1 %v305_v46  ;;  %v1189_v32 = vsel %vm1185_vm7, %v3061_v51, 0.0  ;;  %v1186_v44 = vsel %vm1185_vm7, %v3063_v52, %v3061_v51  ;;  %v2645_v51 = vld [vmem:[%s3701_s1 + $0xd0] sm:$0xff] }
  0x99   : > { %2615 = vmatmul.mubr.msk.f32.gmra.mrb[6].mxu0 %vm312_vm2, %v2611_v47  ;;  %2599 = vmatmul.mubr.msk.f32.vlgmr.msra.gmra.mrb[0].mxu1 %vm312_vm2, %v2595_v48  ;;  %v1204_v39 = vmul.f32 %v3182_v31, %v1189_v32  ;;  %v1203_v47 = vmul.f32 %v3212_v43, %v1186_v44  ;;  %v2643_v48 = vld [vmem:[%s3701_s1 + $0xc0] sm:$0xff] }
  0x9a   : > { %758 = vmatprep.mubr.f32.mxu0 %v2870_v0  ;;  %395 = vmatprep.mubr.f32.mxu1 %v2870_v0 }
  0x9b   : > { %v259_v58 = vpop.permute.xlu1 %258  ;;  %v257_v60 = vpop.permute.xlu0 %256 }
  0x9c   : > { %v261_v61 = vsel %vm260_vm5, %v257_v60, %v259_v58  ;;  %v264_v62 = vsel %vm260_vm5, 0.0, %v257_v60  ;;  %v2652_v58 = vld [vmem:[%s3701_s1 + $0xe0] sm:$0xff]  ;;  %v2654_v60 = vld [vmem:[%s3701_s1 + $0xf0] sm:$0xff] }
  0x9d   : > { %2621 = vmatmul.mubr.msk.f32.vlgmr.msra.gmra.mrb[0].mxu0 %vm312_vm2, %v2617_v55  ;;  %2600 = vmatmul.mubr.msk.f32.gmra.mrb[2].mxu1 %vm312_vm2, %v2596_v56  ;;  %v278_v63 = vmul.f32 %v3070_v54, %v261_v61  ;;  %v277_v4 = vmul.f32 %v3082_v59, %v264_v62  ;;  %v3244_v55 = vrot.slane %v2660_v40, %v2981_v11  ;;  %v2653_v11 = vld [vmem:[%s3701_s1 + $0xe8] sm:$0xff]  ;;  %v2655_v61 = vld [vmem:[%s3701_s1 + $0xf8] sm:$0xff]  ;;  %v2661_v62 = vld [vmem:[%s3701_s1 + $0x100] sm:$0xff] }
  0x9e   : > { %809 = vmatpush1.msra.mxu0 %v2931_v1  ;;  %764 = vmatprep.mubr.f32.mxu0 %v2870_v0  ;;  %v2619_v1 = vld [vmem:[%s3701_s1 + $0x70] sm:$0xff] }
  0x9f   : > { %946 = vmatprep.subr.mxu0 %v928_v57  ;;  %401 = vmatprep.mubr.f32.mxu1 %v2870_v0  ;;  %v1322_v41 = vpop.permute.xlu0 %1321  ;;  %v1320_v52 = vpop.permute.xlu1 %1319 }
  0xa0   : > { %426 = vmatprep.subr.mxu1 %v278_v63  ;;  %v1327_v46 = vsel %vm1323_vm8, %v1322_v41, 0.0  ;;  %v1324_v56 = vsel %vm1323_vm8, %v1320_v52, %v1322_v41  ;;  %v2662_v63 = vld [vmem:[%s3701_s1 + $0x108] sm:$0xff] }
  0xa1   : > { %2622 = vmatmul.mubr.msk.f32.gmra.mrb[2].mxu0 %vm312_vm2, %v2618_v2  ;;  %2601 = vmatmul.mubr.msk.f32.gmra.mrb[4].mxu1 %vm312_vm2, %v2597_v3  ;;  %v1342_v49 = vmul.f32 %v3218_v45, %v1327_v46  ;;  %v1341_v57 = vmul.f32 %v3244_v55, %v1324_v56  ;;  %v2663_v2 = vld [vmem:[%s3701_s1 + $0x110] sm:$0xff]  ;;  %v2664_v3 = vld [vmem:[%s3701_s1 + $0x118] sm:$0xff] }
  0xa2   : > { %770 = vmatprep.mubr.f32.mxu0 %v2870_v0  ;;  %407 = vmatprep.mubr.f32.mxu1 %v2870_v0 }
  0xa3   : > { %427 = vmatpush1.msra.mxu1 %v277_v4 }
  0xa5   : > { %2623 = vmatmul.mubr.msk.f32.gmra.mrb[4].mxu0 %vm312_vm2, %v2619_v1  ;;  %2602 = vmatmul.mubr.msk.f32.gmra.mrb[6].mxu1 %vm312_vm2, %v2598_v5 }
  0xa6   : > { %776 = vmatprep.mubr.f32.mxu0 %v2870_v0  ;;  %490 = vmatprep.mubr.f32.mxu1 %v2870_v0 }
  0xa9   : > { %2624 = vmatmul.mubr.msk.f32.gmra.mrb[6].mxu0 %vm312_vm2, %v2620_v7  ;;  %2603 = vmatmul.mubr.msk.f32.vlgmr.msra.gmra.mrb[0].mxu1 %vm312_vm2, %v279_v9 }
  0xaa   : > { %872 = vmatprep.mubr.f32.mxu0 %v2870_v0  ;;  %496 = vmatprep.mubr.f32.mxu1 %v2870_v0 }
  0xad   : > { %2629 = vmatmul.mubr.msk.f32.vlgmr.msra.gmra.mrb[0].mxu0 %vm312_vm2, %v2625_v20  ;;  %2604 = vmatmul.mubr.msk.f32.gmra.mrb[2].mxu1 %vm312_vm2, %v280_v21 }
  0xae   : > { %947 = vmatpush1.msra.mxu0 %v927_v15  ;;  %878 = vmatprep.mubr.f32.mxu0 %v2870_v0 }
  0xaf   : > { %1084 = vmatprep.subr.mxu0 %v1066_v22  ;;  %502 = vmatprep.mubr.f32.mxu1 %v2870_v0 }
  0xb0   : > { %v1464_v22 = vpop.permute.xlu0 %1463 }
  0xb1   : > { %2630 = vmatmul.mubr.msk.f32.gmra.mrb[2].mxu0 %vm312_vm2, %v2626_v23  ;;  %2605 = vmatmul.mubr.msk.f32.gmra.mrb[4].mxu1 %vm312_vm2, %v281_v24 }
  0xb2   : > { %884 = vmatprep.mubr.f32.mxu0 %v2870_v0  ;;  %508 = vmatprep.mubr.f32.mxu1 %v2870_v0 }
  0xb5   : > { %2631 = vmatmul.mubr.msk.f32.gmra.mrb[4].mxu0 %vm312_vm2, %v2627_v25  ;;  %2606 = vmatmul.mubr.msk.f32.gmra.mrb[6].mxu1 %vm312_vm2, %v282_v26 }
  0xb6   : > { %890 = vmatprep.mubr.f32.mxu0 %v2870_v0  ;;  %1648 = vmatprep.mubr.f32.mxu1 %v2870_v0 }
  0xb9   : > { %2632 = vmatmul.mubr.msk.f32.gmra.mrb[6].mxu0 %vm312_vm2, %v2628_v28 }
  0xba   : > { %1010 = vmatprep.mubr.f32.mxu0 %v2870_v0 }
  0xbd   : > { %2638 = vmatmul.mubr.msk.f32.vlgmr.msra.gmra.mrb[0].mxu0 %vm312_vm2, %v2634_v34 }
  0xbe   : > { %1085 = vmatpush1.msra.mxu0 %v1065_v33  ;;  %1016 = vmatprep.mubr.f32.mxu0 %v2870_v0 }
  0xbf   : > { %1222 = vmatprep.subr.mxu0 %v1204_v39 }
  0xc1   : > { %2639 = vmatmul.mubr.msk.f32.gmra.mrb[2].mxu0 %vm312_vm2, %v2635_v35 }
  0xc2   : > { %1022 = vmatprep.mubr.f32.mxu0 %v2870_v0 }
  0xc5   : > { %2640 = vmatmul.mubr.msk.f32.gmra.mrb[4].mxu0 %vm312_vm2, %v2636_v36 }
  0xc6   : > { %1028 = vmatprep.mubr.f32.mxu0 %v2870_v0 }
  0xc9   : > { %2641 = vmatmul.mubr.msk.f32.gmra.mrb[6].mxu0 %vm312_vm2, %v2637_v42  ;;  %v1469_v42 = vpop.permute.xlu1 %1468 }
  0xca   : > { %1148 = vmatprep.mubr.f32.mxu0 %v2870_v0 }
  0xcd   : > { %2647 = vmatmul.mubr.msk.f32.vlgmr.msra.gmra.mrb[0].mxu0 %vm312_vm2, %v2643_v48 }
  0xce   : > { %1223 = vmatpush1.msra.mxu0 %v1203_v47  ;;  %1154 = vmatprep.mubr.f32.mxu0 %v2870_v0  ;;  %v1474_v47 = vpop.permute.xlu1 %1473 }
  0xcf   : > { %1360 = vmatprep.subr.mxu0 %v1342_v49 }
  0xd1   : > { %2648 = vmatmul.mubr.msk.f32.gmra.mrb[2].mxu0 %vm312_vm2, %v2644_v10  ;;  %v1479_v10 = vpop.permute.xlu0 %1478 }
  0xd2   : > { %1160 = vmatprep.mubr.f32.mxu0 %v2870_v0 }
  0xd5   : > { %2649 = vmatmul.mubr.msk.f32.gmra.mrb[4].mxu0 %vm312_vm2, %v2645_v51 }
  0xd6   : > { %1166 = vmatprep.mubr.f32.mxu0 %v2870_v0 }
  0xd9   : > { %2650 = vmatmul.mubr.msk.f32.gmra.mrb[6].mxu0 %vm312_vm2, %v2646_v53 }
  0xda   : > { %1286 = vmatprep.mubr.f32.mxu0 %v2870_v0 }
  0xdd   : > { %2656 = vmatmul.mubr.msk.f32.vlgmr.msra.gmra.mrb[0].mxu0 %vm312_vm2, %v2652_v58 }
  0xde   : > { %1361 = vmatpush1.msra.mxu0 %v1341_v57  ;;  %1292 = vmatprep.mubr.f32.mxu0 %v2870_v0 }
  0xe1   : > { %2657 = vmatmul.mubr.msk.f32.gmra.mrb[2].mxu0 %vm312_vm2, %v2653_v11 }
  0xe2   : > { %1298 = vmatprep.mubr.f32.mxu0 %v2870_v0 }
  0xe5   : > { %2658 = vmatmul.mubr.msk.f32.gmra.mrb[4].mxu0 %vm312_vm2, %v2654_v60 }
  0xe6   : > { %1304 = vmatprep.mubr.f32.mxu0 %v2870_v0 }
  0xe9   : > { %2659 = vmatmul.mubr.msk.f32.gmra.mrb[6].mxu0 %vm312_vm2, %v2655_v61  ;;  %v2515_v61 = vld [vmem:[%s3704_s4] sm:$0x7] }
  0xea   : > { %1424 = vmatprep.mubr.f32.mxu0 %v2870_v0 }
  0xed   : > { %2665 = vmatmul.mubr.msk.f32.vlgmr.msra.gmra.mrb[0].mxu0 %vm312_vm2, %v2661_v62 }
  0xee   : > { %1430 = vmatprep.mubr.f32.mxu0 %v2870_v0 }
  0xf1   : > { %2666 = vmatmul.mubr.msk.f32.gmra.mrb[2].mxu0 %vm312_vm2, %v2662_v63 }
  0xf2   : > { %1436 = vmatprep.mubr.f32.mxu0 %v2870_v0 }
  0xf5   : > { %2667 = vmatmul.mubr.msk.f32.gmra.mrb[4].mxu0 %vm312_vm2, %v2663_v2 }
  0xf6   : > { %1442 = vmatprep.mubr.f32.mxu0 %v2870_v0 }
  0xf9   : > { %2668 = vmatmul.mubr.msk.f32.gmra.mrb[6].mxu0 %vm312_vm2, %v2664_v3 }
 0x17c   : > { %v492_v4 = vpop.f32.mrb[0].mxu1 }
 0x17d   : > { %v494_v1 = vpop.f32.mrb[1].mxu1 }
 0x180   : > { %v498_v5 = vpop.f32.mrb[2].mxu1 }
 0x181   : > { %v500_v6 = vpop.f32.mrb[3].mxu1 }
 0x184   : > { %v504_v7 = vpop.f32.mrb[4].mxu1 }
 0x185   : > { %v506_v9 = vpop.f32.mrb[5].mxu1 }
 0x188   : > { %v510_v12 = vpop.f32.mrb[6].mxu1 }
 0x189   : > { %v512_v14 = vpop.f32.mrb[7].mxu1 }
 0x1c0   : > { %v1426_v15 = vpop.f32.mrb[0].mxu0 }
 0x1c1   : > { %v2762_v20 = vadd.f32 %v1426_v15, %v492_v4  ;;  %v1428_v21 = vpop.f32.mrb[1].mxu0 }
 0x1c2   : > { %v2763_v23 = vadd.f32 %v1428_v21, %v494_v1 }
 0x1c3   : > { %v3289_v24 = vadd.f32 %v2762_v20, %v1464_v22 }
 0x1c4   : > { %v3291_v25 = vadd.f32 %v2763_v23, %v1464_v22  ;;  %v1432_v26 = vpop.f32.mrb[2].mxu0 }
 0x1c5   : > { %v2764_v27 = vadd.f32 %v1432_v26, %v498_v5  ;;  %v1434_v28 = vpop.f32.mrb[3].mxu0  ;;  %1538 = vrot.lane.b32.xlu1 %v3289_v24, %s2875_s7 }
 0x1c6   : > { %v2765_v30 = vadd.f32 %v1434_v28, %v500_v6  ;;  %1540 = vrot.lane.b32.xlu0 %v3291_v25, %s2875_s7 }
 0x1c7   : > { %v3309_v44 = vadd.f32 %v2764_v27, %v1469_v42 }
 0x1c8   : > { %v1438_v32 = vpop.f32.mrb[4].mxu0  ;;  %v3315_v46 = vadd.f32 %v2765_v30, %v1469_v42 }
 0x1c9   : > { %v2766_v33 = vadd.f32 %v1438_v32, %v504_v7  ;;  %v1440_v34 = vpop.f32.mrb[5].mxu0  ;;  %1497 = vrot.lane.b32.xlu1 %v3289_v24, %s2877_s9 }
 0x1ca   : > { %v2767_v39 = vadd.f32 %v1440_v34, %v506_v9  ;;  %1499 = vrot.lane.b32.xlu0 %v3291_v25, %s2877_s9 }
 0x1cb   : > { %v3337_v48 = vadd.f32 %v2766_v33, %v1474_v47 }
 0x1cc   : > { %v1444_v35 = vpop.f32.mrb[6].mxu0  ;;  %v3339_v49 = vadd.f32 %v2767_v39, %v1474_v47 }
 0x1cd   : > { %v2768_v36 = vadd.f32 %v1444_v35, %v510_v12  ;;  %v1446_v40 = vpop.f32.mrb[7].mxu0  ;;  %1729 = vrot.lane.b32.xlu1 %v3289_v24, %s2872_s28 }
 0x1ce   : > { %v2769_v41 = vadd.f32 %v1446_v40, %v512_v14  ;;  %1731 = vrot.lane.b32.xlu0 %v3291_v25, %s2872_s28 }
 0x1cf   : > { %v3357_v51 = vadd.f32 %v2768_v36, %v1479_v10 }
 0x1d0   : > { %v3359_v52 = vadd.f32 %v2769_v41, %v1479_v10 }
 0x1d1   : > { %1847 = vrot.lane.b32.xlu1 %v3289_v24, %s2871_s27 }
 0x1d2   : > { %1849 = vrot.lane.b32.xlu0 %v3291_v25, %s2871_s27 }
 0x1d5   : > { %2043 = vrot.lane.b32.xlu1 %v3289_v24, %s2873_s29 }
 0x1d6   : > { %2047 = vrot.lane.b32.xlu0 %v3309_v44, %s2873_s29 }
 0x1d9   : > { %2045 = vrot.lane.b32.xlu1 %v3291_v25, %s2873_s29 }
 0x1da   : > { %1544 = vrot.lane.b32.xlu0 %v3315_v46, %s2875_s7 }
 0x1dd   : > { %1542 = vrot.lane.b32.xlu1 %v3309_v44, %s2875_s7 }
 0x1de   : > { %1503 = vrot.lane.b32.xlu0 %v3315_v46, %s2877_s9 }
 0x1e1   : > { %1501 = vrot.lane.b32.xlu1 %v3309_v44, %s2877_s9 }
 0x1e2   : > { %1735 = vrot.lane.b32.xlu0 %v3315_v46, %s2872_s28 }
 0x1e5   : > { %1733 = vrot.lane.b32.xlu1 %v3309_v44, %s2872_s28 }
 0x1e6   : > { %1853 = vrot.lane.b32.xlu0 %v3315_v46, %s2871_s27 }
 0x1e9   : > { %1851 = vrot.lane.b32.xlu1 %v3309_v44, %s2871_s27 }
 0x1ea   : > { %2049 = vrot.lane.b32.xlu0 %v3315_v46, %s2873_s29 }
 0x1ed   : > { %1546 = vrot.lane.b32.xlu1 %v3337_v48, %s2875_s7 }
 0x1ee   : > { %1548 = vrot.lane.b32.xlu0 %v3339_v49, %s2875_s7 }
 0x1f1   : > { %1505 = vrot.lane.b32.xlu1 %v3337_v48, %s2877_s9 }
 0x1f2   : > { %1507 = vrot.lane.b32.xlu0 %v3339_v49, %s2877_s9 }
 0x1f5   : > { %1737 = vrot.lane.b32.xlu1 %v3337_v48, %s2872_s28 }
 0x1f6   : > { %1739 = vrot.lane.b32.xlu0 %v3339_v49, %s2872_s28 }
 0x1f9   : > { %1855 = vrot.lane.b32.xlu1 %v3337_v48, %s2871_s27 }
 0x1fa   : > { %1857 = vrot.lane.b32.xlu0 %v3339_v49, %s2871_s27 }
 0x1fd   : > { %1550 = vrot.lane.b32.xlu1 %v3357_v51, %s2875_s7 }
 0x1fe   : > { %1552 = vrot.lane.b32.xlu0 %v3359_v52, %s2875_s7 }
 0x201   : > { %2053 = vrot.lane.b32.xlu1 %v3339_v49, %s2873_s29 }
 0x202   : > { %2055 = vrot.lane.b32.xlu0 %v3357_v51, %s2873_s29 }
 0x205   : > { %1509 = vrot.lane.b32.xlu1 %v3357_v51, %s2877_s9 }
 0x206   : > { %1511 = vrot.lane.b32.xlu0 %v3359_v52, %s2877_s9 }
 0x209   : > { %2051 = vrot.lane.b32.xlu1 %v3337_v48, %s2873_s29 }
 0x20a   : > { %2167 = vrot.lane.b32.xlu0 %v3315_v46, %s2874_s30 }
 0x20d   : > { %1741 = vrot.lane.b32.xlu1 %v3357_v51, %s2872_s28 }
 0x20e   : > { %1743 = vrot.lane.b32.xlu0 %v3359_v52, %s2872_s28  ;;  %s251_s28 = scalar_lea.vmem %s3706_s6, %s2689_s23 }
 0x211   : > { %1859 = vrot.lane.b32.xlu1 %v3357_v51, %s2871_s27 }
 0x212   : > { %2165 = vrot.lane.b32.xlu0 %v3309_v44, %s2874_s30 }
 0x215   : > { %2163 = vrot.lane.b32.xlu1 %v3291_v25, %s2874_s30 }
 0x216   : > { %1861 = vrot.lane.b32.xlu0 %v3359_v52, %s2871_s27 }
 0x219   : > { %2161 = vrot.lane.b32.xlu1 %v3289_v24, %s2874_s30 }
 0x21a   : > { %2173 = vrot.lane.b32.xlu0 %v3357_v51, %s2874_s30 }
 0x21d   : > { %2171 = vrot.lane.b32.xlu1 %v3339_v49, %s2874_s30 }
 0x21e   : > { %2285 = vrot.lane.b32.xlu0 %v3315_v46, %s2876_s8 }
 0x221   : > { %2169 = vrot.lane.b32.xlu1 %v3337_v48, %s2874_s30 }
 0x222   : > { %2283 = vrot.lane.b32.xlu0 %v3309_v44, %s2876_s8 }
 0x225   : > { %2281 = vrot.lane.b32.xlu1 %v3291_v25, %s2876_s8 }
 0x226   : > { %2057 = vrot.lane.b32.xlu0 %v3359_v52, %s2873_s29 }
 0x229   : > { %2279 = vrot.lane.b32.xlu1 %v3289_v24, %s2876_s8 }
 0x22a   : > { %2291 = vrot.lane.b32.xlu0 %v3357_v51, %s2876_s8 }
 0x22d   : > { %2289 = vrot.lane.b32.xlu1 %v3339_v49, %s2876_s8 }
 0x22e   : > { %2175 = vrot.lane.b32.xlu0 %v3359_v52, %s2874_s30 }
 0x231   : > { %2287 = vrot.lane.b32.xlu1 %v3337_v48, %s2876_s8 }
 0x232   : > { %2403 = vrot.lane.b32.xlu0 %v3315_v46, %s2878_s10 }
 0x235   : > { %2399 = vrot.lane.b32.xlu1 %v3291_v25, %s2878_s10 }
 0x236   : > { %2293 = vrot.lane.b32.xlu0 %v3359_v52, %s2876_s8 }
 0x237   : > { %v1539_v53 = vpop.permute.xlu1 %1538 }
 0x238   : > { %v1541_v56 = vpop.permute.xlu0 %1540  ;;  %v1566_v6 = vsel %vm287_vm3, 0.0, %v1539_v53 }
 0x239   : > { %2397 = vrot.lane.b32.xlu1 %v3289_v24, %s2878_s10  ;;  %v1554_v7 = vsel %vm287_vm3, %v1539_v53, %v1541_v56  ;;  %v1570_v20 = vmul.f32 %v1566_v6, %v3034_v38 }
 0x23a   : > { %2401 = vrot.lane.b32.xlu0 %v3309_v44, %s2878_s10  ;;  %v1571_v21 = vmul.f32 %v1554_v7, %v3031_v37 }
 0x23b   : > { %v3425_v57 = vpop.permute.xlu1 %1497 }
 0x23c   : > { %v1500_v58 = vpop.permute.xlu0 %1499 }
 0x23d   : > { %2407 = vrot.lane.b32.xlu1 %v3339_v49, %s2878_s10 }
 0x23e   : > { %2411 = vrot.lane.b32.xlu0 %v3359_v52, %s2878_s10 }
 0x23f   : > { %v3431_v11 = vpop.permute.xlu1 %1729 }
 0x240   : > { %v3433_v60 = vpop.permute.xlu0 %1731 }
 0x241   : > { %2405 = vrot.lane.b32.xlu1 %v3337_v48, %s2878_s10 }
 0x242   : > { %2409 = vrot.lane.b32.xlu0 %v3357_v51, %s2878_s10 }
 0x243   : > { %v3442_v62 = vpop.permute.xlu1 %1847 }
 0x244   : > { %v3444_v63 = vpop.permute.xlu0 %1849 }
 0x245   : > { %2518 = vperm.xlu1 %2861, %v2515_v61  }
 0x247   : > { %v2044_v2 = vpop.permute.xlu1 %2043 }
 0x248   : > { %v2048_v3 = vpop.permute.xlu0 %2047 }
 0x24b   : > { %v3446_v4 = vpop.permute.xlu1 %2045 }
 0x24c   : > { %v2059_v1 = vsel %vm909_vm4, %v2044_v2, %v3446_v4  ;;  %v1545_v5 = vpop.permute.xlu0 %1544 }
 0x24d   : > { %v3467_v36 = vmul.f32 %v2059_v1, %v3119_v8 }
 0x24f   : > { %v1543_v9 = vpop.permute.xlu1 %1542 }
 0x250   : > { %v1555_v12 = vsel %vm287_vm3, %v1543_v9, %v1545_v5  ;;  %v1567_v14 = vsel %vm287_vm3, 0.0, %v1543_v9  ;;  %v1504_v15 = vpop.permute.xlu0 %1503 }
 0x251   : > { %v1572_v22 = vmul.f32 %v1567_v14, %v3034_v38  ;;  %v1573_v23 = vmul.f32 %v1555_v12, %v3031_v37  ;;  %v1513_v14 = vsel %vm260_vm5, %v3425_v57, %v1500_v58 }
 0x252   : > { %v1530_v58 = vmul.f32 %v1513_v14, %v3070_v54 }
 0x253   : > { %v2692_v26 = vpack.c.bf16 %v1572_v22, %v1570_v20  ;;  %v1502_v27 = vpop.permute.xlu1 %1501  ;;  %v2690_v28 = vpack.c.bf16 %v1573_v23, %v1571_v21 }
 0x254   : > { %v1736_v30 = vpop.permute.xlu0 %1735  ;;  %v1526_v22 = vsel %vm260_vm5, 0.0, %v1502_v27 }
 0x255   : > { %2691 = vmatprep.subr.bf16.mxu1 %v2690_v28 }
 0x256   : > { %2693 = vmatpush1.bf16.msra.mxu1 %v2692_v26 }
 0x257   : > { %v1734_v32 = vpop.permute.xlu1 %1733 }
 0x258   : > { %v3458_v33 = vpop.permute.xlu0 %1853 }
 0x25b   : > { %v3460_v34 = vpop.permute.xlu1 %1851 }
 0x25c   : > { %v3462_v39 = vpop.permute.xlu0 %2049 }
 0x25d   : > { %v2060_v35 = vsel %vm909_vm4, %v2048_v3, %v3462_v39  ;;  %v1514_v3 = vsel %vm260_vm5, %v1502_v27, %v1504_v15  ;;  %v1531_v27 = vmul.f32 %v1526_v22, %v3082_v59 }
 0x25e   : > { %v3470_v40 = vmul.f32 %v2060_v35, %v3119_v8  ;;  %v1532_v23 = vmul.f32 %v1514_v3, %v3070_v54 }
 0x25f   : > { %v1547_v41 = vpop.permute.xlu1 %1546 }
 0x260   : > { %v2732_v42 = vpack.c.bf16 %v3470_v40, %v3467_v36  ;;  %v1549_v47 = vpop.permute.xlu0 %1548  ;;  %v1568_v7 = vsel %vm287_vm3, 0.0, %v1547_v41  ;;  %v2698_v3 = vpack.c.bf16 %v1532_v23, %v1530_v58  ;;  %v1758_v23 = vsel %vm519_vm1, 0.0, %v1734_v32 }
 0x261   : > { %v1556_v1 = vsel %vm287_vm3, %v1547_v41, %v1549_v47  ;;  %v1574_v28 = vmul.f32 %v1568_v7, %v3034_v38  ;;  %v1525_v41 = vsel %vm260_vm5, 0.0, %v3425_v57  ;;  %v2669_v57 = vld [vmem:[%s3703_s3 + $0x4] sm:$0x7] }
 0x262   : > { %v1575_v15 = vmul.f32 %v1556_v1, %v3031_v37  ;;  %v1529_v1 = vmul.f32 %v1525_v41, %v3082_v59 }
 0x263   : > { %v1506_v10 = vpop.permute.xlu1 %1505 }
 0x264   : > { %v1508_v53 = vpop.permute.xlu0 %1507 }
 0x267   : > { %v3474_v56 = vpop.permute.xlu1 %1737 }
 0x268   : > { %v1740_v61 = vpop.permute.xlu0 %1739 }
 0x26b   : > { %v3476_v2 = vpop.permute.xlu1 %1855 }
 0x26c   : > { %v3478_v5 = vpop.permute.xlu0 %1857 }
 0x26f   : > { %v1551_v6 = vpop.permute.xlu1 %1550 }
 0x270   : > { %v1569_v9 = vsel %vm287_vm3, 0.0, %v1551_v6  ;;  %v1553_v12 = vpop.permute.xlu0 %1552 }
 0x271   : > { %v1576_v20 = vmul.f32 %v1569_v9, %v3034_v38  ;;  %v1557_v21 = vsel %vm287_vm3, %v1551_v6, %v1553_v12  ;;  %v1515_v38 = vsel %vm260_vm5, %v1506_v10, %v1508_v53  ;;  %v1527_v12 = vsel %vm260_vm5, 0.0, %v1506_v10 }
 0x272   : > { %v1577_v26 = vmul.f32 %v1557_v21, %v3031_v37  ;;  %v1746_v37 = vsel %vm519_vm1, %v1734_v32, %v1736_v30  ;;  %v1745_v21 = vsel %vm519_vm1, %v3431_v11, %v3433_v60  ;;  %v2700_v30 = vpack.c.bf16 %v1531_v27, %v1529_v1 }
 0x273   : > { %v3493_v35 = vpop.permute.xlu1 %2053  ;;  %v2696_v9 = vpack.c.bf16 %v1576_v20, %v1574_v28  ;;  %v1533_v28 = vmul.f32 %v1527_v12, %v3082_v59  ;;  %v1757_v60 = vsel %vm519_vm1, 0.0, %v3431_v11  ;;  %v1762_v32 = vmul.f32 %v1745_v21, %v2993_v17 }
 0x274   : > { %v3498_v47 = vpop.permute.xlu0 %2055  ;;  %v2694_v6 = vpack.c.bf16 %v1577_v26, %v1575_v15  ;;  %v1764_v15 = vmul.f32 %v1746_v37, %v2993_v17  ;;  %v1534_v26 = vmul.f32 %v1515_v38, %v3070_v54  ;;  %v1763_v27 = vmul.f32 %v1758_v23, %v2999_v19  ;;  %v1537_v37 = vld [vmem:[%s3703_s3] sm:$0x7] }
 0x275   : > { %v1747_v1 = vsel %vm519_vm1, %v3474_v56, %v1740_v61  ;;  %v1759_v38 = vsel %vm519_vm1, 0.0, %v3474_v56 }
 0x276   : > { %2695 = vmatprep.subr.bf16.mxu1 %v2694_v6  ;;  %v1766_v56 = vmul.f32 %v1747_v1, %v2993_v17 }
 0x277   : > { %v1510_v7 = vpop.permute.xlu1 %1509  ;;  %2697 = vmatpush1.bf16.msra.mxu1 %v2696_v9  ;;  %v2706_v9 = vpack.c.bf16 %v1764_v15, %v1762_v32 }
 0x278   : > { %v1528_v14 = vsel %vm260_vm5, 0.0, %v1510_v7  ;;  %2699 = vmatprep.subr.bf16.mxu1 %v2698_v3  ;;  %v1512_v20 = vpop.permute.xlu0 %1511  ;;  %v1864_v3 = vsel %vm657_vm0, %v3460_v34, %v3458_v33  ;;  %v1863_v33 = vsel %vm657_vm0, %v3442_v62, %v3444_v63  ;;  %v1875_v63 = vsel %vm657_vm0, 0.0, %v3442_v62  ;;  %v2672_v62 = vld [vmem:[%s3703_s3 + $0x8] sm:$0x7] }
 0x279   : > { %v1535_v53 = vmul.f32 %v1528_v14, %v3082_v59  ;;  %v1516_v22 = vsel %vm260_vm5, %v1510_v7, %v1512_v20  ;;  %v1761_v59 = vmul.f32 %v1757_v60, %v2999_v19  ;;  %v1876_v20 = vsel %vm657_vm0, 0.0, %v3460_v34 }
 0x27a   : > { %v1536_v10 = vmul.f32 %v1516_v22, %v3070_v54  ;;  %2670 = vmatmul.mubr.msk.f32.vlgmr.msra.gmra.mrb[8].mxu1 %vm1580_vm9, %v2669_v57  ;;  %v1882_v21 = vmul.f32 %v1864_v3, %v2990_v16  ;;  %v1880_v23 = vmul.f32 %v1863_v33, %v2990_v16  ;;  %v1865_v60 = vsel %vm657_vm0, %v3476_v2, %v3478_v5 }
 0x27b   : > { %v3520_v41 = vpop.permute.xlu1 %2051  ;;  %2701 = vmatpush1.bf16.msra.mxu1 %v2700_v30  ;;  %1722 = vmatprep.mubr.f32.mxu1 %v2870_v0  ;;  %v2704_v54 = vpack.c.bf16 %v1535_v53, %v1533_v28  ;;  %v2708_v12 = vpack.c.bf16 %v1763_v27, %v1761_v59  ;;  %v1765_v53 = vmul.f32 %v1759_v38, %v2999_v19 }
 0x27c   : > { %v3526_v58 = vpop.permute.xlu0 %2167  ;;  %v2702_v6 = vpack.c.bf16 %v1536_v10, %v1534_v26  ;;  %v1881_v26 = vmul.f32 %v1876_v20, %v2996_v18  ;;  %v2714_v28 = vpack.c.bf16 %v1882_v21, %v1880_v23  ;;  %v1884_v3 = vmul.f32 %v1865_v60, %v2990_v16 }
 0x27d   : > { %v2061_v21 = vsel %vm909_vm4, %v3520_v41, %v3493_v35 }
 0x27e   : > { %2703 = vmatprep.subr.bf16.mxu1 %v2702_v6  ;;  %v1877_v6 = vsel %vm657_vm0, 0.0, %v3476_v2 }
 0x27f   : > { %v1742_v11 = vpop.permute.xlu1 %1741  ;;  %2705 = vmatpush1.bf16.msra.mxu1 %v2704_v54  ;;  %v1883_v1 = vmul.f32 %v1877_v6, %v2996_v18 }
 0x280   : > { %v1760_v7 = vsel %vm519_vm1, 0.0, %v1742_v11  ;;  %2707 = vmatprep.subr.bf16.mxu1 %v2706_v9  ;;  %v1744_v57 = vpop.permute.xlu0 %1743 }
 0x281   : > { %v1767_v61 = vmul.f32 %v1760_v7, %v2999_v19  ;;  %v1748_v14 = vsel %vm519_vm1, %v1742_v11, %v1744_v57  ;;  %v1879_v19 = vmul.f32 %v1875_v63, %v2996_v18  ;;  %v2722_v7 = vpack.c.bf16 %v3315_v46, %v3291_v25 }
 0x282   : > { %v1768_v30 = vmul.f32 %v1748_v14, %v2993_v17  ;;  %2671 = vmatmul.mubr.msk.f32.vlgmr.msra.gmra.mrb[8].mxu1 %vm1580_vm9, %v1537_v37  ;;  %v2072_v57 = vsel %vm909_vm4, %v3462_v39, 0.0  ;;  %v2726_v46 = vpack.c.bf16 %v3359_v52, %v3339_v49 }
 0x283   : > { %v1860_v22 = vpop.permute.xlu1 %1859  ;;  %2709 = vmatpush1.bf16.msra.mxu1 %v2708_v12  ;;  %1838 = vmatprep.mubr.f32.mxu1 %v2870_v0  ;;  %v2712_v10 = vpack.c.bf16 %v1767_v61, %v1765_v53  ;;  %v2716_v54 = vpack.c.bf16 %v1881_v26, %v1879_v19  ;;  %v2071_v12 = vsel %vm909_vm4, %v3446_v4, 0.0  ;;  %v2724_v61 = vpack.c.bf16 %v3309_v44, %v3289_v24 }
 0x284   : > { %v3557_v34 = vpop.permute.xlu0 %2165  ;;  %v2710_v15 = vpack.c.bf16 %v1768_v30, %v1766_v56  ;;  %v1878_v17 = vsel %vm657_vm0, 0.0, %v1860_v22  ;;  %v2078_v25 = vmul.f32 %v2072_v57, %v3059_v50  ;;  %v2076_v14 = vmul.f32 %v2071_v12, %v3059_v50  ;;  %v2676_v56 = vld [vmem:[%s3703_s3 + $0x10] sm:$0x7] }
 0x285   : > { %v1885_v9 = vmul.f32 %v1878_v17, %v2996_v18  ;;  %v2674_v18 = vld [vmem:[%s3703_s3 + $0xc] sm:$0x7]  ;;  %v2073_v4 = vsel %vm909_vm4, %v3493_v35, 0.0  ;;  %v2728_v24 = vpack.c.bf16 %v3357_v51, %v3337_v48  ;;  %v2190_v48 = vsel %vm1047_vm6, %v3526_v58, 0.0 }
 0x286   : > { %2711 = vmatprep.subr.bf16.mxu1 %v2710_v15  ;;  %v2730_v44 = vpack.c.bf16 %v2078_v25, %v2076_v14  ;;  %v2080_v30 = vmul.f32 %v2073_v4, %v3059_v50  ;;  %v2178_v26 = vsel %vm1047_vm6, %v3557_v34, %v3526_v58  ;;  %v2680_v25 = vld [vmem:[%s3703_s3 + $0x18] sm:$0x7] }
 0x287   : > { %v2164_v32 = vpop.permute.xlu1 %2163  ;;  %2713 = vmatpush1.bf16.msra.mxu1 %v2712_v10  ;;  %v2720_v38 = vpack.c.bf16 %v1885_v9, %v1883_v1  ;;  %v2195_v60 = vmul.f32 %v2178_v26, %v3175_v29 }
 0x288   : > { %2715 = vmatprep.subr.bf16.mxu1 %v2714_v28  ;;  %v1862_v27 = vpop.permute.xlu0 %1861  ;;  %v2189_v49 = vsel %vm1047_vm6, %v2164_v32, 0.0 }
 0x289   : > { %v1866_v59 = vsel %vm657_vm0, %v1860_v22, %v1862_v27  ;;  %v2079_v22 = vmul.f32 %v2061_v21, %v3119_v8  ;;  %v2194_v63 = vmul.f32 %v2189_v49, %v3129_v13 }
 0x28a   : > { %v1886_v5 = vmul.f32 %v1866_v59, %v2990_v16  ;;  %2673 = vmatmul.mubr.msk.f32.vlgmr.msra.gmra.mrb[8].mxu1 %vm1580_vm9, %v2672_v62 }
 0x28b   : > { %v2162_v11 = vpop.permute.xlu1 %2161  ;;  %2717 = vmatpush1.bf16.msra.mxu1 %v2716_v54  ;;  %1956 = vmatprep.mubr.f32.mxu1 %v2870_v0 }
 0x28c   : > { %v3577_v2 = vpop.permute.xlu0 %2173  ;;  %v2718_v37 = vpack.c.bf16 %v1886_v5, %v1884_v3  ;;  %v2177_v51 = vsel %vm1047_vm6, %v2162_v11, %v2164_v32 }
 0x28d   : > { %v2193_v17 = vmul.f32 %v2177_v51, %v3175_v29 }
 0x28e   : > { %2719 = vmatprep.subr.bf16.mxu1 %v2718_v37 }
 0x28f   : > { %v2172_v16 = vpop.permute.xlu1 %2171  ;;  %2721 = vmatpush1.bf16.msra.mxu1 %v2720_v38  ;;  %v2740_v32 = vpack.c.bf16 %v2195_v60, %v2193_v17 }
 0x290   : > { %2723 = vmatprep.subr.bf16.mxu1 %v2722_v7  ;;  %v3586_v33 = vpop.permute.xlu0 %2285  ;;  %v2191_v19 = vsel %vm1047_vm6, %v2172_v16, 0.0 }
 0x291   : > { %v2198_v62 = vmul.f32 %v2191_v19, %v3129_v13  ;;  %v2308_v27 = vsel %vm1185_vm7, %v3586_v33, 0.0 }
 0x292   : > { %2675 = vmatmul.mubr.msk.f32.vlgmr.msra.gmra.mrb[8].mxu1 %vm1580_vm9, %v2674_v18 }
 0x293   : > { %v2170_v39 = vpop.permute.xlu1 %2169  ;;  %2725 = vmatpush1.bf16.msra.mxu1 %v2724_v61  ;;  %2034 = vmatprep.mubr.f32.mxu1 %v2870_v0 }
 0x294   : > { %2727 = vmatprep.subr.bf16.mxu1 %v2726_v46  ;;  %v2284_v20 = vpop.permute.xlu0 %2283  ;;  %v2179_v34 = vsel %vm1047_vm6, %v2170_v39, %v2172_v16 }
 0x295   : > { %v2197_v3 = vmul.f32 %v2179_v34, %v3175_v29  ;;  %v2296_v37 = vsel %vm1185_vm7, %v2284_v20, %v3586_v33 }
 0x297   : > { %v2282_v52 = vpop.permute.xlu1 %2281  ;;  %2729 = vmatpush1.bf16.msra.mxu1 %v2728_v24 }
 0x298   : > { %2731 = vmatprep.subr.bf16.mxu1 %v2730_v44  ;;  %v2058_v53 = vpop.permute.xlu0 %2057  ;;  %v2307_v36 = vsel %vm1185_vm7, %v2282_v52, 0.0 }
 0x299   : > { %v2062_v35 = vsel %vm909_vm4, %v3498_v47, %v2058_v53  ;;  %v2074_v41 = vsel %vm909_vm4, %v2058_v53, 0.0  ;;  %v2196_v47 = vmul.f32 %v2190_v48, %v3129_v13  ;;  %v2312_v5 = vmul.f32 %v2307_v36, %v3182_v31 }
 0x29a   : > { %v2081_v23 = vmul.f32 %v2062_v35, %v3119_v8  ;;  %v2082_v15 = vmul.f32 %v2074_v41, %v3059_v50  ;;  %2677 = vmatmul.mubr.msk.f32.vlgmr.msra.gmra.mrb[8].mxu1 %vm1580_vm9, %v2676_v56 }
 0x29b   : > { %v2280_v10 = vpop.permute.xlu1 %2279  ;;  %2733 = vmatpush1.bf16.msra.mxu1 %v2732_v42  ;;  %2152 = vmatprep.mubr.f32.mxu1 %v2870_v0  ;;  %v2738_v58 = vpack.c.bf16 %v2196_v47, %v2194_v63  ;;  %v2678_v42 = vld [vmem:[%s3703_s3 + $0x14] sm:$0x7] }
 0x29c   : > { %v2736_v8 = vpack.c.bf16 %v2081_v23, %v2079_v22  ;;  %v2292_v28 = vpop.permute.xlu0 %2291  ;;  %v2734_v50 = vpack.c.bf16 %v2082_v15, %v2080_v30  ;;  %v2295_v54 = vsel %vm1185_vm7, %v2280_v10, %v2282_v52  ;;  %v2682_v15 = vld [vmem:[%s3703_s3 + $0x1c] sm:$0x7] }
 0x29d   : > { %v2311_v7 = vmul.f32 %v2295_v54, %v3212_v43 }
 0x29e   : > { %2735 = vmatprep.subr.bf16.mxu1 %v2734_v50 }
 0x29f   : > { %v2290_v40 = vpop.permute.xlu1 %2289  ;;  %2737 = vmatpush1.bf16.msra.mxu1 %v2736_v8 }
 0x2a0   : > { %2739 = vmatprep.subr.bf16.mxu1 %v2738_v58  ;;  %v2176_v6 = vpop.permute.xlu0 %2175 }
 0x2a1   : > { %v2180_v9 = vsel %vm1047_vm6, %v3577_v2, %v2176_v6  ;;  %v2192_v59 = vsel %vm1047_vm6, %v2176_v6, 0.0  ;;  %v2314_v2 = vmul.f32 %v2308_v27, %v3182_v31 }
 0x2a2   : > { %v2199_v1 = vmul.f32 %v2180_v9, %v3175_v29  ;;  %v2200_v11 = vmul.f32 %v2192_v59, %v3129_v13  ;;  %2679 = vmatmul.mubr.msk.f32.vlgmr.msra.gmra.mrb[8].mxu1 %vm1580_vm9, %v2678_v42  ;;  %v2313_v29 = vmul.f32 %v2296_v37, %v3212_v43  ;;  %v2309_v13 = vsel %vm1185_vm7, %v2290_v40, 0.0 }
 0x2a3   : > { %v2288_v38 = vpop.permute.xlu1 %2287  ;;  %2741 = vmatpush1.bf16.msra.mxu1 %v2740_v32  ;;  %2270 = vmatprep.mubr.f32.mxu1 %v2870_v0  ;;  %v2746_v12 = vpack.c.bf16 %v2314_v2, %v2312_v5  ;;  %v2316_v20 = vmul.f32 %v2309_v13, %v3182_v31 }
 0x2a4   : > { %v2744_v57 = vpack.c.bf16 %v2199_v1, %v2197_v3  ;;  %v2404_v16 = vpop.permute.xlu0 %2403  ;;  %v2742_v18 = vpack.c.bf16 %v2200_v11, %v2198_v62  ;;  %v2297_v61 = vsel %vm1185_vm7, %v2288_v38, %v2290_v40  ;;  %v2748_v46 = vpack.c.bf16 %v2313_v29, %v2311_v7 }
 0x2a5   : > { %v2426_v4 = vsel %vm1323_vm8, %v2404_v16, 0.0  ;;  %v2315_v21 = vmul.f32 %v2297_v61, %v3212_v43 }
 0x2a6   : > { %2743 = vmatprep.subr.bf16.mxu1 %v2742_v18  ;;  %v2432_v53 = vmul.f32 %v2426_v4, %v3218_v45 }
 0x2a7   : > { %v2400_v33 = vpop.permute.xlu1 %2399  ;;  %2745 = vmatpush1.bf16.msra.mxu1 %v2744_v57 }
 0x2a8   : > { %v2425_v39 = vsel %vm1323_vm8, %v2400_v33, 0.0  ;;  %2747 = vmatprep.subr.bf16.mxu1 %v2746_v12  ;;  %v2294_v14 = vpop.permute.xlu0 %2293 }
 0x2a9   : > { %v2298_v24 = vsel %vm1185_vm7, %v2292_v28, %v2294_v14  ;;  %v2310_v44 = vsel %vm1185_vm7, %v2294_v14, 0.0  ;;  %v2430_v49 = vmul.f32 %v2425_v39, %v3218_v45 }
 0x2aa   : > { %v2317_v52 = vmul.f32 %v2298_v24, %v3212_v43  ;;  %v2318_v56 = vmul.f32 %v2310_v44, %v3182_v31  ;;  %2681 = vmatmul.mubr.msk.f32.vlgmr.msra.gmra.mrb[8].mxu1 %vm1580_vm9, %v2680_v25 }
 0x2ab   : > { %v2398_v30 = vpop.permute.xlu1 %2397  ;;  %2749 = vmatpush1.bf16.msra.mxu1 %v2748_v46  ;;  %2388 = vmatprep.mubr.f32.mxu1 %v2870_v0  ;;  %v2754_v31 = vpack.c.bf16 %v2432_v53, %v2430_v49 }
 0x2ac   : > { %v2752_v48 = vpack.c.bf16 %v2317_v52, %v2315_v21  ;;  %v2413_v51 = vsel %vm1323_vm8, %v2398_v30, %v2400_v33  ;;  %v2402_v35 = vpop.permute.xlu0 %2401  ;;  %v2750_v41 = vpack.c.bf16 %v2318_v56, %v2316_v20 }
 0x2ad   : > { %v2429_v22 = vmul.f32 %v2413_v51, %v3244_v55  ;;  %v2414_v63 = vsel %vm1323_vm8, %v2402_v35, %v2404_v16 }
 0x2ae   : > { %v2431_v43 = vmul.f32 %v2414_v63, %v3244_v55  ;;  %2751 = vmatprep.subr.bf16.mxu1 %v2750_v41 }
 0x2af   : > { %v2408_v23 = vpop.permute.xlu1 %2407  ;;  %2753 = vmatpush1.bf16.msra.mxu1 %v2752_v48 }
 0x2b0   : > { %v2756_v26 = vpack.c.bf16 %v2431_v43, %v2429_v22  ;;  %v2427_v10 = vsel %vm1323_vm8, %v2408_v23, 0.0  ;;  %2755 = vmatprep.subr.bf16.mxu1 %v2754_v31  ;;  %v2412_v47 = vpop.permute.xlu0 %2411 }
 0x2b1   : > { %v2434_v17 = vmul.f32 %v2427_v10, %v3218_v45  ;;  %v2428_v8 = vsel %vm1323_vm8, %v2412_v47, 0.0 }
 0x2b2   : > { %v2436_v28 = vmul.f32 %v2428_v8, %v3218_v45  ;;  %2683 = vmatmul.mubr.msk.f32.vlgmr.msra.gmra.mrb[8].mxu1 %vm1580_vm9, %v2682_v15  ;;  %v2684_v45 = vld [vmem:[%s3703_s3 + $0x20] sm:$0x7] }
 0x2b3   : > { %v2406_v50 = vpop.permute.xlu1 %2405  ;;  %2757 = vmatpush1.bf16.msra.mxu1 %v2756_v26  ;;  %2506 = vmatprep.mubr.f32.mxu1 %v2870_v0 }
 0x2b4   : > { %v2415_v19 = vsel %vm1323_vm8, %v2406_v50, %v2408_v23  ;;  %v2410_v60 = vpop.permute.xlu0 %2409  ;;  %v2758_v58 = vpack.c.bf16 %v2436_v28, %v2434_v17 }
 0x2b5   : > { %v2433_v34 = vmul.f32 %v2415_v19, %v3244_v55  ;;  %v2416_v36 = vsel %vm1323_vm8, %v2410_v60, %v2412_v47 }
 0x2b6   : > { %v2435_v40 = vmul.f32 %v2416_v36, %v3244_v55  ;;  %2759 = vmatprep.subr.bf16.mxu1 %v2758_v58 }
 0x2b8   : > { %v2760_v42 = vpack.c.bf16 %v2435_v40, %v2433_v34 }
 0x2ba   : > { %2761 = vmatpush1.bf16.msra.mxu1 %v2760_v42 }
 0x2bd   : > { %2685 = vmatmul.mubr.msk.f32.vlgmr.msra.gmra.mrb[8].mxu1 %vm1580_vm9, %v2684_v45 }
 0x2c4   : > { %v2519_v0 = vpop.permute.xlu1 %2518 }
 0x390   : > { %v2508_v32 = vpop.f32.mrb[8].mxu1 }
 0x391   : > { %v2521_v62 = vadd.f32 %v2519_v0, %v2508_v32  ;;  %v2510_v6 = vpop.f32.mrb[9].mxu1 }
 0x392   : > { %v2522_v27 = vadd.f32 %v2519_v0, %v2510_v6 }
 0x393   : > { %v2523_v54 = vmax.f32 %v2521_v62, 0.0 }
 0x394   : > { %v2524_v9 = vmax.f32 %v2522_v27, 0.0 }
 0x396   : > { %v2527_v55 = vcombine.low %v2523_v54, %v2524_v9 }
 0x398   : > { %2529 = vst [vmem:[%s251_s28] sm:$0x77] %v2527_v55 }
 0x399 PF: > { %s16_s21 = sadd.s32 1, %s2868_s21  }
 0x39a   : > { %p13_p4 = scmp.ge.s32.totalorder %s16_s21, 4  }
 0x39c   :  { %15 = sbr.rel (!%p13_p4) target bundleno = 1 (0x1), region = 97 }

</bundles_post_ra>
